<compile_context>
chip_gen: v6e
topology: v6e:2x2x1
jax: 0.10.0
libtpu: 0.0.40
codegen_flags: <defaults>
</compile_context>

<pallas_src>
import functools

import jax
import jax.numpy as jnp
from jax.experimental import pallas as pl
from jax.experimental.pallas import tpu as pltpu


def _cross_attention_kernel(x_ref, kin_ref, vin_ref,
                            wq_ref, wk_ref, wv_ref, wp_ref, bp_ref,
                            o_ref,
                            q_scr, m_scr, l_scr, acc_scr,
                            *, num_heads, head_dim):
    # x_ref:   (bb, N,  C)  bf16 query-side tokens for this batch block
    # kin_ref: (bb, tk, C)  bf16 key-side tokens for this KV tile
    # vin_ref: (bb, tk, C)  bf16 value-side tokens for this KV tile
    # wq/wk/wv_ref: (C, D)  bf16 projection weights (wq carries the 1/sqrt(hd) scale)
    # wp_ref:  (D, C)       bf16 output projection weight
    # bp_ref:  (1, C)       f32 output projection bias
    # o_ref:   (bb, N, C)   output (written on the last KV step)
    # q_scr:   (bb*H, N, hd) bf16  per-head query, computed once per batch block
    # m_scr/l_scr: (bb*H, N, 1) f32 online-softmax running max / denom
    # acc_scr: (bb*H, N, hd) f32  un-normalized context accumulator
    bb, N, C = x_ref.shape
    _, tk, _ = kin_ref.shape
    H, hd = num_heads, head_dim
    D = H * hd
    cdt = jnp.bfloat16
    kv = pl.program_id(1)

    @pl.when(kv == 0)
    def _init():
        # Query projection + head split once per batch block (reused over KV tiles).
        x = x_ref[...].reshape(bb * N, C)
        q = jnp.dot(x, wq_ref[...], preferred_element_type=jnp.float32)  # (bb*N, D)
        q = (q.astype(cdt).reshape(bb, N, H, hd)
             .transpose(0, 2, 1, 3).reshape(bb * H, N, hd))
        q_scr[...] = q
        m_scr[...] = jnp.full_like(m_scr, -jnp.inf)
        l_scr[...] = jnp.zeros_like(l_scr)
        acc_scr[...] = jnp.zeros_like(acc_scr)

    # K / V projection + head split for this KV tile (bf16 MXU, f32 accumulate).
    kin = kin_ref[...].reshape(bb * tk, C)
    vin = vin_ref[...].reshape(bb * tk, C)
    k = jnp.dot(kin, wk_ref[...], preferred_element_type=jnp.float32).astype(cdt)
    v = jnp.dot(vin, wv_ref[...], preferred_element_type=jnp.float32).astype(cdt)
    k3 = k.reshape(bb, tk, H, hd).transpose(0, 2, 1, 3).reshape(bb * H, tk, hd)
    v3 = v.reshape(bb, tk, H, hd).transpose(0, 2, 1, 3).reshape(bb * H, tk, hd)

    # Scores for this tile: (bb*H, N, tk), f32.
    s = jnp.einsum('bqd,bkd->bqk', q_scr[...], k3,
                   preferred_element_type=jnp.float32)

    # Online (flash) softmax update; normalization deferred to the final step.
    m_prev = m_scr[...]
    m_new = jnp.maximum(m_prev, jnp.max(s, axis=-1, keepdims=True))
    alpha = jnp.exp(m_prev - m_new)
    p = jnp.exp(s - m_new)
    l_scr[...] = alpha * l_scr[...] + jnp.sum(p, axis=-1, keepdims=True)
    acc_scr[...] = alpha * acc_scr[...] + jnp.einsum(
        'bqk,bkd->bqd', p.astype(cdt), v3, preferred_element_type=jnp.float32)
    m_scr[...] = m_new

    @pl.when(kv == pl.num_programs(1) - 1)
    def _finalize():
        # Normalize after PV (f32), merge heads, output projection.
        ctx = acc_scr[...] * pl.reciprocal(l_scr[...], approx=True)   # (bb*H, N, hd)
        ctx = (ctx.astype(cdt).reshape(bb, H, N, hd)
               .transpose(0, 2, 1, 3).reshape(bb * N, D))
        out = jnp.dot(ctx, wp_ref[...],
                      preferred_element_type=jnp.float32) + bp_ref[...]
        o_ref[...] = out.reshape(bb, N, C).astype(o_ref.dtype)


def _lane_pad(n):
    return max(((n + 127) // 128) * 128, 128)


def _vmem_estimate_bytes(bb, N, tk, C, D, H, hd, out_itemsize):
    """Rough per-step VMEM working-set estimate (lane-padded, bytes)."""
    bf16, f32 = 2, 4
    est = 0
    # Pipelined activation blocks (double-buffered by the BlockSpec pipeline).
    est += 2 * bb * N * _lane_pad(C) * bf16              # x
    est += 2 * bb * N * _lane_pad(C) * out_itemsize      # out
    est += 2 * 2 * bb * tk * _lane_pad(C) * bf16         # kin, vin
    # Weights (count 2x in case the single-buffer request is unavailable).
    est += 2 * ((3 * C * _lane_pad(D) + D * _lane_pad(C)) * bf16
                + _lane_pad(C) * f32)
    # Persistent scratch.
    est += bb * H * N * _lane_pad(hd) * bf16              # q
    est += bb * H * N * _lane_pad(hd) * f32               # acc
    est += 2 * bb * H * N * _lane_pad(1) * f32            # m, l
    # Transient intermediates inside one step.
    est += 2 * bb * H * tk * _lane_pad(hd) * bf16         # k3, v3
    est += 2 * bb * H * N * _lane_pad(tk) * f32           # s, p
    est += bb * N * _lane_pad(D) * f32                    # projected output (f32)
    return est


def _pick_kv_tile(Nk, target=512):
    """Largest KV tile <= target that divides Nk and is a multiple of 8."""
    if Nk <= target:
        return Nk
    best = None
    for t in range(8, min(target, Nk) + 1, 8):
        if Nk % t == 0:
            best = t
    return best if best is not None else Nk


def cross_attention(x, k_in, v_in, params, *, num_heads,
                    batch_block=None, kv_tile=None):
    """Pallas CrossAttention forward.

    x:    (B, N,  C)
    k_in: (B, Nk, C)
    v_in: (B, Nv, C)   (Nk must equal Nv)
    params: wq, wk, wv of shape (C, D); wp of shape (D, C); bp of shape (C,)
    """
    B, N, C = x.shape
    _, Nk, _ = k_in.shape
    _, Nv, _ = v_in.shape
    assert Nk == Nv, "CrossAttention expects matching key/value sequence lengths"
    D = params["wq"].shape[1]
    assert D % num_heads == 0
    head_dim = D // num_heads
    scale = head_dim ** (-0.5)
    cdt = jnp.bfloat16

    # --- KV tile choice (flash tiling along the key axis). ---
    if kv_tile is None:
        kv_tile = _pick_kv_tile(Nk)
    assert Nk % kv_tile == 0 and (kv_tile == Nk or kv_tile % 8 == 0), (
        "kv_tile must divide Nk and be a multiple of 8 (or equal Nk)")
    n_kv = Nk // kv_tile

    # --- VMEM budget (conservative default = v7x-sized if the query fails). ---
    try:
        physical_vmem = int(pltpu.get_tpu_info().vmem_capacity_bytes)
    except Exception:
        physical_vmem = 64 << 20
    budget = min(physical_vmem - (16 << 20), 96 << 20)

    out_itemsize = jnp.dtype(x.dtype).itemsize

    # --- batch_block: largest divisor of B that fits the budget, keeping the
    #     batch grid axis >= 2 steps (megacore on v7x) whenever B >= 2. ---
    if batch_block is None:
        max_bb = B if B == 1 else max(1, B // 2)
        batch_block = 1
        for d in range(1, max_bb + 1):
            if B % d != 0:
                continue
            if _vmem_estimate_bytes(d, N, kv_tile, C, D, num_heads, head_dim,
                                    out_itemsize) <= budget:
                batch_block = d
    assert B % batch_block == 0, "batch_block must divide B"

    est = _vmem_estimate_bytes(batch_block, N, kv_tile, C, D, num_heads,
                               head_dim, out_itemsize)
    vmem_limit = int(min(max(int(est * 1.4) + (4 << 20), 32 << 20),
                         physical_vmem - (8 << 20)))

    # --- Parameter prep: fold softmax scale into wq (f32, exact), cast weights
    #     and activations to bf16 once so every DMA moves half the bytes. ---
    wq = (params["wq"].astype(jnp.float32) * scale).astype(cdt)
    wk = params["wk"].astype(cdt)
    wv = params["wv"].astype(cdt)
    wp = params["wp"].astype(cdt)
    bp2d = params["bp"].reshape(1, C).astype(jnp.float32)
    x_bf = x.astype(cdt)
    k_bf = k_in.astype(cdt)
    v_bf = v_in.astype(cdt)

    kernel = functools.partial(
        _cross_attention_kernel, num_heads=num_heads, head_dim=head_dim)

    bb = batch_block
    H = num_heads
    grid = (B // bb, n_kv)

    def _run(weight_pipeline_mode):
        def wspec(shape):
            if weight_pipeline_mode is None:
                return pl.BlockSpec(shape, lambda b, kv: (0, 0))
            return pl.BlockSpec(shape, lambda b, kv: (0, 0),
                                pipeline_mode=weight_pipeline_mode)

        grid_spec = pltpu.PrefetchScalarGridSpec(
            num_scalar_prefetch=0,
            grid=grid,
            in_specs=[
                pl.BlockSpec((bb, N, C), lambda b, kv: (b, 0, 0)),        # x
                pl.BlockSpec((bb, kv_tile, C), lambda b, kv: (b, kv, 0)),  # k
                pl.BlockSpec((bb, kv_tile, C), lambda b, kv: (b, kv, 0)),  # v
                wspec((C, D)),   # wq (scaled)
                wspec((C, D)),   # wk
                wspec((C, D)),   # wv
                wspec((D, C)),   # wp
                wspec((1, C)),   # bp
            ],
            out_specs=pl.BlockSpec((bb, N, C), lambda b, kv: (b, 0, 0)),
            scratch_shapes=[
                pltpu.VMEM((bb * H, N, head_dim), jnp.bfloat16),   # q
                pltpu.VMEM((bb * H, N, 1), jnp.float32),           # m
                pltpu.VMEM((bb * H, N, 1), jnp.float32),           # l
                pltpu.VMEM((bb * H, N, head_dim), jnp.float32),    # acc
            ],
        )
        return pl.pallas_call(
            kernel,
            out_shape=jax.ShapeDtypeStruct((B, N, C), x.dtype),
            grid_spec=grid_spec,
            compiler_params=pltpu.CompilerParams(
                dimension_semantics=("parallel", "arbitrary"),
                vmem_limit_bytes=vmem_limit,
            ),
        )(x_bf, k_bf, v_bf, wq, wk, wv, wp, bp2d)

    try:
        # Weights have a constant block index; single-buffer them to save VMEM.
        return _run(pl.Buffered(1))
    except Exception:
        # TODO(synk): fallback for JAX builds without Buffered pipeline_mode
        # support on pallas_call — default double-buffered weights.
        return _run(None)


def cross_attention_ref(x, k_in, v_in, params, *, num_heads):
    """Pure-JAX f32 reference mirroring the PyTorch forward."""
    B, N, C = x.shape
    Nk = k_in.shape[1]
    Nv = v_in.shape[1]
    D = params["wq"].shape[1]
    head_dim = D // num_heads
    scale = head_dim ** (-0.5)

    q = x @ params["wq"]
    k = k_in @ params["wk"]
    v = v_in @ params["wv"]

    q = q.reshape(B, N, num_heads, head_dim).transpose(0, 2, 1, 3)
    k = k.reshape(B, Nk, num_heads, head_dim).transpose(0, 2, 1, 3)
    v = v.reshape(B, Nv, num_heads, head_dim).transpose(0, 2, 1, 3)

    attn = (q * scale) @ jnp.swapaxes(k, -2, -1)
    attn = jax.nn.softmax(attn, axis=-1)
    out = (attn @ v).transpose(0, 2, 1, 3).reshape(B, N, D)
    return out @ params["wp"] + params["bp"]


if __name__ == "__main__":
    # Small, module-consistent shapes.  Nk > kv_tile so the online-softmax
    # accumulation path (multiple KV grid steps) is actually exercised.
    B, N, Nk, Nv, C = 2, 8, 32, 32, 32
    num_heads = 4
    D = C  # all_head_dim = head_dim * num_heads = dim (default attn_head_dim=None)

    key = jax.random.PRNGKey(0)
    kx, kk, kv, kwq, kwk, kwv, kwp, kbp = jax.random.split(key, 8)

    x = jax.random.normal(kx, (B, N, C), dtype=jnp.float32)
    k_in = jax.random.normal(kk, (B, Nk, C), dtype=jnp.float32)
    v_in = jax.random.normal(kv, (B, Nv, C), dtype=jnp.float32)

    # Deterministic synthetic parameters (weights stored as (in, out)).
    params = {
        "wq": jax.random.normal(kwq, (C, D), dtype=jnp.float32) * 0.05,
        "wk": jax.random.normal(kwk, (C, D), dtype=jnp.float32) * 0.05,
        "wv": jax.random.normal(kwv, (C, D), dtype=jnp.float32) * 0.05,
        "wp": jax.random.normal(kwp, (D, C), dtype=jnp.float32) * 0.05,
        "bp": jax.random.normal(kbp, (C,), dtype=jnp.float32) * 0.05,
    }

    out = cross_attention(x, k_in, v_in, params, num_heads=num_heads,
                          kv_tile=16)   # 2 KV tiles -> exercises flash path
    out = jax.block_until_ready(out)

    ref = cross_attention_ref(x, k_in, v_in, params, num_heads=num_heads)
    assert out.shape == (B, N, C)
    # bf16 activations/weights + approx reciprocal -> ~1e-2 level numeric drift.
    assert jnp.allclose(out, ref, rtol=2e-2, atol=2e-2), (
        "mismatch vs reference; max abs diff = "
        f"{float(jnp.max(jnp.abs(out - ref)))}")

    print("KERNEL_OK")
</pallas_src>

<mosaic_0001>
module attributes {stable_mosaic.version = 11 : i64} {
  func.func @_cross_attention_kernel(%arg0: i32, %arg1: i32, %arg2: memref<1x8x32xbf16, #tpu.memory_space<vmem>>, %arg3: memref<1x16x32xbf16, #tpu.memory_space<vmem>>, %arg4: memref<1x16x32xbf16, #tpu.memory_space<vmem>>, %arg5: memref<32x32xbf16, #tpu.memory_space<vmem>>, %arg6: memref<32x32xbf16, #tpu.memory_space<vmem>>, %arg7: memref<32x32xbf16, #tpu.memory_space<vmem>>, %arg8: memref<32x32xbf16, #tpu.memory_space<vmem>>, %arg9: memref<1x32xf32, #tpu.memory_space<vmem>>, %arg10: memref<1x8x32xf32, #tpu.memory_space<vmem>>, %arg11: memref<4x8x8xbf16, #tpu.memory_space<vmem>>, %arg12: memref<4x8x1xf32, #tpu.memory_space<vmem>>, %arg13: memref<4x8x1xf32, #tpu.memory_space<vmem>>, %arg14: memref<4x8x8xf32, #tpu.memory_space<vmem>>) attributes {dimension_semantics = [#tpu.dimension_semantics<parallel>, #tpu.dimension_semantics<arbitrary>], iteration_bounds = array<i64: 2, 2>, scalar_prefetch = 0 : i64, scratch_operands = 4 : i64, tpu.core_type = #tpu.core_type<tc>, window_params = [{transform_indices = @transform_0, window_bounds = array<i64: 1, 8, 32>}, {transform_indices = @transform_1, window_bounds = array<i64: 1, 16, 32>}, {transform_indices = @transform_2, window_bounds = array<i64: 1, 16, 32>}, {pipeline_mode = #tpu.pipeline_mode<synchronous>, transform_indices = @transform_3, window_bounds = array<i64: 32, 32>}, {pipeline_mode = #tpu.pipeline_mode<synchronous>, transform_indices = @transform_4, window_bounds = array<i64: 32, 32>}, {pipeline_mode = #tpu.pipeline_mode<synchronous>, transform_indices = @transform_5, window_bounds = array<i64: 32, 32>}, {pipeline_mode = #tpu.pipeline_mode<synchronous>, transform_indices = @transform_6, window_bounds = array<i64: 32, 32>}, {pipeline_mode = #tpu.pipeline_mode<synchronous>, transform_indices = @transform_7, window_bounds = array<i64: 1, 32>}, {transform_indices = @transform_8, window_bounds = array<i64: 1, 8, 32>}]} {
    %c0_i32 = arith.constant 0 : i32
    %0 = arith.cmpi eq, %arg1, %c0_i32 : i32
    %1 = arith.extui %0 : i1 to i32
    %c0_i32_0 = arith.constant 0 : i32
    %2 = arith.cmpi ne, %1, %c0_i32_0 : i32
    scf.if %2 {
      %c0_37 = arith.constant 0 : index
      %c0_38 = arith.constant 0 : index
      %c0_39 = arith.constant 0 : index
      %47 = vector.load %arg2[%c0_37, %c0_38, %c0_39] : memref<1x8x32xbf16, #tpu.memory_space<vmem>>, vector<1x8x32xbf16>
      %48 = vector.shape_cast %47 : vector<1x8x32xbf16> to vector<8x32xbf16>
      %c0_40 = arith.constant 0 : index
      %c0_41 = arith.constant 0 : index
      %49 = vector.load %arg5[%c0_40, %c0_41] : memref<32x32xbf16, #tpu.memory_space<vmem>>, vector<32x32xbf16>
      %cst_42 = arith.constant dense<0.000000e+00> : vector<8x32xf32>
      %50 = tpu.matmul %48, %49, %cst_42 {dimension_numbers = #tpu.dot_dimension_numbers<[1], [0], [0], [1], [0, 0, 1, 1], [], []>} : vector<8x32xbf16>, vector<32x32xbf16>, vector<8x32xf32> -> vector<8x32xf32>
      %51 = arith.truncf %50 : vector<8x32xf32> to vector<8x32xbf16>
      %52 = vector.shape_cast %51 : vector<8x32xbf16> to vector<1x8x4x8xbf16>
      %53 = tpu.transpose %52, [0, 2, 1, 3] : vector<1x8x4x8xbf16> -> vector<1x4x8x8xbf16>
      %54 = vector.shape_cast %53 : vector<1x4x8x8xbf16> to vector<4x8x8xbf16>
      %c0_43 = arith.constant 0 : index
      %c0_44 = arith.constant 0 : index
      %c0_45 = arith.constant 0 : index
      %55 = vector.load %arg11[%c0_43, %c0_44, %c0_45] : memref<4x8x8xbf16, #tpu.memory_space<vmem>>, vector<4x8x8xbf16>
      tpu.vector_store %arg11[%c0_43, %c0_44, %c0_45], %54 {strides = array<i32>} : memref<4x8x8xbf16, #tpu.memory_space<vmem>>, vector<4x8x8xbf16>,
      %cst_46 = arith.constant 0xFF800000 : f32
      %56 = vector.broadcast %cst_46 : f32 to vector<4x8x1xf32>
      %c0_47 = arith.constant 0 : index
      %c0_48 = arith.constant 0 : index
      %c0_49 = arith.constant 0 : index
      %57 = vector.load %arg12[%c0_47, %c0_48, %c0_49] : memref<4x8x1xf32, #tpu.memory_space<vmem>>, vector<4x8x1xf32>
      tpu.vector_store %arg12[%c0_47, %c0_48, %c0_49], %56 {strides = array<i32>} : memref<4x8x1xf32, #tpu.memory_space<vmem>>, vector<4x8x1xf32>,
      %cst_50 = arith.constant 0.000000e+00 : f32
      %58 = vector.broadcast %cst_50 : f32 to vector<4x8x1xf32>
      %c0_51 = arith.constant 0 : index
      %c0_52 = arith.constant 0 : index
      %c0_53 = arith.constant 0 : index
      %59 = vector.load %arg13[%c0_51, %c0_52, %c0_53] : memref<4x8x1xf32, #tpu.memory_space<vmem>>, vector<4x8x1xf32>
      tpu.vector_store %arg13[%c0_51, %c0_52, %c0_53], %58 {strides = array<i32>} : memref<4x8x1xf32, #tpu.memory_space<vmem>>, vector<4x8x1xf32>,
      %cst_54 = arith.constant 0.000000e+00 : f32
      %60 = vector.broadcast %cst_54 : f32 to vector<4x8x8xf32>
      %c0_55 = arith.constant 0 : index
      %c0_56 = arith.constant 0 : index
      %c0_57 = arith.constant 0 : index
      %61 = vector.load %arg14[%c0_55, %c0_56, %c0_57] : memref<4x8x8xf32, #tpu.memory_space<vmem>>, vector<4x8x8xf32>
      tpu.vector_store %arg14[%c0_55, %c0_56, %c0_57], %60 {strides = array<i32>} : memref<4x8x8xf32, #tpu.memory_space<vmem>>, vector<4x8x8xf32>,
    } else {
    }
    %c0 = arith.constant 0 : index
    %c0_1 = arith.constant 0 : index
    %c0_2 = arith.constant 0 : index
    %3 = vector.load %arg3[%c0, %c0_1, %c0_2] : memref<1x16x32xbf16, #tpu.memory_space<vmem>>, vector<1x16x32xbf16>
    %4 = vector.shape_cast %3 : vector<1x16x32xbf16> to vector<16x32xbf16>
    %c0_3 = arith.constant 0 : index
    %c0_4 = arith.constant 0 : index
    %c0_5 = arith.constant 0 : index
    %5 = vector.load %arg4[%c0_3, %c0_4, %c0_5] : memref<1x16x32xbf16, #tpu.memory_space<vmem>>, vector<1x16x32xbf16>
    %6 = vector.shape_cast %5 : vector<1x16x32xbf16> to vector<16x32xbf16>
    %c0_6 = arith.constant 0 : index
    %c0_7 = arith.constant 0 : index
    %7 = vector.load %arg6[%c0_6, %c0_7] : memref<32x32xbf16, #tpu.memory_space<vmem>>, vector<32x32xbf16>
    %cst = arith.constant dense<0.000000e+00> : vector<16x32xf32>
    %8 = tpu.matmul %4, %7, %cst {dimension_numbers = #tpu.dot_dimension_numbers<[1], [0], [0], [1], [0, 0, 1, 1], [], []>} : vector<16x32xbf16>, vector<32x32xbf16>, vector<16x32xf32> -> vector<16x32xf32>
    %9 = arith.truncf %8 : vector<16x32xf32> to vector<16x32xbf16>
    %c0_8 = arith.constant 0 : index
    %c0_9 = arith.constant 0 : index
    %10 = vector.load %arg7[%c0_8, %c0_9] : memref<32x32xbf16, #tpu.memory_space<vmem>>, vector<32x32xbf16>
    %cst_10 = arith.constant dense<0.000000e+00> : vector<16x32xf32>
    %11 = tpu.matmul %6, %10, %cst_10 {dimension_numbers = #tpu.dot_dimension_numbers<[1], [0], [0], [1], [0, 0, 1, 1], [], []>} : vector<16x32xbf16>, vector<32x32xbf16>, vector<16x32xf32> -> vector<16x32xf32>
    %12 = arith.truncf %11 : vector<16x32xf32> to vector<16x32xbf16>
    %13 = vector.shape_cast %9 : vector<16x32xbf16> to vector<1x16x4x8xbf16>
    %14 = tpu.transpose %13, [0, 2, 1, 3] : vector<1x16x4x8xbf16> -> vector<1x4x16x8xbf16>
    %15 = vector.shape_cast %14 : vector<1x4x16x8xbf16> to vector<4x16x8xbf16>
    %16 = vector.shape_cast %12 : vector<16x32xbf16> to vector<1x16x4x8xbf16>
    %17 = tpu.transpose %16, [0, 2, 1, 3] : vector<1x16x4x8xbf16> -> vector<1x4x16x8xbf16>
    %18 = vector.shape_cast %17 : vector<1x4x16x8xbf16> to vector<4x16x8xbf16>
    %c0_11 = arith.constant 0 : index
    %c0_12 = arith.constant 0 : index
    %c0_13 = arith.constant 0 : index
    %19 = vector.load %arg11[%c0_11, %c0_12, %c0_13] : memref<4x8x8xbf16, #tpu.memory_space<vmem>>, vector<4x8x8xbf16>
    "tpu.trace_start"() <{level = 10 : i32, message = "bqd,bkd->bqk"}> : () -> ()
    %cst_14 = arith.constant dense<0.000000e+00> : vector<4x8x16xf32>
    %20 = tpu.matmul %19, %15, %cst_14 {dimension_numbers = #tpu.dot_dimension_numbers<[2], [2], [1], [1], [0, 0, 0, 1, 1, 1], [0], [0]>} : vector<4x8x8xbf16>, vector<4x16x8xbf16>, vector<4x8x16xf32> -> vector<4x8x16xf32>
    "tpu.trace_stop"() : () -> ()
    %c0_15 = arith.constant 0 : index
    %c0_16 = arith.constant 0 : index
    %c0_17 = arith.constant 0 : index
    %21 = vector.load %arg12[%c0_15, %c0_16, %c0_17] : memref<4x8x1xf32, #tpu.memory_space<vmem>>, vector<4x8x1xf32>
    %cst_18 = arith.constant dense<0xFF800000> : vector<4x8xf32>
    %22 = vector.multi_reduction <maximumf>, %20, %cst_18 [2] : vector<4x8x16xf32> to vector<4x8xf32>
    %23 = vector.shape_cast %22 : vector<4x8xf32> to vector<4x8x1xf32>
    %24 = arith.maximumf %21, %23 : vector<4x8x1xf32>
    %25 = arith.subf %21, %24 : vector<4x8x1xf32>
    %26 = math.exp %25 : vector<4x8x1xf32>
    %27 = vector.broadcast %24 : vector<4x8x1xf32> to vector<4x8x16xf32>
    %28 = arith.subf %20, %27 : vector<4x8x16xf32>
    %29 = math.exp %28 : vector<4x8x16xf32>
    %c0_19 = arith.constant 0 : index
    %c0_20 = arith.constant 0 : index
    %c0_21 = arith.constant 0 : index
    %30 = vector.load %arg13[%c0_19, %c0_20, %c0_21] : memref<4x8x1xf32, #tpu.memory_space<vmem>>, vector<4x8x1xf32>
    %31 = arith.mulf %26, %30 : vector<4x8x1xf32>
    %cst_22 = arith.constant dense<0.000000e+00> : vector<4x8xf32>
    %32 = vector.multi_reduction <add>, %29, %cst_22 [2] : vector<4x8x16xf32> to vector<4x8xf32>
    %33 = vector.shape_cast %32 : vector<4x8xf32> to vector<4x8x1xf32>
    %34 = arith.addf %31, %33 : vector<4x8x1xf32>
    %c0_23 = arith.constant 0 : index
    %c0_24 = arith.constant 0 : index
    %c0_25 = arith.constant 0 : index
    %35 = vector.load %arg13[%c0_23, %c0_24, %c0_25] : memref<4x8x1xf32, #tpu.memory_space<vmem>>, vector<4x8x1xf32>
    tpu.vector_store %arg13[%c0_23, %c0_24, %c0_25], %34 {strides = array<i32>} : memref<4x8x1xf32, #tpu.memory_space<vmem>>, vector<4x8x1xf32>,
    %c0_26 = arith.constant 0 : index
    %c0_27 = arith.constant 0 : index
    %c0_28 = arith.constant 0 : index
    %36 = vector.load %arg14[%c0_26, %c0_27, %c0_28] : memref<4x8x8xf32, #tpu.memory_space<vmem>>, vector<4x8x8xf32>
    %37 = vector.broadcast %26 : vector<4x8x1xf32> to vector<4x8x8xf32>
    %38 = arith.mulf %37, %36 : vector<4x8x8xf32>
    %39 = arith.truncf %29 : vector<4x8x16xf32> to vector<4x8x16xbf16>
    "tpu.trace_start"() <{level = 10 : i32, message = "bqk,bkd->bqd"}> : () -> ()
    %cst_29 = arith.constant dense<0.000000e+00> : vector<4x8x8xf32>
    %40 = tpu.matmul %39, %18, %cst_29 {dimension_numbers = #tpu.dot_dimension_numbers<[2], [1], [1], [2], [0, 0, 0, 1, 1, 2], [0], [0]>} : vector<4x8x16xbf16>, vector<4x16x8xbf16>, vector<4x8x8xf32> -> vector<4x8x8xf32>
    "tpu.trace_stop"() : () -> ()
    %41 = arith.addf %38, %40 : vector<4x8x8xf32>
    %c0_30 = arith.constant 0 : index
    %c0_31 = arith.constant 0 : index
    %c0_32 = arith.constant 0 : index
    %42 = vector.load %arg14[%c0_30, %c0_31, %c0_32] : memref<4x8x8xf32, #tpu.memory_space<vmem>>, vector<4x8x8xf32>
    tpu.vector_store %arg14[%c0_30, %c0_31, %c0_32], %41 {strides = array<i32>} : memref<4x8x8xf32, #tpu.memory_space<vmem>>, vector<4x8x8xf32>,
    %c0_33 = arith.constant 0 : index
    %c0_34 = arith.constant 0 : index
    %c0_35 = arith.constant 0 : index
    %43 = vector.load %arg12[%c0_33, %c0_34, %c0_35] : memref<4x8x1xf32, #tpu.memory_space<vmem>>, vector<4x8x1xf32>
    tpu.vector_store %arg12[%c0_33, %c0_34, %c0_35], %24 {strides = array<i32>} : memref<4x8x1xf32, #tpu.memory_space<vmem>>, vector<4x8x1xf32>,
    %c1_i32 = arith.constant 1 : i32
    %44 = arith.cmpi eq, %arg1, %c1_i32 : i32
    %45 = arith.extui %44 : i1 to i32
    %c0_i32_36 = arith.constant 0 : i32
    %46 = arith.cmpi ne, %45, %c0_i32_36 : i32
    scf.if %46 {
      %c0_37 = arith.constant 0 : index
      %c0_38 = arith.constant 0 : index
      %c0_39 = arith.constant 0 : index
      %47 = vector.load %arg14[%c0_37, %c0_38, %c0_39] : memref<4x8x8xf32, #tpu.memory_space<vmem>>, vector<4x8x8xf32>
      %c0_40 = arith.constant 0 : index
      %c0_41 = arith.constant 0 : index
      %c0_42 = arith.constant 0 : index
      %48 = vector.load %arg13[%c0_40, %c0_41, %c0_42] : memref<4x8x1xf32, #tpu.memory_space<vmem>>, vector<4x8x1xf32>
      %49 = tpu.reciprocal %48 {approx = true} : vector<4x8x1xf32> -> vector<4x8x1xf32>
      %50 = vector.broadcast %49 : vector<4x8x1xf32> to vector<4x8x8xf32>
      %51 = arith.mulf %47, %50 : vector<4x8x8xf32>
      %52 = arith.truncf %51 : vector<4x8x8xf32> to vector<4x8x8xbf16>
      %53 = vector.shape_cast %52 : vector<4x8x8xbf16> to vector<1x4x8x8xbf16>
      %54 = tpu.transpose %53, [0, 2, 1, 3] : vector<1x4x8x8xbf16> -> vector<1x8x4x8xbf16>
      %55 = vector.shape_cast %54 : vector<1x8x4x8xbf16> to vector<8x32xbf16>
      %c0_43 = arith.constant 0 : index
      %c0_44 = arith.constant 0 : index
      %56 = vector.load %arg8[%c0_43, %c0_44] : memref<32x32xbf16, #tpu.memory_space<vmem>>, vector<32x32xbf16>
      %cst_45 = arith.constant dense<0.000000e+00> : vector<8x32xf32>
      %57 = tpu.matmul %55, %56, %cst_45 {dimension_numbers = #tpu.dot_dimension_numbers<[1], [0], [0], [1], [0, 0, 1, 1], [], []>} : vector<8x32xbf16>, vector<32x32xbf16>, vector<8x32xf32> -> vector<8x32xf32>
      %c0_46 = arith.constant 0 : index
      %c0_47 = arith.constant 0 : index
      %58 = vector.load %arg9[%c0_46, %c0_47] : memref<1x32xf32, #tpu.memory_space<vmem>>, vector<1x32xf32>
      %59 = vector.broadcast %58 : vector<1x32xf32> to vector<8x32xf32>
      %60 = arith.addf %57, %59 : vector<8x32xf32>
      %61 = vector.shape_cast %60 : vector<8x32xf32> to vector<1x8x32xf32>
      %c0_48 = arith.constant 0 : index
      %c0_49 = arith.constant 0 : index
      %c0_50 = arith.constant 0 : index
      %62 = vector.load %arg10[%c0_48, %c0_49, %c0_50] : memref<1x8x32xf32, #tpu.memory_space<vmem>>, vector<1x8x32xf32>
      tpu.vector_store %arg10[%c0_48, %c0_49, %c0_50], %61 {strides = array<i32>} : memref<1x8x32xf32, #tpu.memory_space<vmem>>, vector<1x8x32xf32>,
    } else {
    }
    return
  }
  func.func @transform_0(%arg0: i32, %arg1: i32) -> (i32, i32, i32) {
    %c0_i32 = arith.constant 0 : i32
    %c0_i32_0 = arith.constant 0 : i32
    %c0_i32_1 = arith.constant 0 : i32
    return %arg0, %c0_i32, %c0_i32_0 : i32, i32, i32
  }
  func.func @transform_1(%arg0: i32, %arg1: i32) -> (i32, i32, i32) {
    %c0_i32 = arith.constant 0 : i32
    %c0_i32_0 = arith.constant 0 : i32
    return %arg0, %arg1, %c0_i32 : i32, i32, i32
  }
  func.func @transform_2(%arg0: i32, %arg1: i32) -> (i32, i32, i32) {
    %c0_i32 = arith.constant 0 : i32
    %c0_i32_0 = arith.constant 0 : i32
    return %arg0, %arg1, %c0_i32 : i32, i32, i32
  }
  func.func @transform_3(%arg0: i32, %arg1: i32) -> (i32, i32) {
    %c0_i32 = arith.constant 0 : i32
    %c0_i32_0 = arith.constant 0 : i32
    %c0_i32_1 = arith.constant 0 : i32
    return %c0_i32, %c0_i32_0 : i32, i32
  }
  func.func @transform_4(%arg0: i32, %arg1: i32) -> (i32, i32) {
    %c0_i32 = arith.constant 0 : i32
    %c0_i32_0 = arith.constant 0 : i32
    %c0_i32_1 = arith.constant 0 : i32
    return %c0_i32, %c0_i32_0 : i32, i32
  }
  func.func @transform_5(%arg0: i32, %arg1: i32) -> (i32, i32) {
    %c0_i32 = arith.constant 0 : i32
    %c0_i32_0 = arith.constant 0 : i32
    %c0_i32_1 = arith.constant 0 : i32
    return %c0_i32, %c0_i32_0 : i32, i32
  }
  func.func @transform_6(%arg0: i32, %arg1: i32) -> (i32, i32) {
    %c0_i32 = arith.constant 0 : i32
    %c0_i32_0 = arith.constant 0 : i32
    %c0_i32_1 = arith.constant 0 : i32
    return %c0_i32, %c0_i32_0 : i32, i32
  }
  func.func @transform_7(%arg0: i32, %arg1: i32) -> (i32, i32) {
    %c0_i32 = arith.constant 0 : i32
    %c0_i32_0 = arith.constant 0 : i32
    %c0_i32_1 = arith.constant 0 : i32
    return %c0_i32, %c0_i32_0 : i32, i32
  }
  func.func @transform_8(%arg0: i32, %arg1: i32) -> (i32, i32, i32) {
    %c0_i32 = arith.constant 0 : i32
    %c0_i32_0 = arith.constant 0 : i32
    %c0_i32_1 = arith.constant 0 : i32
    return %arg0, %c0_i32, %c0_i32_0 : i32, i32, i32
  }
}

module attributes {stable_mosaic.version = 11 : i64} {
  func.func @_cross_attention_kernel(%arg0: i32, %arg1: i32, %arg2: memref<1x8x32xbf16, #tpu.memory_space<vmem>>, %arg3: memref<1x16x32xbf16, #tpu.memory_space<vmem>>, %arg4: memref<1x16x32xbf16, #tpu.memory_space<vmem>>, %arg5: memref<32x32xbf16, #tpu.memory_space<vmem>>, %arg6: memref<32x32xbf16, #tpu.memory_space<vmem>>, %arg7: memref<32x32xbf16, #tpu.memory_space<vmem>>, %arg8: memref<32x32xbf16, #tpu.memory_space<vmem>>, %arg9: memref<1x32xf32, #tpu.memory_space<vmem>>, %arg10: memref<1x8x32xf32, #tpu.memory_space<vmem>>, %arg11: memref<4x8x8xbf16, #tpu.memory_space<vmem>>, %arg12: memref<4x8x1xf32, #tpu.memory_space<vmem>>, %arg13: memref<4x8x1xf32, #tpu.memory_space<vmem>>, %arg14: memref<4x8x8xf32, #tpu.memory_space<vmem>>) attributes {dimension_semantics = [#tpu.dimension_semantics<parallel>, #tpu.dimension_semantics<arbitrary>], iteration_bounds = array<i64: 2, 2>, scalar_prefetch = 0 : i64, scratch_operands = 4 : i64, tpu.core_type = #tpu.core_type<tc>, window_params = [{transform_indices = @transform_0, window_bounds = array<i64: 1, 8, 32>}, {transform_indices = @transform_1, window_bounds = array<i64: 1, 16, 32>}, {transform_indices = @transform_2, window_bounds = array<i64: 1, 16, 32>}, {pipeline_mode = #tpu.pipeline_mode<synchronous>, transform_indices = @transform_3, window_bounds = array<i64: 32, 32>}, {pipeline_mode = #tpu.pipeline_mode<synchronous>, transform_indices = @transform_4, window_bounds = array<i64: 32, 32>}, {pipeline_mode = #tpu.pipeline_mode<synchronous>, transform_indices = @transform_5, window_bounds = array<i64: 32, 32>}, {pipeline_mode = #tpu.pipeline_mode<synchronous>, transform_indices = @transform_6, window_bounds = array<i64: 32, 32>}, {pipeline_mode = #tpu.pipeline_mode<synchronous>, transform_indices = @transform_7, window_bounds = array<i64: 1, 32>}, {transform_indices = @transform_8, window_bounds = array<i64: 1, 8, 32>}]} {
    %c0_i32 = arith.constant 0 : i32
    %0 = arith.cmpi eq, %arg1, %c0_i32 : i32
    %1 = arith.extui %0 : i1 to i32
    %c0_i32_0 = arith.constant 0 : i32
    %2 = arith.cmpi ne, %1, %c0_i32_0 : i32
    scf.if %2 {
      %c0_37 = arith.constant 0 : index
      %c0_38 = arith.constant 0 : index
      %c0_39 = arith.constant 0 : index
      %47 = vector.load %arg2[%c0_37, %c0_38, %c0_39] : memref<1x8x32xbf16, #tpu.memory_space<vmem>>, vector<1x8x32xbf16>
      %48 = vector.shape_cast %47 : vector<1x8x32xbf16> to vector<8x32xbf16>
      %c0_40 = arith.constant 0 : index
      %c0_41 = arith.constant 0 : index
      %49 = vector.load %arg5[%c0_40, %c0_41] : memref<32x32xbf16, #tpu.memory_space<vmem>>, vector<32x32xbf16>
      %cst_42 = arith.constant dense<0.000000e+00> : vector<8x32xf32>
      %50 = tpu.matmul %48, %49, %cst_42 {dimension_numbers = #tpu.dot_dimension_numbers<[1], [0], [0], [1], [0, 0, 1, 1], [], []>} : vector<8x32xbf16>, vector<32x32xbf16>, vector<8x32xf32> -> vector<8x32xf32>
      %51 = arith.truncf %50 : vector<8x32xf32> to vector<8x32xbf16>
      %52 = vector.shape_cast %51 : vector<8x32xbf16> to vector<1x8x4x8xbf16>
      %53 = tpu.transpose %52, [0, 2, 1, 3] : vector<1x8x4x8xbf16> -> vector<1x4x8x8xbf16>
      %54 = vector.shape_cast %53 : vector<1x4x8x8xbf16> to vector<4x8x8xbf16>
      %c0_43 = arith.constant 0 : index
      %c0_44 = arith.constant 0 : index
      %c0_45 = arith.constant 0 : index
      %55 = vector.load %arg11[%c0_43, %c0_44, %c0_45] : memref<4x8x8xbf16, #tpu.memory_space<vmem>>, vector<4x8x8xbf16>
      tpu.vector_store %arg11[%c0_43, %c0_44, %c0_45], %54 {strides = array<i32>} : memref<4x8x8xbf16, #tpu.memory_space<vmem>>, vector<4x8x8xbf16>,
      %cst_46 = arith.constant 0xFF800000 : f32
      %56 = vector.broadcast %cst_46 : f32 to vector<4x8x1xf32>
      %c0_47 = arith.constant 0 : index
      %c0_48 = arith.constant 0 : index
      %c0_49 = arith.constant 0 : index
      %57 = vector.load %arg12[%c0_47, %c0_48, %c0_49] : memref<4x8x1xf32, #tpu.memory_space<vmem>>, vector<4x8x1xf32>
      tpu.vector_store %arg12[%c0_47, %c0_48, %c0_49], %56 {strides = array<i32>} : memref<4x8x1xf32, #tpu.memory_space<vmem>>, vector<4x8x1xf32>,
      %cst_50 = arith.constant 0.000000e+00 : f32
      %58 = vector.broadcast %cst_50 : f32 to vector<4x8x1xf32>
      %c0_51 = arith.constant 0 : index
      %c0_52 = arith.constant 0 : index
      %c0_53 = arith.constant 0 : index
      %59 = vector.load %arg13[%c0_51, %c0_52, %c0_53] : memref<4x8x1xf32, #tpu.memory_space<vmem>>, vector<4x8x1xf32>
      tpu.vector_store %arg13[%c0_51, %c0_52, %c0_53], %58 {strides = array<i32>} : memref<4x8x1xf32, #tpu.memory_space<vmem>>, vector<4x8x1xf32>,
      %cst_54 = arith.constant 0.000000e+00 : f32
      %60 = vector.broadcast %cst_54 : f32 to vector<4x8x8xf32>
      %c0_55 = arith.constant 0 : index
      %c0_56 = arith.constant 0 : index
      %c0_57 = arith.constant 0 : index
      %61 = vector.load %arg14[%c0_55, %c0_56, %c0_57] : memref<4x8x8xf32, #tpu.memory_space<vmem>>, vector<4x8x8xf32>
      tpu.vector_store %arg14[%c0_55, %c0_56, %c0_57], %60 {strides = array<i32>} : memref<4x8x8xf32, #tpu.memory_space<vmem>>, vector<4x8x8xf32>,
    } else {
    }
    %c0 = arith.constant 0 : index
    %c0_1 = arith.constant 0 : index
    %c0_2 = arith.constant 0 : index
    %3 = vector.load %arg3[%c0, %c0_1, %c0_2] : memref<1x16x32xbf16, #tpu.memory_space<vmem>>, vector<1x16x32xbf16>
    %4 = vector.shape_cast %3 : vector<1x16x32xbf16> to vector<16x32xbf16>
    %c0_3 = arith.constant 0 : index
    %c0_4 = arith.constant 0 : index
    %c0_5 = arith.constant 0 : index
    %5 = vector.load %arg4[%c0_3, %c0_4, %c0_5] : memref<1x16x32xbf16, #tpu.memory_space<vmem>>, vector<1x16x32xbf16>
    %6 = vector.shape_cast %5 : vector<1x16x32xbf16> to vector<16x32xbf16>
    %c0_6 = arith.constant 0 : index
    %c0_7 = arith.constant 0 : index
    %7 = vector.load %arg6[%c0_6, %c0_7] : memref<32x32xbf16, #tpu.memory_space<vmem>>, vector<32x32xbf16>
    %cst = arith.constant dense<0.000000e+00> : vector<16x32xf32>
    %8 = tpu.matmul %4, %7, %cst {dimension_numbers = #tpu.dot_dimension_numbers<[1], [0], [0], [1], [0, 0, 1, 1], [], []>} : vector<16x32xbf16>, vector<32x32xbf16>, vector<16x32xf32> -> vector<16x32xf32>
    %9 = arith.truncf %8 : vector<16x32xf32> to vector<16x32xbf16>
    %c0_8 = arith.constant 0 : index
    %c0_9 = arith.constant 0 : index
    %10 = vector.load %arg7[%c0_8, %c0_9] : memref<32x32xbf16, #tpu.memory_space<vmem>>, vector<32x32xbf16>
    %cst_10 = arith.constant dense<0.000000e+00> : vector<16x32xf32>
    %11 = tpu.matmul %6, %10, %cst_10 {dimension_numbers = #tpu.dot_dimension_numbers<[1], [0], [0], [1], [0, 0, 1, 1], [], []>} : vector<16x32xbf16>, vector<32x32xbf16>, vector<16x32xf32> -> vector<16x32xf32>
    %12 = arith.truncf %11 : vector<16x32xf32> to vector<16x32xbf16>
    %13 = vector.shape_cast %9 : vector<16x32xbf16> to vector<1x16x4x8xbf16>
    %14 = tpu.transpose %13, [0, 2, 1, 3] : vector<1x16x4x8xbf16> -> vector<1x4x16x8xbf16>
    %15 = vector.shape_cast %14 : vector<1x4x16x8xbf16> to vector<4x16x8xbf16>
    %16 = vector.shape_cast %12 : vector<16x32xbf16> to vector<1x16x4x8xbf16>
    %17 = tpu.transpose %16, [0, 2, 1, 3] : vector<1x16x4x8xbf16> -> vector<1x4x16x8xbf16>
    %18 = vector.shape_cast %17 : vector<1x4x16x8xbf16> to vector<4x16x8xbf16>
    %c0_11 = arith.constant 0 : index
    %c0_12 = arith.constant 0 : index
    %c0_13 = arith.constant 0 : index
    %19 = vector.load %arg11[%c0_11, %c0_12, %c0_13] : memref<4x8x8xbf16, #tpu.memory_space<vmem>>, vector<4x8x8xbf16>
    "tpu.trace_start"() <{level = 10 : i32, message = "bqd,bkd->bqk"}> : () -> ()
    %cst_14 = arith.constant dense<0.000000e+00> : vector<4x8x16xf32>
    %20 = tpu.matmul %19, %15, %cst_14 {dimension_numbers = #tpu.dot_dimension_numbers<[2], [2], [1], [1], [0, 0, 0, 1, 1, 1], [0], [0]>} : vector<4x8x8xbf16>, vector<4x16x8xbf16>, vector<4x8x16xf32> -> vector<4x8x16xf32>
    "tpu.trace_stop"() : () -> ()
    %c0_15 = arith.constant 0 : index
    %c0_16 = arith.constant 0 : index
    %c0_17 = arith.constant 0 : index
    %21 = vector.load %arg12[%c0_15, %c0_16, %c0_17] : memref<4x8x1xf32, #tpu.memory_space<vmem>>, vector<4x8x1xf32>
    %cst_18 = arith.constant dense<0xFF800000> : vector<4x8xf32>
    %22 = vector.multi_reduction <maximumf>, %20, %cst_18 [2] : vector<4x8x16xf32> to vector<4x8xf32>
    %23 = vector.shape_cast %22 : vector<4x8xf32> to vector<4x8x1xf32>
    %24 = arith.maximumf %21, %23 : vector<4x8x1xf32>
    %25 = arith.subf %21, %24 : vector<4x8x1xf32>
    %26 = math.exp %25 : vector<4x8x1xf32>
    %27 = vector.broadcast %24 : vector<4x8x1xf32> to vector<4x8x16xf32>
    %28 = arith.subf %20, %27 : vector<4x8x16xf32>
    %29 = math.exp %28 : vector<4x8x16xf32>
    %c0_19 = arith.constant 0 : index
    %c0_20 = arith.constant 0 : index
    %c0_21 = arith.constant 0 : index
    %30 = vector.load %arg13[%c0_19, %c0_20, %c0_21] : memref<4x8x1xf32, #tpu.memory_space<vmem>>, vector<4x8x1xf32>
    %31 = arith.mulf %26, %30 : vector<4x8x1xf32>
    %cst_22 = arith.constant dense<0.000000e+00> : vector<4x8xf32>
    %32 = vector.multi_reduction <add>, %29, %cst_22 [2] : vector<4x8x16xf32> to vector<4x8xf32>
    %33 = vector.shape_cast %32 : vector<4x8xf32> to vector<4x8x1xf32>
    %34 = arith.addf %31, %33 : vector<4x8x1xf32>
    %c0_23 = arith.constant 0 : index
    %c0_24 = arith.constant 0 : index
    %c0_25 = arith.constant 0 : index
    %35 = vector.load %arg13[%c0_23, %c0_24, %c0_25] : memref<4x8x1xf32, #tpu.memory_space<vmem>>, vector<4x8x1xf32>
    tpu.vector_store %arg13[%c0_23, %c0_24, %c0_25], %34 {strides = array<i32>} : memref<4x8x1xf32, #tpu.memory_space<vmem>>, vector<4x8x1xf32>,
    %c0_26 = arith.constant 0 : index
    %c0_27 = arith.constant 0 : index
    %c0_28 = arith.constant 0 : index
    %36 = vector.load %arg14[%c0_26, %c0_27, %c0_28] : memref<4x8x8xf32, #tpu.memory_space<vmem>>, vector<4x8x8xf32>
    %37 = vector.broadcast %26 : vector<4x8x1xf32> to vector<4x8x8xf32>
    %38 = arith.mulf %37, %36 : vector<4x8x8xf32>
    %39 = arith.truncf %29 : vector<4x8x16xf32> to vector<4x8x16xbf16>
    "tpu.trace_start"() <{level = 10 : i32, message = "bqk,bkd->bqd"}> : () -> ()
    %cst_29 = arith.constant dense<0.000000e+00> : vector<4x8x8xf32>
    %40 = tpu.matmul %39, %18, %cst_29 {dimension_numbers = #tpu.dot_dimension_numbers<[2], [1], [1], [2], [0, 0, 0, 1, 1, 2], [0], [0]>} : vector<4x8x16xbf16>, vector<4x16x8xbf16>, vector<4x8x8xf32> -> vector<4x8x8xf32>
    "tpu.trace_stop"() : () -> ()
    %41 = arith.addf %38, %40 : vector<4x8x8xf32>
    %c0_30 = arith.constant 0 : index
    %c0_31 = arith.constant 0 : index
    %c0_32 = arith.constant 0 : index
    %42 = vector.load %arg14[%c0_30, %c0_31, %c0_32] : memref<4x8x8xf32, #tpu.memory_space<vmem>>, vector<4x8x8xf32>
    tpu.vector_store %arg14[%c0_30, %c0_31, %c0_32], %41 {strides = array<i32>} : memref<4x8x8xf32, #tpu.memory_space<vmem>>, vector<4x8x8xf32>,
    %c0_33 = arith.constant 0 : index
    %c0_34 = arith.constant 0 : index
    %c0_35 = arith.constant 0 : index
    %43 = vector.load %arg12[%c0_33, %c0_34, %c0_35] : memref<4x8x1xf32, #tpu.memory_space<vmem>>, vector<4x8x1xf32>
    tpu.vector_store %arg12[%c0_33, %c0_34, %c0_35], %24 {strides = array<i32>} : memref<4x8x1xf32, #tpu.memory_space<vmem>>, vector<4x8x1xf32>,
    %c1_i32 = arith.constant 1 : i32
    %44 = arith.cmpi eq, %arg1, %c1_i32 : i32
    %45 = arith.extui %44 : i1 to i32
    %c0_i32_36 = arith.constant 0 : i32
    %46 = arith.cmpi ne, %45, %c0_i32_36 : i32
    scf.if %46 {
      %c0_37 = arith.constant 0 : index
      %c0_38 = arith.constant 0 : index
      %c0_39 = arith.constant 0 : index
      %47 = vector.load %arg14[%c0_37, %c0_38, %c0_39] : memref<4x8x8xf32, #tpu.memory_space<vmem>>, vector<4x8x8xf32>
      %c0_40 = arith.constant 0 : index
      %c0_41 = arith.constant 0 : index
      %c0_42 = arith.constant 0 : index
      %48 = vector.load %arg13[%c0_40, %c0_41, %c0_42] : memref<4x8x1xf32, #tpu.memory_space<vmem>>, vector<4x8x1xf32>
      %49 = tpu.reciprocal %48 {approx = true} : vector<4x8x1xf32> -> vector<4x8x1xf32>
      %50 = vector.broadcast %49 : vector<4x8x1xf32> to vector<4x8x8xf32>
      %51 = arith.mulf %47, %50 : vector<4x8x8xf32>
      %52 = arith.truncf %51 : vector<4x8x8xf32> to vector<4x8x8xbf16>
      %53 = vector.shape_cast %52 : vector<4x8x8xbf16> to vector<1x4x8x8xbf16>
      %54 = tpu.transpose %53, [0, 2, 1, 3] : vector<1x4x8x8xbf16> -> vector<1x8x4x8xbf16>
      %55 = vector.shape_cast %54 : vector<1x8x4x8xbf16> to vector<8x32xbf16>
      %c0_43 = arith.constant 0 : index
      %c0_44 = arith.constant 0 : index
      %56 = vector.load %arg8[%c0_43, %c0_44] : memref<32x32xbf16, #tpu.memory_space<vmem>>, vector<32x32xbf16>
      %cst_45 = arith.constant dense<0.000000e+00> : vector<8x32xf32>
      %57 = tpu.matmul %55, %56, %cst_45 {dimension_numbers = #tpu.dot_dimension_numbers<[1], [0], [0], [1], [0, 0, 1, 1], [], []>} : vector<8x32xbf16>, vector<32x32xbf16>, vector<8x32xf32> -> vector<8x32xf32>
      %c0_46 = arith.constant 0 : index
      %c0_47 = arith.constant 0 : index
      %58 = vector.load %arg9[%c0_46, %c0_47] : memref<1x32xf32, #tpu.memory_space<vmem>>, vector<1x32xf32>
      %59 = vector.broadcast %58 : vector<1x32xf32> to vector<8x32xf32>
      %60 = arith.addf %57, %59 : vector<8x32xf32>
      %61 = vector.shape_cast %60 : vector<8x32xf32> to vector<1x8x32xf32>
      %c0_48 = arith.constant 0 : index
      %c0_49 = arith.constant 0 : index
      %c0_50 = arith.constant 0 : index
      %62 = vector.load %arg10[%c0_48, %c0_49, %c0_50] : memref<1x8x32xf32, #tpu.memory_space<vmem>>, vector<1x8x32xf32>
      tpu.vector_store %arg10[%c0_48, %c0_49, %c0_50], %61 {strides = array<i32>} : memref<1x8x32xf32, #tpu.memory_space<vmem>>, vector<1x8x32xf32>,
    } else {
    }
    return
  }
  func.func @transform_0(%arg0: i32, %arg1: i32) -> (i32, i32, i32) {
    %c0_i32 = arith.constant 0 : i32
    %c0_i32_0 = arith.constant 0 : i32
    %c0_i32_1 = arith.constant 0 : i32
    return %arg0, %c0_i32, %c0_i32_0 : i32, i32, i32
  }
  func.func @transform_1(%arg0: i32, %arg1: i32) -> (i32, i32, i32) {
    %c0_i32 = arith.constant 0 : i32
    %c0_i32_0 = arith.constant 0 : i32
    return %arg0, %arg1, %c0_i32 : i32, i32, i32
  }
  func.func @transform_2(%arg0: i32, %arg1: i32) -> (i32, i32, i32) {
    %c0_i32 = arith.constant 0 : i32
    %c0_i32_0 = arith.constant 0 : i32
    return %arg0, %arg1, %c0_i32 : i32, i32, i32
  }
  func.func @transform_3(%arg0: i32, %arg1: i32) -> (i32, i32) {
    %c0_i32 = arith.constant 0 : i32
    %c0_i32_0 = arith.constant 0 : i32
    %c0_i32_1 = arith.constant 0 : i32
    return %c0_i32, %c0_i32_0 : i32, i32
  }
  func.func @transform_4(%arg0: i32, %arg1: i32) -> (i32, i32) {
    %c0_i32 = arith.constant 0 : i32
    %c0_i32_0 = arith.constant 0 : i32
    %c0_i32_1 = arith.constant 0 : i32
    return %c0_i32, %c0_i32_0 : i32, i32
  }
  func.func @transform_5(%arg0: i32, %arg1: i32) -> (i32, i32) {
    %c0_i32 = arith.constant 0 : i32
    %c0_i32_0 = arith.constant 0 : i32
    %c0_i32_1 = arith.constant 0 : i32
    return %c0_i32, %c0_i32_0 : i32, i32
  }
  func.func @transform_6(%arg0: i32, %arg1: i32) -> (i32, i32) {
    %c0_i32 = arith.constant 0 : i32
    %c0_i32_0 = arith.constant 0 : i32
    %c0_i32_1 = arith.constant 0 : i32
    return %c0_i32, %c0_i32_0 : i32, i32
  }
  func.func @transform_7(%arg0: i32, %arg1: i32) -> (i32, i32) {
    %c0_i32 = arith.constant 0 : i32
    %c0_i32_0 = arith.constant 0 : i32
    %c0_i32_1 = arith.constant 0 : i32
    return %c0_i32, %c0_i32_0 : i32, i32
  }
  func.func @transform_8(%arg0: i32, %arg1: i32) -> (i32, i32, i32) {
    %c0_i32 = arith.constant 0 : i32
    %c0_i32_0 = arith.constant 0 : i32
    %c0_i32_1 = arith.constant 0 : i32
    return %arg0, %c0_i32, %c0_i32_0 : i32, i32, i32
  }
}

</mosaic_0001>

<bundles_post_ra>
// kernel: tpu_custom_call.1
= control target key start
LH: loop header
LB: loop body
LE: loop exit
PB: predicated region body
PF: predicated region fallthrough
CT: control target
= control target key end

     0   :  { %s3747_s0 = inlined_call_operand.hbm [shape: bf16[2,8,32], index: 0, kind: input, shape index: {}]   ;;  %s3748_s1 = inlined_call_operand.hbm [shape: bf16[2,32,32], index: 1, kind: input, shape index: {}]   ;;  %s3749_s2 = inlined_call_operand.hbm [shape: bf16[2,32,32], index: 2, kind: input, shape index: {}]   ;;  %s3750_s3 = inlined_call_operand.hbm [shape: bf16[32,32], index: 3, kind: input, shape index: {}]   ;;  %s3751_s4 = inlined_call_operand.hbm [shape: bf16[32,32], index: 4, kind: input, shape index: {}]   ;;  %s3752_s5 = inlined_call_operand.hbm [shape: bf16[32,32], index: 5, kind: input, shape index: {}]   ;;  %s3753_s6 = inlined_call_operand.hbm [shape: bf16[32,32], index: 6, kind: input, shape index: {}]   ;;  %s3754_s7 = inlined_call_operand.vmem [shape: f32[1,32], index: 7, kind: input, shape index: {}]   ;;  %s3755_s8 = inlined_call_operand.hbm [shape: f32[2,8,32], index: 8, kind: output, shape index: {}]  }
   0x1   :  { %3771 = sst [smem:[#allocation31_spill]] %s3747_s0 }
   0x2   :  { %3772 = sst [smem:[#allocation32_spill]] %s3748_s1 }
   0x3   :  { %3773 = sst [smem:[#allocation33_spill]] %s3749_s2 }
   0x4   :  { %3774 = sst [smem:[#allocation34_spill]] %s3750_s3 }
   0x5   :  { %3775 = sst [smem:[#allocation35_spill]] %s3751_s4 }
   0x6   :  { %3776 = sst [smem:[#allocation36_spill]] %s3752_s5 }
   0x7   :  { %3777 = sst [smem:[#allocation37_spill]] %s3753_s6 }
   0x8   :  { %3778 = sst [smem:[#allocation38_spill]] %s3754_s7 }
   0x9   :  { %3779 = sst [smem:[#allocation39_spill]] %s3755_s8 }
   0xa   :  { %13 = vsyncpa [#allocation7], 0 }
   0xb   :  { %15 = vsyncpa [#allocation7 + $0x1], 0 }
   0xc   :  { %16 = vsyncpa [#allocation10], 0 }
   0xd   :  { %18 = vsyncpa [#allocation10 + $0x1], 0 }
   0xe   :  { %19 = vsyncpa [#allocation13], 0 }
   0xf   :  { %20 = vsyncpa [#allocation16], 0 }
  0x10   :  { %21 = vsyncpa [#allocation8], 0 }
  0x11   :  { %23 = vsyncpa [#allocation8 + $0x1], 0  ;;  %s3168_s27 = smov 0   ;;  %s3170_s28 = smov 0  }
  0x12   :  { %s3172_s29 = smov 0   ;;  %s3174_s30 = smov 0  }
  0x13   :  { %s3176_s9 = smov 0   ;;  %s3178_s10 = smov 0  }
  0x14   :  { %s3180_s11 = smov 0   ;;  %s3182_s12 = smov 0  }
  0x15   :  { %s3184_s13 = smov 0   ;;  %s3186_s14 = smov 0  }
  0x16   :  { %s3188_s15 = smov 0  }
  0x17 LB: > { %3780 = sst [smem:[#allocation24_spill]] %s3052_s28  ;;  %s3224_s16 = sadd.s32 4294967295, %s3088_s15   ;;  %s3088_s15 = sphi %s3188_s15, %s29_s15   ;;  %s3084_s14 = sphi %s3186_s14, %s3833_s14   ;;  %s3080_s13 = sphi %s3184_s13, %s3832_s13   ;;  %s3076_s12 = sphi %s3182_s12, %s3831_s12   ;;  %s3072_s11 = sphi %s3180_s11, %s3830_s11   ;;  %s3068_s10 = sphi %s3178_s10, %s3829_s10   ;;  %s3064_s9 = sphi %s3176_s9, %s3828_s9   ;;  %s3060_s30 = sphi %s3174_s30, %s3827_s30   ;;  %s3056_s29 = sphi %s3172_s29, %s3826_s29   ;;  %s3052_s28 = sphi %s3170_s28, %s3825_s28   ;;  %s3048_s27 = sphi %s3168_s27, %s3822_s27  }
  0x18   : > { %3781 = sst [smem:[#allocation25_spill]] %s3072_s11  ;;  %p2382_p0 = scmp.ge.s32.totalorder %s3088_s15, 1 }
  0x19   : > { %3782 = sst [smem:[#allocation26_spill]] %s3076_s12  ;;  %p3768_p1 = scmp.eq.s32.totalorder %s3224_s16, 0 }
  0x1a   : > { %p259_p2 = scmp.lt.s32.totalorder %s3088_s15, 5  ;;  %s3090_s18 = smov [#allocation12]  }
  0x1b   : > { %s271_s19 = sshll.u32 %s3090_s18, 4  ;;  %s3091_s21 = smov [#allocation15]   ;;  %s272_s19 = int_to_ptr.vmem [resolvable:$true] %s271_s19 }
  0x1c   : > { %p3229_p3 = pnand %p2382_p0, %p259_p2  ;;  %s297_s22 = sshll.u32 %s3091_s21, 4  ;;  %s298_s22 = int_to_ptr.vmem [resolvable:$true] %s297_s22 }
  0x1d   : > { %s2779_s23 = scalar_lea.vmem %s272_s19, 256  ;;  %p2787_p10 = scmp.lt.s32.totalorder %s272_s19, %s272_s19 }
  0x1e   : > { %s3783_s17 = scalar_select %p3229_p3, 1, 0 }
  0x1f   : > { %p2576_p4 = pneg %p3229_p3  ;;  %p2780_p7 = scmp.ne.s32.totalorder %s272_s19, %s2779_s23 }
  0x20   : > { %3784 = sst [smem:[#allocation27_spill]] %s3783_s17  ;;  %p2788_p11 = scmp.lt.s32.totalorder %s2779_s23, %s2779_s23 }
  0x21   : > { %p3237_p5 = pnand %p2576_p4, %p3768_p1 }
  0x22   : > { %p2789_p12 = por %p2788_p11, %p2787_p10 }
  0x23   : > { %p2770_p6 = pneg %p3237_p5 }
  0x25   : > { %p2782_p8 = pnand %p2780_p7, %p2770_p6 }
  0x27   : > { %p2783_p9 = pneg %p2782_p8 }
  0x29   : > { %p2790_p13 = pnand %p2789_p12, %p2783_p9 }
  0x2b   : > { %2793 = shalt.err (!%p2790_p13)
}
  0x2c   : > { %s3757_s24 = smov 64   ;;  %s3759_s25 = smov 4  }
  0x2d   : > { %s3786_s3 = sld [smem:[#allocation34_spill]]  ;;  %s2805_s21 = scalar_lea.vmem %s298_s22, 256 }
  0x2e   : > { %p2806_p0 = scmp.ne.s32.totalorder %s298_s22, %s2805_s21  ;;  %p2813_p7 = scmp.lt.s32.totalorder %s298_s22, %s298_s22 }
  0x2f   : > { %p2814_p8 = scmp.lt.s32.totalorder %s2805_s21, %s2805_s21 }
  0x30   : > { %p2808_p2 = pnand %p2806_p0, %p2770_p6 }
  0x31   : > { %p2815_p9 = por %p2814_p8, %p2813_p7 }
  0x32   : > { %p2809_p4 = pneg %p2808_p2 }
  0x33   : > { %2579 = dma.hbm_to_vmem [thread:$0]  (!%p3237_p5), %s3786_s3, 256, %s272_s19, [#allocation13], %s3757_s24, %s3757_s24, %s3759_s25  }
  0x34   : > { %p2816_p10 = pnand %p2815_p9, %p2809_p4 }
  0x36   : > { %2819 = shalt.err (!%p2816_p10)
}
  0x37   : > { %s3787_s5 = sld [smem:[#allocation36_spill]]  ;;  %s38_s19 = sadd.s32 1, %s3080_s13 }
  0x38   : > { %s41_s26 = sadd.s32 1, %s3084_s14  ;;  %p39_p11 = scmp.ge.s32.totalorder %s38_s19, 2 }
  0x39   : > { %p56_p12 = scmp.eq.s32.totalorder %s3088_s15, 0  ;;  %s76_s8 = sadd.s32 1, %s3056_s29 }
  0x3a   : > { %p83_p13 = scmp.ne.s32.totalorder %s3056_s29, %s3052_s28  ;;  %s3835_s19 = smov (%p39_p11, %s38_s19), 0 }
  0x3b   : > { %3788 = sst [smem:[#allocation28_spill]] %s3835_s19  ;;  %s3837_s26 = smov (!%p39_p11, %s41_s26), %s3084_s14 }
  0x3c   : > { %s72_s18 = ssub.s32 %s3080_s13, %s3835_s19  ;;  %p3278_p0 = por %p83_p13, %p56_p12 }
  0x3d   : > { %2585 = dma.hbm_to_vmem [thread:$0]  (!%p3237_p5), %s3787_s5, 256, %s298_s22, [#allocation16], %s3757_s24, %s3757_s24, %s3759_s25  }
  0x3e   : > { %p43_p2 = scmp.ge.s32.totalorder %s3837_s26, 2  ;;  %p89_p4 = scmp.ne.s32.totalorder %s3052_s28, %s3048_s27 }
  0x3f   : > { %p3767_p7 = scmp.lt.s32.totalorder %s3088_s15, 4  ;;  %s345_s21 = sand.u32 1, %s3088_s15  }
  0x40   : > { %s3839_s26 = smov (%p43_p2, %s3837_s26), 0  ;;  %p3290_p8 = por %p89_p4, %p3768_p1 }
  0x41   : > { %3790 = sst [smem:[#allocation29_spill]] %s3839_s26  ;;  %s3296_s24 = ssub.s32 %s3084_s14, %s3839_s26 }
  0x42   : > { %s3791_s23 = scalar_select %p3290_p8, 1, 0 }
  0x43   : > { %s347_s25 = sand.u32 1, %s3056_s29   ;;  %s73_s3 = sor.u32 %s72_s18, %s3296_s24 }
  0x44   : > { %3792 = sst [smem:[#allocation30_spill]] %s3791_s23  ;;  %s3300_s5 = sshll.u32 %s347_s25, 3 }
  0x45   : > { %p74_p9 = scmp.eq.s32.totalorder %s73_s3, 0  ;;  %s2391_s27 = sshll.u32 %s3080_s13, 1 }
  0x46   : > { %s2392_s19 = sshll.u32 %s3084_s14, 2  ;;  %s349_s11 = scalar_lea.vmem [#allocation9], %s3300_s5 }
  0x47   : > { %s3305_s12 = scalar_select %p74_p9, %s3056_s29, %s76_s8  }
  0x48   : > { %s355_s7 = sadd.s32 %s2392_s19, %s2391_s27  ;;  %s358_s28 = sshll.u32 %s349_s11, 4  ;;  %s359_s28 = int_to_ptr.vmem [resolvable:$true] %s358_s28 }
  0x49   : > { %s2393_s17 = sshll.u32 %s355_s7, 6  ;;  %s3793_s1 = sld [smem:[#allocation32_spill]] }
  0x4a   : > { %p3315_p10 = pnand %p3767_p7, %p3278_p0  ;;  %s3795_s2 = sld [smem:[#allocation33_spill]] }
  0x4b   : > { %s3324_s11 = scalar_lea.sflag [#allocation10], %s345_s21  ;;  %s2833_s7 = scalar_lea.vmem %s359_s28, 128 }
  0x4c   : > { %p3769_p11 = pneg %p3315_p10  ;;  %p2834_p13 = scmp.ne.s32.totalorder %s359_s28, %s2833_s7 }
  0x4d   : > { %s3094_s0 = smov [#allocation9]  }
  0x4e   : > { %p2836_p2 = pnand %p2834_p13, %p3769_p11  ;;  %s2838_s8 = sshll.u32 %s3094_s0, 4  ;;  %s2839_s8 = int_to_ptr.vmem [resolvable:$false] %s2838_s8 }
  0x4f   : > { %s357_s26 = scalar_lea.hbm %s3793_s1, %s2393_s17  ;;  %s2840_s22 = scalar_lea.vmem %s2839_s8, 256 }
  0x50   : > { %s3322_s19 = scalar_lea.hbm %s3795_s2, %s2393_s17  ;;  %p2837_p0 = pneg %p2836_p2 }
  0x51   : > { %p2841_p4 = scmp.lt.s32.totalorder %s359_s28, %s2839_s8  ;;  %p2842_p9 = scmp.lt.s32.totalorder %s2840_s22, %s2833_s7 }
  0x53   : > { %p2843_p7 = por %p2842_p9, %p2841_p4 }
  0x55   : > { %p2844_p1 = pnand %p2843_p7, %p2837_p0 }
  0x57   : > { %2847 = shalt.err (!%p2844_p1)
}
  0x58   : > { %s3796_s17 = smov 4   ;;  %s3797_s21 = smov 64  }
  0x59   : > { %2595 = dma.hbm_to_vmem [thread:$0]  (!%p3315_p10), %s357_s26, 128, %s359_s28, %s3324_s11, %s3797_s21, %s3797_s21, %s3796_s17  }
  0x5a   : > { %s372_s23 = scalar_lea.vmem [#allocation11], %s3300_s5  ;;  %s3095_s3 = smov [#allocation14]  }
  0x5b   : > { %s3338_s27 = sshll.u32 %s372_s23, 4  ;;  %s284_s18 = sshll.u32 %s3095_s3, 4  ;;  %s285_s18 = int_to_ptr.vmem [resolvable:$true] %s284_s18  ;;  %s3401_s27 = int_to_ptr.vmem [resolvable:$true] %s3338_s27 }
  0x5c   : > { %s3096_s0 = smov [#allocation17]   ;;  %s2859_s8 = scalar_lea.vmem %s285_s18, 256 }
  0x5d   : > { %s310_s7 = sshll.u32 %s3096_s0, 4  ;;  %p2860_p7 = scmp.ne.s32.totalorder %s285_s18, %s2859_s8  ;;  %s311_s7 = int_to_ptr.vmem [resolvable:$true] %s310_s7 }
  0x5e   : > { %p2867_p2 = scmp.lt.s32.totalorder %s285_s18, %s285_s18  ;;  %p2868_p0 = scmp.lt.s32.totalorder %s2859_s8, %s2859_s8 }
  0x5f   : > { %p2862_p1 = pnand %p2860_p7, %p2770_p6 }
  0x60   : > { %p2869_p4 = por %p2868_p0, %p2867_p2 }
  0x61   : > { %p2863_p13 = pneg %p2862_p1 }
  0x63   : > { %p2870_p9 = pnand %p2869_p4, %p2863_p13 }
  0x65   : > { %2873 = shalt.err (!%p2870_p9)
}
  0x66   : > { %s3798_s4 = sld [smem:[#allocation35_spill]]  ;;  %s2885_s26 = scalar_lea.vmem %s311_s7, 256 }
  0x67   : > { %p2886_p11 = scmp.ne.s32.totalorder %s311_s7, %s2885_s26  ;;  %p2893_p2 = scmp.lt.s32.totalorder %s311_s7, %s311_s7 }
  0x68   : > { %p2894_p13 = scmp.lt.s32.totalorder %s2885_s26, %s2885_s26 }
  0x69   : > { %p2888_p7 = pnand %p2886_p11, %p2770_p6 }
  0x6a   : > { %p2895_p0 = por %p2894_p13, %p2893_p2 }
  0x6b   : > { %p2889_p1 = pneg %p2888_p7 }
  0x6c   : > { %2582 = dma.hbm_to_vmem [thread:$0]  (!%p3237_p5), %s3798_s4, 256, %s285_s18, [#allocation13], %s3797_s21, %s3797_s21, %s3796_s17  }
  0x6d   : > { %p2896_p4 = pnand %p2895_p0, %p2889_p1 }
  0x6f   : > { %2899 = shalt.err (!%p2896_p4)
}
  0x70   : > { %s3799_s6 = sld [smem:[#allocation37_spill]]  ;;  %s2381_s20 = sadd.s32 4294967294, %s3088_s15  }
  0x71   : > { %p46_p6 = scmp.eq.s32.totalorder %s3296_s24, 0  ;;  %s48_s3 = sadd.s32 1, %s3068_s10 }
  0x72   : > { %p55_p11 = scmp.ne.s32.totalorder %s3068_s10, %s3064_s9  ;;  %p61_p9 = scmp.ne.s32.totalorder %s3064_s9, %s3060_s30 }
  0x73   : > { %s3370_s18 = scalar_select %p46_p6, %s3068_s10, %s48_s3  }
  0x74   : > { %p57_p7 = por %p56_p12, %p55_p11  ;;  %p3800_p1 = scmp.eq.s32.totalorder %s3224_s16, 0 }
  0x75   : > { %p246_p13 = scmp.eq.s32.totalorder %s3224_s16, 3  ;;  %p252_p0 = scmp.eq.s32.totalorder %s2381_s20, 3 }
  0x76   : > { %2588 = dma.hbm_to_vmem [thread:$0]  (!%p3237_p5), %s3799_s6, 256, %s311_s7, [#allocation16], %s3797_s21, %s3797_s21, %s3796_s17  }
  0x77   : > { %p3376_p2 = por %p3800_p1, %p61_p9  ;;  %s327_s8 = sand.u32 1, %s3068_s10  }
  0x78   : > { %s2389_s7 = sshll.u32 %s3084_s14, 6  ;;  %p3383_p5 = por %p246_p13, %p55_p11 }
  0x79   : > { %p3387_p4 = por %p252_p0, %p61_p9  ;;  %s2388_s28 = sshll.u32 %s327_s8, 2 }
  0x7a   : > { %s3802_s24 = scalar_select %p3383_p5, 1, 0 }
  0x7b   : > { %s3803_s5 = scalar_select %p3387_p4, 1, 0 }
  0x7c   : > { %s3804_s23 = sld [smem:[#allocation31_spill]]  ;;  %s331_s1 = scalar_lea.vmem [#allocation6], %s2388_s28 }
  0x7d   : > { %s338_s2 = sshll.u32 %s331_s1, 4  ;;  %p3805_p12 = scmp.lt.s32.totalorder %s3088_s15, 4  ;;  %s339_s2 = int_to_ptr.vmem [resolvable:$true] %s338_s2 }
  0x7e   : > { %s328_s4 = scalar_lea.sflag [#allocation7], %s327_s8  ;;  %s2913_s6 = scalar_lea.vmem %s339_s2, 64 }
  0x7f   : > { %p3396_p6 = pnand %p3805_p12, %p57_p7  ;;  %p2914_p9 = scmp.ne.s32.totalorder %s339_s2, %s2913_s6 }
  0x80   : > { %s3097_s26 = smov [#allocation6]  }
  0x81   : > { %p2902_p11 = pneg %p3396_p6 }
  0x82   : > { %s336_s3 = scalar_lea.hbm %s3804_s23, %s2389_s7  ;;  %s2918_s7 = sshll.u32 %s3097_s26, 4  ;;  %s2919_s7 = int_to_ptr.vmem [resolvable:$false] %s2918_s7 }
  0x83   : > { %p2916_p1 = pnand %p2914_p9, %p2902_p11  ;;  %s2920_s1 = scalar_lea.vmem %s2919_s7, 128 }
  0x84   : > { %p2921_p0 = scmp.lt.s32.totalorder %s339_s2, %s2919_s7  ;;  %p2922_p7 = scmp.lt.s32.totalorder %s2920_s1, %s2913_s6 }
  0x85   : > { %p2917_p13 = pneg %p2916_p1 }
  0x86   : > { %p2923_p12 = por %p2922_p7, %p2921_p0 }
  0x88   : > { %p2924_p4 = pnand %p2923_p12, %p2917_p13 }
  0x8a   : > { %2927 = shalt.err (!%p2924_p4)
}
  0x8b   : > { %2592 = dma.hbm_to_vmem [thread:$0]  (!%p3396_p6), %s336_s3, 64, %s339_s2, %s328_s4  }
  0x8c   : > { %s2941_s8 = scalar_lea.vmem %s3401_s27, 128  ;;  %p3807_p11 = pneg %p3315_p10 }
  0x8d   : > { %p2942_p5 = scmp.ne.s32.totalorder %s3401_s27, %s2941_s8  ;;  %s3098_s28 = smov [#allocation11]  }
  0x8e   : > { %s2946_s22 = sshll.u32 %s3098_s28, 4  ;;  %s2947_s22 = int_to_ptr.vmem [resolvable:$false] %s2946_s22 }
  0x8f   : > { %p2944_p9 = pnand %p2942_p5, %p3807_p11  ;;  %s2948_s6 = scalar_lea.vmem %s2947_s22, 256 }
  0x90   : > { %p2949_p0 = scmp.lt.s32.totalorder %s3401_s27, %s2947_s22  ;;  %p2950_p13 = scmp.lt.s32.totalorder %s2948_s6, %s2941_s8 }
  0x91   : > { %p2945_p1 = pneg %p2944_p9 }
  0x92   : > { %p2951_p4 = por %p2950_p13, %p2949_p0 }
  0x94   : > { %p2952_p7 = pnand %p2951_p4, %p2945_p1 }
  0x96   : > { %2955 = shalt.err (!%p2952_p7)
}
  0x97   : > { %2598 = dma.hbm_to_vmem [thread:$0]  (!%p3315_p10), %s3322_s19, 128, %s3401_s27, %s3324_s11, %s3797_s21, %s3797_s21, %s3796_s17  }
  0x98   : > { %393 = sbr.rel (%p3229_p3) target bundleno = 2103 (0x837), region = 52  ;;  %s3424_s4 = sand.u32 (!%p3229_p3), 1, %s3064_s9  }
  0x99   : > { %s2399_s23 = sshll.u32 (!%p3229_p3), %s3424_s4, 2  ;;  %s396_s3 = scalar_lea.sflag (!%p3229_p3), [#allocation7], %s3424_s4 }
  0x9a   : > { %s3428_s20 = scalar_lea.vmem (!%p3229_p3), [#allocation6], %s2399_s23 }
  0x9d   : > { %3027 = dma.done.wait (%p3376_p2), %s396_s3, 64  }
  0x9e   : > { %3029 = vsyncadd (%p3376_p2), %s396_s3, 4294967232  ;;  %s3809_s25 = sld [smem:[#allocation24_spill]]  ;;  %s404_s11 = sand.u32 1, %s3224_s16  }
  0x9f   : > { %s405_s27 = scalar_lea.sflag [#allocation10], %s404_s11 }
  0xa4   : > { %s406_s17 = sand.u32 1, %s3809_s25  }
  0xa5   : > { %s3436_s21 = sshll.u32 %s406_s17, 3 }
  0xa6   : > { %s408_s26 = scalar_lea.vmem [#allocation9], %s3436_s21 }
  0xa7   : > { %3031 = dma.done.wait (%p3290_p8), %s405_s27, 256  }
  0xa8   : > { %3033 = vsyncadd (%p3290_p8), %s405_s27, 4294967040  ;;  %s417_s7 = scalar_lea.vmem [#allocation11], %s3436_s21  ;;  %p3811_p3 = scmp.eq.s32.totalorder %s3224_s16, 0 }
  0xaa   : > { %3035 = dma.done.wait (%p3811_p3), [#allocation13], 512   ;;  %p3812_p10 = pmov %p3811_p3 }
  0xab   : > { %p3813_p2 = pmov %p3811_p3 }
  0xac   : > { %3037 = vsyncadd (%p3812_p10), [#allocation13], 4294966784 }
  0xad   : > { %3039 = dma.done.wait (%p3813_p2), [#allocation16], 512   ;;  %p3814_p5 = pmov %p3813_p2 }
  0xae   : > { %s2406_s0 = sshll.u32 %s3424_s4, 3  ;;  %s3815_s8 = sld [smem:[#allocation25_spill]] }
  0xaf   : > { %3041 = vsyncadd (%p3814_p5), [#allocation16], 4294966784  ;;  %s3453_s1 = scalar_lea.vmem [#allocation18], %s2406_s0 }
  0xb4   : > { %p2407_p8 = scmp.ne.s32.totalorder %s3815_s8, 0 }
  0xb5   : > { %s3102_s16 = smov (!%p2407_p8), 104   ;;  %s3103_s28 = smov (!%p2407_p8), 120  }
  0xb6   : > { %482 = sbr.rel (%p2407_p8) target bundleno = 538 (0x21a), region = 84  ;;  %s3104_s22 = smov (!%p2407_p8), 112  }
  0xbb   : > { %vm722_vm0 = vcmask 7168   ;;  %vm731_vm1 = vcmask 64512   ;;  %v3099_v0 = vmov 0.0   ;;  %v3100_v1 = vmov -inf   ;;  %v2730_v2 = vld [vmem:[#allocation12 + $0x8] sm:$0xff]   ;;  %v2731_v3 = vld [vmem:[#allocation12] sm:$0xff]  }
  0xbc   : > { %2472 = vmatprep.subr.bf16.mxu0 %v3099_v0  ;;  %723 = vst.msk [vmem:[#allocation3] sm:$0xff] %vm722_vm0, %v3100_v1  ;;  %724 = vst.msk [vmem:[#allocation3 + $0x8] sm:$0xff] %vm722_vm0, %v3100_v1  ;;  %vm3101_vm2 = vmmov 0   ;;  %v483_v4 = vld [vmem:[%s3428_s20] sm:$0xf]  ;;  %vm500_vm3 = vcmask 261120   ;;  %v555_v12 = vlaneseq }
  0xbd   : > { %725 = vst.msk [vmem:[#allocation3 + $0x10] sm:$0xff] %vm722_vm0, %v3100_v1  ;;  %726 = vst.msk [vmem:[#allocation3 + $0x18] sm:$0xff] %vm722_vm0, %v3100_v1  ;;  %2476 = vmatprep.mubr.msk.bf16.mxu0 %vm3101_vm2, %v3099_v0  ;;  %2473 = vmatpush3.bf16.msra.mxu0 %v2730_v2  ;;  %v3105_v10 = vmov 1983009808   ;;  %v3106_v13 = vmov 1934713408  }
  0xbe   : > { %727 = vst.msk [vmem:[#allocation4] sm:$0xff] %vm722_vm0, %v3099_v0  ;;  %728 = vst.msk [vmem:[#allocation4 + $0x8] sm:$0xff] %vm722_vm0, %v3099_v0  ;;  %2474 = vmatprep.subr.bf16.mxu0 %v3099_v0  ;;  %v553_v11 = vunpack.c.l.s4 %v3105_v10  ;;  %v570_v14 = vunpack.c.l.s4 %v3106_v13  ;;  %v556_v16 = vshrl.u32 %v555_v12, 7  ;;  %v3107_v33 = vmov 0  }
  0xbf   : > { %729 = vst.msk [vmem:[#allocation4 + $0x10] sm:$0xff] %vm722_vm0, %v3099_v0  ;;  %730 = vst.msk [vmem:[#allocation4 + $0x18] sm:$0xff] %vm722_vm0, %v3099_v0  ;;  %vm717_vm4 = vcmask 60416  }
  0xc0   : > { %732 = vst.msk [vmem:[#allocation5] sm:$0xff] %vm731_vm1, %v3099_v0  ;;  %733 = vst.msk [vmem:[#allocation5 + $0x8] sm:$0xff] %vm731_vm1, %v3099_v0  ;;  %v554_v15 = vunpack.c.0.s8 %v553_v11  ;;  %v571_v17 = vunpack.c.0.s8 %v570_v14 }
  0xc1   : > { %734 = vst.msk [vmem:[#allocation5 + $0x10] sm:$0xff] %vm731_vm1, %v3099_v0  ;;  %735 = vst.msk [vmem:[#allocation5 + $0x18] sm:$0xff] %vm731_vm1, %v3099_v0  ;;  %2475 = vmatpush3.bf16.msra.mxu0 %v2731_v3 }
  0xc2   : > { %v557_v18 = vsub.s32 %v554_v15, %v556_v16  ;;  %v574_v22 = vsub.s32 %v571_v17, %v556_v16 }
  0xc4   : > { %2477 = vmatmul.mubr.msk.bf16.vlgmr.msra.gmra.mxu0 %vm500_vm3, %v483_v4 }
 0x184   : > { %v538_v5 = vpop.f32.mrf.mxu0 }
 0x185   : > { %v544_v6 = vpack.c.bf16 %v538_v5, %v538_v5 }
 0x186   : > { %v2478_v7 = vpop.f32.mrf.mxu0 }
 0x187   : > { %550 = vrot.lane.b32.xlu1 %v544_v6, %s3102_s16  ;;  %546 = vrot.lane.b32.xlu0 %v544_v6, %s3103_s28  ;;  %v558_v29 = vrot.slane %v544_v6, %v557_v18 }
 0x188   : > { %v541_v8 = vpop.f32.mrf.mxu0 }
 0x18a   : > { %v2479_v9 = vpop.f32.mrf.mxu0 }
 0x18b   : > { %548 = vrot.lane.b32.xlu0 %v544_v6, %s3104_s22 }
 0x1f9   : > { %v551_v19 = vpop.permute.xlu1 %550  ;;  %v547_v20 = vpop.permute.xlu0 %546 }
 0x1fa   : > { %v600_v21 = vrot.slane %v551_v19, %v557_v18  ;;  %v592_v23 = vrot.slane %v547_v20, %v557_v18 }
 0x1fc   : > { %v601_v24 = vcombine.low %v592_v23, %v600_v21  ;;  %v602_v25 = vcombine.high %v592_v23, %v600_v21 }
 0x1fd   : > { %v549_v26 = vpop.permute.xlu0 %548 }
 0x1fe   : > { %v609_v27 = vrot.slane %v601_v24, %v574_v22  ;;  %v566_v28 = vrot.slane %v549_v26, %v557_v18  ;;  %v616_v30 = vrot.slane %v602_v25, %v574_v22 }
 0x200   : > { %v567_v31 = vcombine.low %v558_v29, %v566_v28  ;;  %v568_v32 = vcombine.high %v558_v29, %v566_v28  ;;  %v617_v34 = vcombine.high %v609_v27, %v3107_v33  ;;  %v618_v37 = vcombine.high %v616_v30, %v3107_v33 }
 0x201   : > { %v624_v38 = vshrl.u32 %v609_v27, 16  ;;  %v640_v44 = vshrl.u32 %v616_v30, 16 }
 0x202   : > { %v575_v35 = vrot.slane %v567_v31, %v574_v22  ;;  %v582_v36 = vrot.slane %v568_v32, %v574_v22  ;;  %v632_v43 = vshrl.u32 %v617_v34, 16  ;;  %v648_v51 = vshrl.u32 %v618_v37, 16 }
 0x204   : > { %v583_v39 = vcombine.high %v575_v35, %v3107_v33  ;;  %v584_v40 = vcombine.high %v582_v36, %v3107_v33  ;;  %v621_v41 = vpack.i.b16 %v609_v27, %v575_v35  ;;  %v623_v42 = vshrl.u32 %v575_v35, 16 }
 0x205   : > { %v637_v45 = vpack.i.b16 %v616_v30, %v582_v36  ;;  %v639_v46 = vshrl.u32 %v582_v36, 16 }
 0x206   : > { %v625_v47 = vpack.i.b16 %v624_v38, %v623_v42  ;;  %v629_v48 = vpack.i.b16 %v617_v34, %v583_v39  ;;  %v631_v49 = vshrl.u32 %v583_v39, 16  ;;  %v645_v50 = vpack.i.b16 %v618_v37, %v584_v40 }
 0x207   : > { %v641_v52 = vpack.i.b16 %v640_v44, %v639_v46  ;;  %v647_v53 = vshrl.u32 %v584_v40, 16  ;;  %v651_v54 = vcombine.low %v621_v41, %v637_v45 }
 0x208   : > { %v633_v55 = vpack.i.b16 %v632_v43, %v631_v49  ;;  %v659_v56 = vcombine.low %v629_v48, %v645_v50 }
 0x209   : > { %v649_v57 = vpack.i.b16 %v648_v51, %v647_v53  ;;  %v676_v58 = vcombine.low %v625_v47, %v641_v52  ;;  %v658_v59 = vrot.slane %v651_v54, %v557_v18 }
 0x20a   : > { %v666_v60 = vrot.slane %v659_v56, %v557_v18 }
 0x20b   : > { %v684_v61 = vcombine.low %v633_v55, %v649_v57  ;;  %v683_v63 = vrot.slane %v676_v58, %v557_v18 }
 0x20c   : > { %v667_v62 = vcombine.low %v658_v59, %v666_v60 }
 0x20d   : > { %v691_v0 = vrot.slane %v684_v61, %v557_v18 }
 0x20e   : > { %v674_v1 = vrot.slane %v667_v62, %v574_v22 }
 0x20f   : > { %v692_v2 = vcombine.low %v683_v63, %v691_v0 }
 0x210   : > { %v675_v3 = vcombine.high %v674_v1, %v3107_v33  ;;  %v705_v7 = vshrl.u32 %v674_v1, 16 }
 0x211   : > { %v699_v4 = vrot.slane %v692_v2, %v574_v22 }
 0x212   : > { %v713_v11 = vshrl.u32 %v675_v3, 16 }
 0x213   : > { %v700_v5 = vcombine.high %v699_v4, %v3107_v33  ;;  %v703_v6 = vpack.i.b16 %v699_v4, %v674_v1  ;;  %v706_v8 = vshrl.u32 %v699_v4, 16 }
 0x215   : > { %v707_v9 = vpack.i.b16 %v706_v8, %v705_v7  ;;  %v711_v10 = vpack.i.b16 %v700_v5, %v675_v3  ;;  %v714_v12 = vshrl.u32 %v700_v5, 16  ;;  %718 = vst.msk [vmem:[#allocation2] sm:$0xf] %vm717_vm4, %v703_v6 }
 0x217   : > { %v715_v13 = vpack.i.b16 %v714_v12, %v713_v11  ;;  %719 = vst.msk [vmem:[#allocation2 + $0x4] sm:$0xf] %vm717_vm4, %v707_v9  ;;  %720 = vst.msk [vmem:[#allocation2 + $0x8] sm:$0xf] %vm717_vm4, %v711_v10 }
 0x219   : > { %721 = vst.msk [vmem:[#allocation2 + $0xc] sm:$0xf] %vm717_vm4, %v715_v13 }
 0x21a PF: > { %v2734_v14 = vld [vmem:[#allocation14 + $0x8] sm:$0xff]   ;;  %v3108_v15 = vmov 0.0   ;;  %v2735_v16 = vld [vmem:[#allocation14] sm:$0xff]   ;;  %vm3109_vm5 = vmmov 0   ;;  %v2736_v17 = vld [vmem:[%s408_s26] sm:$0xff]   ;;  %vm761_vm6 = vcmask 261120   ;;  %v906_v29 = vlaneseq }
 0x21b   : > { %2480 = vmatprep.subr.bf16.mxu0 %v3108_v15  ;;  %2488 = vmatprep.subr.bf16.mxu1 %v3108_v15  ;;  %v3110_v18 = vmov 0   ;;  %s3111_s6 = smov 104   ;;  %s3112_s2 = smov 120   ;;  %v2737_v24 = vld [vmem:[#allocation15 + $0x8] sm:$0xff]   ;;  %v2738_v25 = vld [vmem:[#allocation15] sm:$0xff]   ;;  %v2739_v26 = vld [vmem:[%s417_s7] sm:$0xff]  }
 0x21c   : > { %2481 = vmatpush3.bf16.msra.mxu0 %v2734_v14  ;;  %2484 = vmatprep.mubr.msk.bf16.mxu0 %vm3109_vm5, %v3108_v15  ;;  %s3113_s23 = smov 112   ;;  %v3114_v27 = vmov 1983009808   ;;  %v907_v31 = vshrl.u32 %v906_v29, 7  ;;  %v3115_v32 = vmov 1934713408   ;;  %v3480_v35 = vpack.i.b16 %v3110_v18, %v3110_v18 }
 0x21d   : > { %2482 = vmatprep.subr.bf16.mxu0 %v3108_v15  ;;  %2492 = vmatprep.mubr.msk.bf16.mxu1 %vm3109_vm5, %v3108_v15  ;;  %v904_v28 = vunpack.c.l.s4 %v3114_v27  ;;  %v935_v33 = vunpack.c.l.s4 %v3115_v32  ;;  %vm1421_vm7 = vcmask 64512   ;;  %vm1610_vm8 = vcmask 130048   ;;  %s3816_s3 = sld [smem:[#allocation25_spill]] }
 0x21e   : > { %2732 = vset.pattern.permute.xlu0 %v3110_v18  ;;  %2733 = vset.pattern.permute.xlu1 %v3110_v18  ;;  %vm1695_vm9 = vcmask 7168  }
 0x21f   : > { %2489 = vmatpush3.bf16.msra.mxu1 %v2737_v24  ;;  %v905_v30 = vunpack.c.0.s8 %v904_v28  ;;  %v936_v41 = vunpack.c.0.s8 %v935_v33 }
 0x220   : > { %2483 = vmatpush3.bf16.msra.mxu0 %v2735_v16  ;;  %2490 = vmatprep.subr.bf16.mxu1 %v3108_v15 }
 0x221   : > { %2496 = vmatprep.subr.bf16.mxu0 %v3108_v15  ;;  %v3482_v40 = vsub.s32 %v905_v30, %v907_v31  ;;  %v3486_v49 = vsub.s32 %v936_v41, %v907_v31 }
 0x223   : > { %2485 = vmatmul.mubr.msk.bf16.vlgmr.msra.gmra.mxu0 %vm761_vm6, %v2736_v17  ;;  %2491 = vmatpush3.bf16.msra.mxu1 %v2738_v25  ;;  %p2435_p6 = scmp.ne.s32.totalorder %s3816_s3, 1 }
 0x224   : > { %2498 = vmatprep.mubr.msk.bf16.mxu0 %vm3109_vm5, %v3108_v15  ;;  %2502 = vmatprep.subr.bf16.mxu1 %v3108_v15  ;;  %s3119_s20 = smov (!%p2435_p6), 8   ;;  %s3120_s25 = smov (!%p2435_p6), 16  }
 0x225   : > { %s3121_s19 = smov (!%p2435_p6), 24   ;;  %s3817_s21 = sld [smem:[#allocation38_spill]] (!%p2435_p6) }
 0x226   : > { %2493 = vmatmul.mubr.msk.bf16.vlgmr.msra.gmra.mxu1 %vm761_vm6, %v2739_v26 }
 0x227   : > { %2504 = vmatprep.mubr.msk.bf16.mxu1 %vm3109_vm5, %v3108_v15 }
 0x2e3   : > { %v799_v19 = vpop.f32.mrf.mxu0 }
 0x2e5   : > { %v2486_v20 = vpop.f32.mrf.mxu0 }
 0x2e7   : > { %v802_v21 = vpop.f32.mrf.mxu0 }
 0x2e8   : > { %v806_v22 = vpack.c.bf16 %v802_v21, %v799_v19 }
 0x2e9   : > { %v2487_v23 = vpop.f32.mrf.mxu0 }
 0x2ea   : > { %878 = vrot.lane.b32.xlu1 %v806_v22, %s3111_s6  ;;  %874 = vrot.lane.b32.xlu0 %v806_v22, %s3112_s2  ;;  %v884_v38 = vshrl.u32 %v806_v22, 16 }
 0x2ee   : > { %876 = vrot.lane.b32.xlu0 %v806_v22, %s3113_s23 }
 0x35c   : > { %v875_v34 = vpop.permute.xlu0 %874  ;;  %v879_v39 = vpop.permute.xlu1 %878 }
 0x35d   : > { %v882_v36 = vpack.i.b16 %v875_v34, %v806_v22  ;;  %v885_v37 = vshrl.u32 %v875_v34, 16  ;;  %v893_v46 = vshrl.u32 %v879_v39, 16 }
 0x35f   : > { %v886_v42 = vpack.i.b16 %v885_v37, %v884_v38  ;;  %v902_v44 = vcombine.high %v882_v36, %v3480_v35  ;;  %v909_v48 = vrot.slane %v882_v36, %v3482_v40 }
 0x360   : > { %v877_v43 = vpop.permute.xlu0 %876 }
 0x361   : > { %v890_v45 = vpack.i.b16 %v879_v39, %v877_v43  ;;  %v892_v47 = vshrl.u32 %v877_v43, 16  ;;  %v968_v52 = vcombine.high %v886_v42, %v3480_v35  ;;  %v916_v54 = vrot.slane %v902_v44, %v3482_v40 }
 0x362   : > { %v975_v58 = vrot.slane %v886_v42, %v3482_v40 }
 0x363   : > { %v917_v50 = vcombine.high %v890_v45, %v3480_v35  ;;  %v924_v51 = vrot.slane %v890_v45, %v3482_v40  ;;  %v894_v53 = vpack.i.b16 %v893_v46, %v892_v47  ;;  %v982_v1 = vrot.slane %v968_v52, %v3482_v40 }
 0x365   : > { %v931_v55 = vrot.slane %v917_v50, %v3482_v40  ;;  %v932_v56 = vcombine.low %v909_v48, %v924_v51  ;;  %v933_v57 = vcombine.high %v909_v48, %v924_v51  ;;  %v983_v59 = vcombine.high %v894_v53, %v3480_v35 }
 0x366   : > { %v990_v60 = vrot.slane %v894_v53, %v3482_v40 }
 0x367   : > { %v940_v61 = vrot.slane %v932_v56, %v3486_v49  ;;  %v947_v62 = vrot.slane %v933_v57, %v3486_v49  ;;  %v948_v63 = vcombine.low %v916_v54, %v931_v55  ;;  %v949_v0 = vcombine.high %v916_v54, %v931_v55  ;;  %v1417_v54 = vld [vmem:[#allocation2] sm:$0xf]  ;;  %v1418_v56 = vld [vmem:[#allocation2 + $0x4] sm:$0xf] }
 0x368   : > { %v997_v2 = vrot.slane %v983_v59, %v3482_v40  ;;  %v998_v3 = vcombine.low %v975_v58, %v990_v60  ;;  %v999_v4 = vcombine.high %v975_v58, %v990_v60  ;;  %v1419_v59 = vld [vmem:[#allocation2 + $0x8] sm:$0xf]  ;;  %v1420_v60 = vld [vmem:[#allocation2 + $0xc] sm:$0xf] }
 0x369   : > { %v956_v5 = vrot.slane %v948_v63, %v3486_v49  ;;  %v963_v6 = vrot.slane %v949_v0, %v3486_v49  ;;  %v1034_v7 = vcombine.low %v940_v61, %v947_v62  ;;  %v2419_v8 = vcombine.high %v940_v61, %v947_v62  ;;  %v865_v61 = vpop.f32.mrf.mxu1 }
 0x36a   : > { %v1006_v9 = vrot.slane %v998_v3, %v3486_v49  ;;  %v1013_v10 = vrot.slane %v999_v4, %v3486_v49  ;;  %v1014_v11 = vcombine.low %v982_v1, %v997_v2  ;;  %v1015_v12 = vcombine.high %v982_v1, %v997_v2 }
 0x36b   : > { %v1041_v13 = vrot.slane %v1034_v7, %v3482_v40  ;;  %v1049_v14 = vrot.slane %v2419_v8, %v3482_v40  ;;  %v1050_v16 = vcombine.low %v956_v5, %v963_v6  ;;  %v2420_v17 = vcombine.high %v956_v5, %v963_v6  ;;  %v2494_v62 = vpop.f32.mrf.mxu1 }
 0x36c   : > { %v1022_v18 = vrot.slane %v1014_v11, %v3486_v49  ;;  %v1029_v19 = vrot.slane %v1015_v12, %v3486_v49  ;;  %v1084_v20 = vcombine.low %v1006_v9, %v1013_v10  ;;  %v2421_v21 = vcombine.high %v1006_v9, %v1013_v10 }
 0x36d   : > { %v1057_v22 = vrot.slane %v1050_v16, %v3482_v40  ;;  %v1065_v23 = vrot.slane %v2420_v17, %v3482_v40  ;;  %v1066_v24 = vcombine.low %v1041_v13, %v1049_v14  ;;  %v868_v63 = vpop.f32.mrf.mxu1 }
 0x36e   : > { %v1100_v25 = vcombine.low %v1022_v18, %v1029_v19  ;;  %v2422_v26 = vcombine.high %v1022_v18, %v1029_v19  ;;  %v1091_v27 = vrot.slane %v1084_v20, %v3482_v40  ;;  %v1099_v28 = vrot.slane %v2421_v21, %v3482_v40 }
 0x36f   : > { %v1074_v29 = vcombine.low %v1057_v22, %v1065_v23  ;;  %v1073_v34 = vrot.slane %v1066_v24, %v3486_v49  ;;  %v3538_v0 = vpack.c.bf16 %v868_v63, %v865_v61  ;;  %v2495_v1 = vpop.f32.mrf.mxu1  ;;  %v1606_v23 = vld [vmem:[#allocation3] sm:$0xff] }
 0x370   : > { %v1107_v30 = vrot.slane %v1100_v25, %v3482_v40  ;;  %v1115_v31 = vrot.slane %v2422_v26, %v3482_v40  ;;  %v1116_v32 = vcombine.low %v1091_v27, %v1099_v28  ;;  %v1607_v25 = vld [vmem:[#allocation3 + $0x8] sm:$0xff] }
 0x371   : > { %v1081_v33 = vrot.slane %v1074_v29, %v3486_v49 }
 0x372   : > { %v1124_v36 = vcombine.low %v1107_v30, %v1115_v31  ;;  %v1123_v38 = vrot.slane %v1116_v32, %v3486_v49  ;;  %v3564_v32 = vld [vmem:[#allocation3 + $0x10] sm:$0xff] }
 0x373   : > { %v1082_v37 = vcombine.low %v1073_v34, %v1081_v33  ;;  %v1083_v48 = vcombine.high %v1073_v34, %v1081_v33 }
 0x374   : > { %v1131_v39 = vrot.slane %v1124_v36, %v3486_v49  ;;  %v3566_v36 = vld [vmem:[#allocation3 + $0x18] sm:$0xff] }
 0x375   : > { %v1137_v43 = vshrl.u32 %v1082_v37, 16  ;;  %v1143_v53 = vshrl.u32 %v1083_v48, 16 }
 0x376   : > { %v1132_v41 = vcombine.low %v1123_v38, %v1131_v39  ;;  %v1133_v45 = vcombine.high %v1123_v38, %v1131_v39 }
 0x378   : > { %v1136_v42 = vpack.i.b16 %v1132_v41, %v1082_v37  ;;  %v1138_v44 = vshrl.u32 %v1132_v41, 16  ;;  %v1144_v51 = vshrl.u32 %v1133_v45, 16  ;;  %v1142_v52 = vpack.i.b16 %v1133_v45, %v1083_v48 }
 0x37a   : > { %v1426_v46 = vsel %vm1421_vm7, %v1136_v42, 0  ;;  %v1139_v47 = vpack.i.b16 %v1138_v44, %v1137_v43  ;;  %v1145_v55 = vpack.i.b16 %v1144_v51, %v1143_v53  ;;  %v1518_v57 = vsel %vm1421_vm7, %v1142_v52, 0 }
 0x37b   : > { %2497 = vmatpush3.bf16.xpose.msra.mxu0 %v1426_v46 }
 0x37c   : > { %v1472_v50 = vsel %vm1421_vm7, %v1139_v47, 0  ;;  %2508 = vmatprep.subr.bf16.mxu0 %v3108_v15  ;;  %v1564_v58 = vsel %vm1421_vm7, %v1145_v55, 0  ;;  %v1157_v47 = vshrl.u32 %v3538_v0, 16 }
 0x37d   : > { %2503 = vmatpush3.bf16.xpose.msra.mxu1 %v1472_v50 }
 0x37e   : > { %2514 = vmatprep.subr.bf16.mxu1 %v3108_v15 }
 0x382   : > { %2499 = vmatmul.mubr.msk.bf16.vlgmr.msra.gmra.mxu0 %vm1421_vm7, %v1417_v54 }
 0x383   : > { %2509 = vmatpush3.bf16.xpose.msra.mxu0 %v1518_v57  ;;  %2510 = vmatprep.mubr.msk.bf16.mxu0 %vm3109_vm5, %v3108_v15 }
 0x384   : > { %2505 = vmatmul.mubr.msk.bf16.vlgmr.msra.gmra.mxu1 %vm1421_vm7, %v1418_v56  ;;  %2520 = vmatprep.subr.bf16.mxu0 %v3108_v15 }
 0x385   : > { %2515 = vmatpush3.bf16.xpose.msra.mxu1 %v1564_v58  ;;  %2516 = vmatprep.mubr.msk.bf16.mxu1 %vm3109_vm5, %v3108_v15 }
 0x386   : > { %2526 = vmatprep.subr.bf16.mxu1 %v3108_v15 }
 0x38a   : > { %2511 = vmatmul.mubr.msk.bf16.vlgmr.msra.gmra.mxu0 %vm1421_vm7, %v1419_v59 }
 0x38b   : > { %2522 = vmatprep.mubr.msk.bf16.mxu0 %vm3109_vm5, %v3108_v15 }
 0x38c   : > { %2517 = vmatmul.mubr.msk.bf16.vlgmr.msra.gmra.mxu1 %vm1421_vm7, %v1420_v60 }
 0x38d   : > { %2528 = vmatprep.mubr.msk.bf16.mxu1 %vm3109_vm5, %v3108_v15 }
 0x442   : > { %v3540_v2 = vpop.f32.mrf.mxu0 }
 0x443   : > { %v1611_v3 = vsel %vm1610_vm8, %v3540_v2, -inf }
 0x444   : > { %v3544_v4 = vpop.f32.mrf.mxu1  ;;  %1612 = vmax.xlane.f32.xlu1 %v1611_v3  ;;  %v2500_v5 = vpop.f32.mrf.mxu0 }
 0x445   : > { %v1614_v6 = vsel %vm1610_vm8, %v3544_v4, -inf }
 0x446   : > { %1615 = vmax.xlane.f32.xlu0 %v1614_v6  ;;  %v1465_v7 = vpop.f32.mrf.mxu0  ;;  %v2506_v8 = vpop.f32.mrf.mxu1 }
 0x448   : > { %v2501_v9 = vpop.f32.mrf.mxu0  ;;  %v1511_v10 = vpop.f32.mrf.mxu1 }
 0x44a   : > { %v2507_v11 = vpop.f32.mrf.mxu1  ;;  %v3548_v12 = vpop.f32.mrf.mxu0 }
 0x44b   : > { %v1617_v13 = vsel %vm1610_vm8, %v3548_v12, -inf }
 0x44c   : > { %v3552_v14 = vpop.f32.mrf.mxu1  ;;  %1618 = vmax.xlane.f32.xlu0 %v1617_v13  ;;  %v2512_v16 = vpop.f32.mrf.mxu0 }
 0x44d   : > { %v1620_v17 = vsel %vm1610_vm8, %v3552_v14, -inf }
 0x44e   : > { %v2518_v18 = vpop.f32.mrf.mxu1  ;;  %1621 = vmax.xlane.f32.xlu1 %v1620_v17  ;;  %v1557_v19 = vpop.f32.mrf.mxu0 }
 0x450   : > { %v2513_v20 = vpop.f32.mrf.mxu0  ;;  %v1603_v21 = vpop.f32.mrf.mxu1 }
 0x452   : > { %v2519_v22 = vpop.f32.mrf.mxu1 }
 0x45f   : > { %1149 = vrot.lane.b32.xlu1 %v3538_v0, %s3113_s23 }
 0x462   : > { %1147 = vrot.lane.b32.xlu0 %v3538_v0, %s3112_s2 }
 0x463   : > { %1151 = vrot.lane.b32.xlu1 %v3538_v0, %s3111_s6 }
 0x4cd   : > { %v1613_v24 = vpop.xlane.xlu1 %1612 }
 0x4ce   : > { %v1623_v26 = vmax.f32 %v1606_v23, %v1613_v24 }
 0x4cf   : > { %v1616_v27 = vpop.xlane.xlu0 %1615 }
 0x4d0   : > { %v1627_v28 = vsub.f32 %v1606_v23, %v1623_v26  ;;  %1912 = vst.msk [vmem:[#allocation3] sm:$0xff] %vm1695_vm9, %v1623_v26  ;;  %v1624_v29 = vmax.f32 %v1607_v25, %v1616_v27  ;;  %1641 = vperm.xlu0 %2732, %v1623_v26  }
 0x4d2   : > { %v1631_v30 = vmul.f32 1.442695, %v1627_v28  ;;  %v1628_v31 = vsub.f32 %v1607_v25, %v1624_v29  ;;  %1913 = vst.msk [vmem:[#allocation3 + $0x8] sm:$0xff] %vm1695_vm9, %v1624_v29  ;;  %1646 = vperm.xlu1 %2733, %v1624_v29  }
 0x4d4   : > { %2740 = vpow2.f32 %v1631_v30  ;;  %v1633_v33 = vmul.f32 1.442695, %v1628_v31 }
 0x4d5   : > { %v1619_v34 = vpop.xlane.xlu0 %1618 }
 0x4d6   : > { %2742 = vpow2.f32 %v1633_v33  ;;  %v3569_v37 = vmax.f32 %v3564_v32, %v1619_v34 }
 0x4d7   : > { %v1622_v38 = vpop.xlane.xlu1 %1621 }
 0x4d8   : > { %v1629_v39 = vsub.f32 %v3564_v32, %v3569_v37  ;;  %1914 = vst.msk [vmem:[#allocation3 + $0x10] sm:$0xff] %vm1695_vm9, %v3569_v37  ;;  %v3576_v41 = vmax.f32 %v3566_v36, %v1622_v38  ;;  %1651 = vperm.xlu1 %2733, %v3569_v37   ;;  %v1671_v37 = vld [vmem:[#allocation4] sm:$0xff] }
 0x4d9   : > { %v1148_v42 = vpop.permute.xlu0 %1147 }
 0x4da   : > { %v1630_v43 = vsub.f32 %v3566_v36, %v3576_v41  ;;  %1915 = vst.msk [vmem:[#allocation3 + $0x18] sm:$0xff] %vm1695_vm9, %v3576_v41  ;;  %1656 = vperm.xlu0 %2732, %v3576_v41   ;;  %v1155_v44 = vpack.i.b16 %v1148_v42, %v3538_v0  ;;  %v1158_v45 = vshrl.u32 %v1148_v42, 16  ;;  %v1673_v41 = vld [vmem:[#allocation4 + $0x10] sm:$0xff] }
 0x4db   : > { %v1150_v46 = vpop.permute.xlu1 %1149 }
 0x4dc   : > { %v1159_v48 = vpack.i.b16 %v1158_v45, %v1157_v47  ;;  %v1169_v50 = vcombine.high %v1155_v44, %v3480_v35  ;;  %v1165_v52 = vshrl.u32 %v1150_v46, 16  ;;  %v1176_v56 = vrot.slane %v1155_v44, %v3482_v40 }
 0x4de   : > { %v1183_v61 = vrot.slane %v1169_v50, %v3482_v40  ;;  %v1235_v62 = vcombine.high %v1159_v48, %v3480_v35  ;;  %v1242_v5 = vrot.slane %v1159_v48, %v3482_v40 }
 0x4df   : > { %v1152_v51 = vpop.permute.xlu1 %1151 }
 0x4e0   : > { %v1163_v53 = vpack.i.b16 %v1152_v51, %v1150_v46  ;;  %v1166_v54 = vshrl.u32 %v1152_v51, 16  ;;  %v1249_v11 = vrot.slane %v1235_v62, %v3482_v40 }
 0x4e1   : > { %v3587_v55 = vpop.eup %2740 }
 0x4e2   : > { %v1167_v57 = vpack.i.b16 %v1166_v54, %v1165_v52  ;;  %v1184_v58 = vcombine.high %v1163_v53, %v3480_v35  ;;  %v1191_v59 = vrot.slane %v1163_v53, %v3482_v40  ;;  %1706 = vperm.xlu0 %2732, %v3587_v55  }
 0x4e3   : > { %v3593_v60 = vpop.eup %2742 }
 0x4e4   : > { %v1198_v63 = vrot.slane %v1184_v58, %v3482_v40  ;;  %v1199_v0 = vcombine.low %v1176_v56, %v1191_v59  ;;  %v1200_v1 = vcombine.high %v1176_v56, %v1191_v59  ;;  %v1250_v3 = vcombine.high %v1167_v57, %v3480_v35  ;;  %1711 = vperm.xlu1 %2733, %v3593_v60  }
 0x4e5   : > { %v1257_v6 = vrot.slane %v1167_v57, %v3482_v40 }
 0x4e6   : > { %v1207_v7 = vrot.slane %v1199_v0, %v3486_v49  ;;  %v1214_v8 = vrot.slane %v1200_v1, %v3486_v49  ;;  %v1215_v9 = vcombine.low %v1183_v61, %v1198_v63  ;;  %v1216_v10 = vcombine.high %v1183_v61, %v1198_v63 }
 0x4e7   : > { %v1264_v13 = vrot.slane %v1250_v3, %v3482_v40  ;;  %v1265_v16 = vcombine.low %v1242_v5, %v1257_v6  ;;  %v1266_v17 = vcombine.high %v1242_v5, %v1257_v6 }
 0x4e8   : > { %v1223_v35 = vrot.slane %v1215_v9, %v3486_v49  ;;  %v1230_v18 = vrot.slane %v1216_v10, %v3486_v49  ;;  %v1301_v19 = vcombine.low %v1207_v7, %v1214_v8  ;;  %v2423_v20 = vcombine.high %v1207_v7, %v1214_v8 }
 0x4e9   : > { %v1273_v21 = vrot.slane %v1265_v16, %v3486_v49  ;;  %v1280_v22 = vrot.slane %v1266_v17, %v3486_v49  ;;  %v1281_v23 = vcombine.low %v1249_v11, %v1264_v13  ;;  %v1282_v24 = vcombine.high %v1249_v11, %v1264_v13 }
 0x4ea   : > { %v1308_v25 = vrot.slane %v1301_v19, %v3482_v40  ;;  %v1316_v26 = vrot.slane %v2423_v20, %v3482_v40  ;;  %v1317_v27 = vcombine.low %v1223_v35, %v1230_v18  ;;  %v2424_v28 = vcombine.high %v1223_v35, %v1230_v18 }
 0x4eb   : > { %v1289_v29 = vrot.slane %v1281_v23, %v3486_v49  ;;  %v1296_v30 = vrot.slane %v1282_v24, %v3486_v49  ;;  %v1351_v31 = vcombine.low %v1273_v21, %v1280_v22  ;;  %v2425_v33 = vcombine.high %v1273_v21, %v1280_v22 }
 0x4ec   : > { %v1324_v34 = vrot.slane %v1317_v27, %v3482_v40  ;;  %v1332_v38 = vrot.slane %v2424_v28, %v3482_v40  ;;  %v1333_v42 = vcombine.low %v1308_v25, %v1316_v26 }
 0x4ed   : > { %v1358_v44 = vrot.slane %v1351_v31, %v3482_v40  ;;  %v1366_v45 = vrot.slane %v2425_v33, %v3482_v40  ;;  %v1367_v46 = vcombine.low %v1289_v29, %v1296_v30  ;;  %v2426_v47 = vcombine.high %v1289_v29, %v1296_v30 }
 0x4ee   : > { %v1341_v48 = vcombine.low %v1324_v34, %v1332_v38  ;;  %v1340_v53 = vrot.slane %v1333_v42, %v3486_v49  ;;  %v1635_v30 = vmul.f32 1.442695, %v1629_v39  ;;  %v1672_v42 = vld [vmem:[#allocation4 + $0x8] sm:$0xff] }
 0x4ef   : > { %v1374_v50 = vrot.slane %v1367_v46, %v3482_v40  ;;  %v1382_v51 = vrot.slane %v2426_v47, %v3482_v40  ;;  %v1383_v52 = vcombine.low %v1358_v44, %v1366_v45  ;;  %v1675_v44 = vmul.f32 %v3587_v55, %v1671_v37 }
 0x4f0   : > { %v1348_v54 = vrot.slane %v1341_v48, %v3486_v49  ;;  %v1676_v47 = vmul.f32 %v3593_v60, %v1672_v42  ;;  %v1701_v60 = vld [vmem:[#allocation5 + $0x8] sm:$0xff] }
 0x4f1   : > { %v1391_v56 = vcombine.low %v1374_v50, %v1382_v51  ;;  %v1390_v59 = vrot.slane %v1383_v52, %v3486_v49 }
 0x4f2   : > { %v1349_v57 = vcombine.low %v1340_v53, %v1348_v54  ;;  %v1350_v58 = vcombine.high %v1340_v53, %v1348_v54 }
 0x4f3   : > { %v1398_v61 = vrot.slane %v1391_v56, %v3486_v49  ;;  %v1700_v56 = vld [vmem:[#allocation5] sm:$0xff] }
 0x4f4   : > { %v1405_v0 = vshrl.u32 %v1349_v57, 16  ;;  %v1413_v1 = vshrl.u32 %v1350_v58, 16 }
 0x4f5   : > { %v1399_v62 = vcombine.low %v1390_v59, %v1398_v61  ;;  %v1400_v63 = vcombine.high %v1390_v59, %v1398_v61 }
 0x4f7   : > { %v1403_v3 = vpack.i.b16 %v1399_v62, %v1349_v57  ;;  %v1406_v5 = vshrl.u32 %v1399_v62, 16  ;;  %v1411_v6 = vpack.i.b16 %v1400_v63, %v1350_v58  ;;  %v1414_v7 = vshrl.u32 %v1400_v63, 16 }
 0x4f9   : > { %2521 = vmatpush3.bf16.msra.mxu0 %v1403_v3  ;;  %v1407_v8 = vpack.i.b16 %v1406_v5, %v1405_v0  ;;  %v1415_v9 = vpack.i.b16 %v1414_v7, %v1413_v1  ;;  %v1702_v3 = vld [vmem:[#allocation5 + $0x10] sm:$0xff] }
 0x4fa   : > { %2532 = vmatprep.subr.bf16.mxu0 %v3108_v15 }
 0x4fb   : > { %2527 = vmatpush3.bf16.msra.mxu1 %v1407_v8  ;;  %v1703_v8 = vld [vmem:[#allocation5 + $0x18] sm:$0xff] }
 0x4fc   : > { %2538 = vmatprep.subr.bf16.mxu1 %v3108_v15 }
 0x54b   : > { %v1642_v10 = vpop.permute.xlu0 %1641 }
 0x54c   : > { %v1659_v11 = vsub.f32 %v3540_v2, %v1642_v10 }
 0x54d   : > { %v1647_v13 = vpop.permute.xlu1 %1646 }
 0x54e   : > { %v1663_v16 = vmul.f32 1.442695, %v1659_v11  ;;  %v1660_v17 = vsub.f32 %v3544_v4, %v1647_v13 }
 0x550   : > { %2744 = vpow2.f32 %v1663_v16  ;;  %v1665_v35 = vmul.f32 1.442695, %v1660_v17 }
 0x552   : > { %2746 = vpow2.f32 %v1665_v35 }
 0x553   : > { %v1652_v18 = vpop.permute.xlu1 %1651 }
 0x554   : > { %v1661_v19 = vsub.f32 %v3548_v12, %v1652_v18 }
 0x555   : > { %v1657_v20 = vpop.permute.xlu0 %1656 }
 0x556   : > { %v1667_v21 = vmul.f32 1.442695, %v1661_v19  ;;  %v1662_v22 = vsub.f32 %v3552_v14, %v1657_v20 }
 0x558   : > { %2748 = vpow2.f32 %v1667_v21  ;;  %v1669_v23 = vmul.f32 1.442695, %v1662_v22 }
 0x55a   : > { %2750 = vpow2.f32 %v1669_v23 }
 0x55b   : > { %2752 = vpow2.f32 %v1635_v30 }
 0x55d   : > { %v2745_v24 = vpop.eup %2744  ;;  %v1707_v39 = vpop.permute.xlu0 %1706 }
 0x55e   : > { %v1679_v2 = vsel %vm1610_vm8, %v2745_v24, 0.0  ;;  %v1728_v25 = vpack.c.bf16 %v2745_v24, %v2745_v24  ;;  %v1724_v57 = vmul.f32 %v1707_v39, %v1700_v56 }
 0x55f   : > { %v2747_v26 = vpop.eup %2746  ;;  %1680 = vadd.xlane.f32.xlu1 %v1679_v2  ;;  %v1712_v32 = vpop.permute.xlu1 %1711 }
 0x560   : > { %2523 = vmatmul.mubr.msk.bf16.vlgmr.msra.gmra.mxu0 %vm1610_vm8, %v1728_v25  ;;  %v1682_v4 = vsel %vm1610_vm8, %v2747_v26, 0.0  ;;  %v1729_v27 = vpack.c.bf16 %v2747_v26, %v2747_v26  ;;  %v1725_v59 = vmul.f32 %v1712_v32, %v1701_v60 }
 0x561   : > { %2533 = vmatpush3.bf16.msra.mxu0 %v1411_v6  ;;  %1683 = vadd.xlane.f32.xlu0 %v1682_v4 }
 0x562   : > { %2529 = vmatmul.mubr.msk.bf16.vlgmr.msra.gmra.mxu1 %vm1610_vm8, %v1729_v27  ;;  %2534 = vmatprep.mubr.msk.bf16.mxu0 %vm3109_vm5, %v3108_v15 }
 0x563   : > { %2539 = vmatpush3.bf16.msra.mxu1 %v1415_v9  ;;  %2540 = vmatprep.mubr.msk.bf16.mxu1 %vm3109_vm5, %v3108_v15  ;;  %v1637_v15 = vmul.f32 1.442695, %v1630_v43  ;;  %v1674_v43 = vld [vmem:[#allocation4 + $0x18] sm:$0xff] }
 0x565   : > { %v2749_v12 = vpop.eup %2748  ;;  %2754 = vpow2.f32 %v1637_v15 }
 0x566   : > { %v1685_v14 = vsel %vm1610_vm8, %v2749_v12, 0.0  ;;  %v1730_v28 = vpack.c.bf16 %v2749_v12, %v2749_v12 }
 0x567   : > { %v2751_v29 = vpop.eup %2750  ;;  %1686 = vadd.xlane.f32.xlu0 %v1685_v14 }
 0x568   : > { %2535 = vmatmul.mubr.msk.bf16.vlgmr.msra.gmra.mxu0 %vm1610_vm8, %v1730_v28  ;;  %v1688_v31 = vsel %vm1610_vm8, %v2751_v29, 0.0  ;;  %v1731_v33 = vpack.c.bf16 %v2751_v29, %v2751_v29  ;;  %v2753_v34 = vpop.eup %2752 }
 0x569   : > { %1689 = vadd.xlane.f32.xlu1 %v1688_v31  ;;  %v1677_v50 = vmul.f32 %v2753_v34, %v1673_v41 }
 0x56a   : > { %2541 = vmatmul.mubr.msk.bf16.vlgmr.msra.gmra.mxu1 %vm1610_vm8, %v1731_v33 }
 0x572   : > { %v2755_v38 = vpop.eup %2754 }
 0x573   : > { %v1678_v53 = vmul.f32 %v2755_v38, %v1674_v43 }
 0x57a   : > { %1716 = vperm.xlu1 %2733, %v2753_v34  }
 0x57d   : > { %1721 = vperm.xlu0 %2732, %v2755_v38  }
 0x5e8   : > { %v1681_v45 = vpop.xlane.xlu1 %1680 }
 0x5e9   : > { %v1691_v46 = vadd.f32 %v1681_v45, %v1675_v44 }
 0x5ea   : > { %v1684_v48 = vpop.xlane.xlu0 %1683 }
 0x5eb   : > { %1696 = vst.msk [vmem:[#allocation4] sm:$0xff] %vm1695_vm9, %v1691_v46  ;;  %v1692_v36 = vadd.f32 %v1684_v48, %v1676_v47 }
 0x5ed   : > { %1697 = vst.msk [vmem:[#allocation4 + $0x8] sm:$0xff] %vm1695_vm9, %v1692_v36 }
 0x5f0   : > { %v1687_v51 = vpop.xlane.xlu0 %1686 }
 0x5f1   : > { %v1693_v52 = vadd.f32 %v1687_v51, %v1677_v50 }
 0x5f2   : > { %v1690_v54 = vpop.xlane.xlu1 %1689 }
 0x5f3   : > { %1698 = vst.msk [vmem:[#allocation4 + $0x10] sm:$0xff] %vm1695_vm9, %v1693_v52  ;;  %v1694_v55 = vadd.f32 %v1690_v54, %v1678_v53 }
 0x5f5   : > { %1699 = vst.msk [vmem:[#allocation4 + $0x18] sm:$0xff] %vm1695_vm9, %v1694_v55 }
 0x5f6   : > { %v1717_v0 = vpop.permute.xlu1 %1716 }
 0x5f7   : > { %v1726_v11 = vmul.f32 %v1717_v0, %v1702_v3 }
 0x5f8   : > { %v1722_v7 = vpop.permute.xlu0 %1721 }
 0x5f9   : > { %v1727_v17 = vmul.f32 %v1722_v7, %v1703_v8 }
 0x620   : > { %v1769_v58 = vpop.f32.mrf.mxu0 }
 0x621   : > { %v1904_v61 = vadd.f32 %v1769_v58, %v1724_v57 }
 0x622   : > { %v2524_v62 = vpop.f32.mrf.mxu0  ;;  %v1812_v63 = vpop.f32.mrf.mxu1 }
 0x623   : > { %1908 = vst.msk [vmem:[#allocation5] sm:$0xff] %vm1421_vm7, %v1904_v61  ;;  %v1905_v1 = vadd.f32 %v1812_v63, %v1725_v59 }
 0x624   : > { %v1772_v5 = vpop.f32.mrf.mxu0  ;;  %v2530_v6 = vpop.f32.mrf.mxu1 }
 0x625   : > { %1909 = vst.msk [vmem:[#allocation5 + $0x8] sm:$0xff] %vm1421_vm7, %v1905_v1 }
 0x626   : > { %v2525_v9 = vpop.f32.mrf.mxu0  ;;  %v1815_v10 = vpop.f32.mrf.mxu1 }
 0x628   : > { %v2531_v13 = vpop.f32.mrf.mxu1  ;;  %v1855_v16 = vpop.f32.mrf.mxu0 }
 0x629   : > { %v1906_v35 = vadd.f32 %v1855_v16, %v1726_v11 }
 0x62a   : > { %v2536_v18 = vpop.f32.mrf.mxu0  ;;  %v1898_v19 = vpop.f32.mrf.mxu1 }
 0x62b   : > { %1910 = vst.msk [vmem:[#allocation5 + $0x10] sm:$0xff] %vm1421_vm7, %v1906_v35  ;;  %v1907_v20 = vadd.f32 %v1898_v19, %v1727_v17 }
 0x62c   : > { %v1858_v21 = vpop.f32.mrf.mxu0  ;;  %v2542_v22 = vpop.f32.mrf.mxu1  ;;  %1919 = sbr.rel (%p2435_p6) target bundleno = 2077 (0x81d), region = 88 }
 0x62d   : > { %1911 = vst.msk [vmem:[#allocation5 + $0x18] sm:$0xff] %vm1421_vm7, %v1907_v20 }
 0x62e   : > { %v2537_v23 = vpop.f32.mrf.mxu0  ;;  %v1901_v24 = vpop.f32.mrf.mxu1 }
 0x630   : > { %v2543_v2 = vpop.f32.mrf.mxu1 }
 0x631   : > { %v1926_v25 = vld [vmem:[#allocation4 + $0x10] sm:$0xff]  ;;  %v1924_v26 = vld [vmem:[#allocation4] sm:$0xff]  ;;  %v1927_v4 = vld [vmem:[#allocation4 + $0x18] sm:$0xff]  ;;  %v3116_v27 = vmov 0   ;;  %v3117_v33 = vmov 0.0   ;;  %vm3118_vm10 = vmmov 0  }
 0x632   : > { %2757 = vset.pattern.permute.xlu1 %v3116_v27  ;;  %2756 = vset.pattern.permute.xlu0 %v3116_v27  ;;  %2760 = vrcp.f32 %v1926_v25  ;;  %v1925_v12 = vld [vmem:[#allocation4 + $0x8] sm:$0xff]  ;;  %v2758_v31 = vld [vmem:[#allocation17 + $0x8] sm:$0xff]   ;;  %v1922_v15 = vld [vmem:[#allocation5 + $0x10] sm:$0xff]  ;;  %vm2129_vm11 = vcmask 195584  }
 0x633   : > { %2762 = vrcp.f32 %v1924_v26  ;;  %2544 = vmatprep.subr.bf16.mxu0 %v3117_v33  ;;  %v1920_v34 = vld [vmem:[#allocation5] sm:$0xff]  ;;  %v1921_v45 = vld [vmem:[#allocation5 + $0x8] sm:$0xff]  ;;  %2548 = vmatprep.mubr.msk.bf16.mxu0 %vm3118_vm10, %v3117_v33 }
 0x634   : > { %2764 = vrcp.f32 %v1927_v4  ;;  %2545 = vmatpush3.bf16.msra.mxu0 %v2758_v31  ;;  %v1923_v42 = vld [vmem:[#allocation5 + $0x18] sm:$0xff] }
 0x635   : > { %2766 = vrcp.f32 %v1925_v12  ;;  %2546 = vmatprep.subr.bf16.mxu0 %v3117_v33  ;;  %v2759_v4 = vld [vmem:[#allocation17] sm:$0xff]  }
 0x638   : > { %2547 = vmatpush3.bf16.msra.mxu0 %v2759_v4 }
 0x63f   : > { %v2761_v14 = vpop.eup %2760 }
 0x640   : > { %v2763_v28 = vpop.eup %2762  ;;  %1944 = vperm.xlu1 %2757, %v2761_v14  }
 0x641   : > { %v2765_v29 = vpop.eup %2764  ;;  %1934 = vperm.xlu0 %2756, %v2763_v28  }
 0x642   : > { %v2767_v30 = vpop.eup %2766 }
 0x644   : > { %1949 = vperm.xlu1 %2757, %v2765_v29  }
 0x645   : > { %1939 = vperm.xlu0 %2756, %v2767_v30  }
 0x6bb   : > { %v1945_v38 = vpop.permute.xlu1 %1944 }
 0x6bc   : > { %v1954_v32 = vmul.f32 %v1945_v38, %v1922_v15  ;;  %v1935_v37 = vpop.permute.xlu0 %1934 }
 0x6bd   : > { %v1952_v39 = vmul.f32 %v1935_v37, %v1920_v34 }
 0x6be   : > { %v1964_v44 = vpack.c.bf16 %v1954_v32, %v1954_v32 }
 0x6bf   : > { %v1956_v46 = vpack.c.bf16 %v1952_v39, %v1952_v39  ;;  %v1950_v47 = vpop.permute.xlu1 %1949 }
 0x6c0   : > { %v1971_v48 = vrot.slane %v1964_v44, %v3482_v40  ;;  %v1955_v36 = vmul.f32 %v1950_v47, %v1923_v42  ;;  %v1940_v41 = vpop.permute.xlu0 %1939 }
 0x6c1   : > { %v1963_v43 = vrot.slane %v1956_v46, %v3482_v40  ;;  %v1953_v50 = vmul.f32 %v1940_v41, %v1921_v45  ;;  %v2436_v41 = vld [vmem:[%s3817_s21] ss:$0 sm:$0xff] }
 0x6c2   : > { %v1998_v51 = vpack.c.bf16 %v1955_v36, %v1955_v36 }
 0x6c3   : > { %v1972_v52 = vcombine.low %v1963_v43, %v1971_v48  ;;  %v1973_v53 = vcombine.high %v1963_v43, %v1971_v48  ;;  %v1990_v54 = vpack.c.bf16 %v1953_v50, %v1953_v50 }
 0x6c4   : > { %v2005_v55 = vrot.slane %v1998_v51, %v3482_v40 }
 0x6c5   : > { %v1980_v56 = vrot.slane %v1972_v52, %v3486_v49  ;;  %v1997_v60 = vrot.slane %v1990_v54, %v3482_v40  ;;  %v1987_v57 = vrot.slane %v1973_v53, %v3486_v49 }
 0x6c7   : > { %v2006_v58 = vcombine.low %v1997_v60, %v2005_v55  ;;  %v2007_v59 = vcombine.high %v1997_v60, %v2005_v55  ;;  %v1988_v61 = vcombine.high %v1980_v56, %v3116_v27  ;;  %v1989_v0 = vcombine.high %v1987_v57, %v3116_v27 }
 0x6c8   : > { %v2028_v1 = vshrl.u32 %v1980_v56, 16  ;;  %v2044_v9 = vshrl.u32 %v1987_v57, 16 }
 0x6c9   : > { %v2014_v62 = vrot.slane %v2006_v58, %v3486_v49  ;;  %v2021_v63 = vrot.slane %v2007_v59, %v3486_v49  ;;  %v2036_v8 = vshrl.u32 %v1988_v61, 16  ;;  %v2052_v18 = vshrl.u32 %v1989_v0, 16 }
 0x6cb   : > { %v2022_v3 = vcombine.high %v2014_v62, %v3116_v27  ;;  %v2023_v5 = vcombine.high %v2021_v63, %v3116_v27  ;;  %v2026_v6 = vpack.i.b16 %v2014_v62, %v1980_v56  ;;  %v2029_v7 = vshrl.u32 %v2014_v62, 16 }
 0x6cc   : > { %v2042_v10 = vpack.i.b16 %v2021_v63, %v1987_v57  ;;  %v2045_v11 = vshrl.u32 %v2021_v63, 16 }
 0x6cd   : > { %v2030_v13 = vpack.i.b16 %v2029_v7, %v2028_v1  ;;  %v2034_v16 = vpack.i.b16 %v2022_v3, %v1988_v61  ;;  %v2037_v17 = vshrl.u32 %v2022_v3, 16  ;;  %v2050_v35 = vpack.i.b16 %v2023_v5, %v1989_v0 }
 0x6ce   : > { %v2046_v19 = vpack.i.b16 %v2045_v11, %v2044_v9  ;;  %v2053_v20 = vshrl.u32 %v2023_v5, 16  ;;  %v2056_v21 = vcombine.low %v2026_v6, %v2042_v10 }
 0x6cf   : > { %v2038_v22 = vpack.i.b16 %v2037_v17, %v2036_v8  ;;  %v2064_v23 = vcombine.low %v2034_v16, %v2050_v35 }
 0x6d0   : > { %v2054_v24 = vpack.i.b16 %v2053_v20, %v2052_v18  ;;  %v2081_v2 = vcombine.low %v2030_v13, %v2046_v19  ;;  %v2063_v25 = vrot.slane %v2056_v21, %v3482_v40 }
 0x6d1   : > { %v2071_v26 = vrot.slane %v2064_v23, %v3482_v40 }
 0x6d2   : > { %v2089_v12 = vcombine.low %v2038_v22, %v2054_v24  ;;  %v2088_v28 = vrot.slane %v2081_v2, %v3482_v40 }
 0x6d3   : > { %v2072_v14 = vcombine.low %v2063_v25, %v2071_v26 }
 0x6d4   : > { %v2096_v29 = vrot.slane %v2089_v12, %v3482_v40 }
 0x6d5   : > { %v2079_v30 = vrot.slane %v2072_v14, %v3486_v49 }
 0x6d6   : > { %v2097_v31 = vcombine.low %v2088_v28, %v2096_v29 }
 0x6d7   : > { %v2109_v34 = vshrl.u32 %v2079_v30, 16  ;;  %v2080_v32 = vcombine.high %v2079_v30, %v3116_v27 }
 0x6d8   : > { %v2104_v15 = vrot.slane %v2097_v31, %v3486_v49 }
 0x6d9   : > { %v2115_v40 = vshrl.u32 %v2080_v32, 16 }
 0x6da   : > { %v2110_v38 = vshrl.u32 %v2104_v15, 16  ;;  %v2105_v37 = vcombine.high %v2104_v15, %v3116_v27  ;;  %v2108_v39 = vpack.i.b16 %v2104_v15, %v2079_v30 }
 0x6dc   : > { %v2111_v42 = vpack.i.b16 %v2110_v38, %v2109_v34  ;;  %v2114_v44 = vpack.i.b16 %v2105_v37, %v2080_v32  ;;  %v2116_v45 = vshrl.u32 %v2105_v37, 16 }
 0x6de   : > { %2118 = vrot.lane.b32.xlu0 %v2111_v42, %s3119_s20  ;;  %2120 = vrot.lane.b32.xlu1 %v2114_v44, %s3120_s25  ;;  %v2117_v33 = vpack.i.b16 %v2116_v45, %v2115_v40 }
 0x6e2   : > { %2122 = vrot.lane.b32.xlu0 %v2117_v33, %s3121_s19 }
 0x750   : > { %v2119_v49 = vpop.permute.xlu0 %2118  ;;  %v2121_v47 = vpop.permute.xlu1 %2120 }
 0x751   : > { %v2126_v46 = vsel %vm1421_vm7, %v2108_v39, %v2119_v49 }
 0x752   : > { %v2128_v27 = vsel %vm1610_vm8, %v2126_v46, %v2121_v47 }
 0x754   : > { %v2123_v48 = vpop.permute.xlu0 %2122 }
 0x755   : > { %v2131_v36 = vsel %vm2129_vm11, %v2128_v27, %v2123_v48 }
 0x756   : > { %2549 = vmatmul.mubr.msk.bf16.vlgmr.msra.gmra.mxu0 %vm761_vm6, %v2131_v36 }
 0x816   : > { %v2191_v43 = vpop.f32.mrf.mxu0 }
 0x817   : > { %v2192_v50 = vadd.f32 %v2436_v41, %v2191_v43 }
 0x818   : > { %v2550_v51 = vpop.f32.mrf.mxu0 }
 0x819   : > { %2197 = vst.msk [vmem:[%s3453_s1] sm:$0xff] %vm761_vm6, %v2192_v50 }
 0x81a   : > { %v2194_v52 = vpop.f32.mrf.mxu0 }
 0x81c   : > { %v2551_v53 = vpop.f32.mrf.mxu0 }
 0x81d PF: > { %s3818_s27 = sld [smem:[#allocation26_spill]]  ;;  %s2212_s28 = sshll.u32 %s3453_s1, 4  ;;  %s2213_s28 = int_to_ptr.vmem [resolvable:$true] %s2212_s28 }
 0x81e   : > { %s3819_s8 = sld [smem:[#allocation39_spill]]  ;;  %s2199_s22 = scalar_lea.sflag [#allocation8], %s3424_s4 }
 0x81f   : > { %s2956_s6 = scalar_lea.vmem %s2213_s28, 128  ;;  %p3820_p11 = scmp.ne.s32.totalorder %s3802_s24, 0 }
 0x820   : > { %p2957_p12 = scmp.ne.s32.totalorder %s2213_s28, %s2956_s6  ;;  %s3122_s2 = smov [#allocation18]  }
 0x821   : > { %s2960_s23 = sshll.u32 %s3122_s2, 4  ;;  %s2961_s23 = int_to_ptr.vmem [resolvable:$false] %s2960_s23 }
 0x822   : > { %p2958_p9 = pnand %p2957_p12, %p3820_p11  ;;  %s2962_s3 = scalar_lea.vmem %s2961_s23, 256 }
 0x823   : > { %s2441_s26 = sshll.u32 %s3818_s27, 7  ;;  %p2963_p0 = scmp.lt.s32.totalorder %s2213_s28, %s2961_s23 }
 0x824   : > { %s2210_s16 = scalar_lea.hbm %s3819_s8, %s2441_s26  ;;  %p2959_p1 = pneg %p2958_p9 }
 0x825   : > { %p2964_p13 = scmp.lt.s32.totalorder %s2962_s3, %s2956_s6 }
 0x827   : > { %p2965_p4 = por %p2964_p13, %p2963_p0 }
 0x829   : > { %p2966_p7 = pnand %p2965_p4, %p2959_p1 }
 0x82b   : > { %2969 = shalt.err (!%p2966_p7)
}
 0x82c   : > { %s2970_s20 = scalar_lea.hbm %s2210_s16, 128  ;;  %s2974_s25 = scalar_lea.hbm %s3819_s8, 256 }
 0x82d   : > { %p2971_p3 = scmp.ne.s32.totalorder %s2210_s16, %s2970_s20  ;;  %p2975_p5 = scmp.lt.s32.totalorder %s2210_s16, %s3819_s8 }
 0x82e   : > { %p2976_p8 = scmp.lt.s32.totalorder %s2974_s25, %s2970_s20 }
 0x82f   : > { %p2972_p10 = pnand %p2971_p3, %p3820_p11 }
 0x830   : > { %p2977_p6 = por %p2976_p8, %p2975_p5 }
 0x831   : > { %p2973_p2 = pneg %p2972_p10 }
 0x833   : > { %p2978_p12 = pnand %p2977_p6, %p2973_p2 }
 0x835   : > { %2981 = shalt.err (!%p2978_p12)
}
 0x836   : > { %2574 = dma.vmem_to_hbm [thread:$0]  (%p3820_p11), %s2213_s28, 128, %s2210_s16, %s2199_s22  }
 0x837 PF: > { %p2612_p9 = scmp.ge.s32.totalorder %s3088_s15, 2  ;;  %s2224_s17 = sand.u32 1, %s3060_s30  }
 0x838   : > { %p3821_p1 = scmp.ne.s32.totalorder %s3803_s5, 0  ;;  %s2225_s21 = scalar_lea.sflag [#allocation8], %s2224_s17 }
 0x83a   : > { %p2600_p0 = pnand %p2612_p9, %p3821_p1 }
 0x83c   : > { %p2601_p13 = pneg %p2600_p0 }
 0x83e   : > { %3043 = dma.done.wait (%p2601_p13), %s2225_s21, 128  }
 0x83f   : > { %3045 = vsyncadd (%p2601_p13), %s2225_s21, 4294967168  ;;  %s29_s15 = sadd.s32 1, %s3088_s15   ;;  %s3822_s27 = sld [smem:[#allocation24_spill]] }
 0x840   : > { %p26_p4 = scmp.ge.s32.totalorder %s29_s15, 6   ;;  %s3823_s24 = sld [smem:[#allocation28_spill]] }
 0x841   : > { %s3824_s26 = sld [smem:[#allocation29_spill]]  ;;  %s3825_s28 = smov %s3056_s29 }
 0x842   : > { %s3826_s29 = smov %s3305_s12  ;;  %s3827_s30 = smov %s3064_s9 }
 0x843   : > { %s3828_s9 = smov %s3068_s10  ;;  %s3829_s10 = smov %s3370_s18 }
 0x844   : > { %s3830_s11 = smov %s3080_s13  ;;  %s3831_s12 = smov %s3084_s14 }
 0x845   :  { %28 = sbr.rel (!%p26_p4) target bundleno = 23 (0x17), region = 145 }
 0x846   : > { %s3832_s13 = smov %s3823_s24 }
 0x847   : > { %s3833_s14 = smov %s3824_s26 }
 0x84a   :  { %2230 = vsyncpa [#allocation7], 1 }
 0x84b   :  { %2232 = vsyncpa [#allocation7 + $0x1], 1 }
 0x84c   :  { %2233 = vsyncpa [#allocation10], 1 }
 0x84d   :  { %2235 = vsyncpa [#allocation10 + $0x1], 1 }
 0x84e   :  { %2236 = vsyncpa [#allocation13], 1 }
 0x84f   :  { %2237 = vsyncpa [#allocation16], 1 }
 0x850   :  { %2238 = vsyncpa [#allocation8], 1 }
 0x851   :  { %2240 = vsyncpa [#allocation8 + $0x1], 1 }

// kernel: tpu_custom_call.1
= control target key start
LH: loop header
LB: loop body
LE: loop exit
PB: predicated region body
PF: predicated region fallthrough
CT: control target
= control target key end

     0   :  { %s3747_s0 = inlined_call_operand.hbm [shape: bf16[2,8,32], index: 0, kind: input, shape index: {}]   ;;  %s3748_s1 = inlined_call_operand.hbm [shape: bf16[2,32,32], index: 1, kind: input, shape index: {}]   ;;  %s3749_s2 = inlined_call_operand.hbm [shape: bf16[2,32,32], index: 2, kind: input, shape index: {}]   ;;  %s3750_s3 = inlined_call_operand.hbm [shape: bf16[32,32], index: 3, kind: input, shape index: {}]   ;;  %s3751_s4 = inlined_call_operand.hbm [shape: bf16[32,32], index: 4, kind: input, shape index: {}]   ;;  %s3752_s5 = inlined_call_operand.hbm [shape: bf16[32,32], index: 5, kind: input, shape index: {}]   ;;  %s3753_s6 = inlined_call_operand.hbm [shape: bf16[32,32], index: 6, kind: input, shape index: {}]   ;;  %s3754_s7 = inlined_call_operand.vmem [shape: f32[1,32], index: 7, kind: input, shape index: {}]   ;;  %s3755_s8 = inlined_call_operand.hbm [shape: f32[2,8,32], index: 8, kind: output, shape index: {}]  }
   0x1   :  { %3771 = sst [smem:[#allocation31_spill]] %s3747_s0 }
   0x2   :  { %3772 = sst [smem:[#allocation32_spill]] %s3748_s1 }
   0x3   :  { %3773 = sst [smem:[#allocation33_spill]] %s3749_s2 }
   0x4   :  { %3774 = sst [smem:[#allocation34_spill]] %s3750_s3 }
   0x5   :  { %3775 = sst [smem:[#allocation35_spill]] %s3751_s4 }
   0x6   :  { %3776 = sst [smem:[#allocation36_spill]] %s3752_s5 }
   0x7   :  { %3777 = sst [smem:[#allocation37_spill]] %s3753_s6 }
   0x8   :  { %3778 = sst [smem:[#allocation38_spill]] %s3754_s7 }
   0x9   :  { %3779 = sst [smem:[#allocation39_spill]] %s3755_s8 }
   0xa   :  { %13 = vsyncpa [#allocation7], 0 }
   0xb   :  { %15 = vsyncpa [#allocation7 + $0x1], 0 }
   0xc   :  { %16 = vsyncpa [#allocation10], 0 }
   0xd   :  { %18 = vsyncpa [#allocation10 + $0x1], 0 }
   0xe   :  { %19 = vsyncpa [#allocation13], 0 }
   0xf   :  { %20 = vsyncpa [#allocation16], 0 }
  0x10   :  { %21 = vsyncpa [#allocation8], 0 }
  0x11   :  { %23 = vsyncpa [#allocation8 + $0x1], 0  ;;  %s3168_s27 = smov 0   ;;  %s3170_s28 = smov 0  }
  0x12   :  { %s3172_s29 = smov 0   ;;  %s3174_s30 = smov 0  }
  0x13   :  { %s3176_s9 = smov 0   ;;  %s3178_s10 = smov 0  }
  0x14   :  { %s3180_s11 = smov 0   ;;  %s3182_s12 = smov 0  }
  0x15   :  { %s3184_s13 = smov 0   ;;  %s3186_s14 = smov 0  }
  0x16   :  { %s3188_s15 = smov 0  }
  0x17 LB: > { %3780 = sst [smem:[#allocation24_spill]] %s3052_s28  ;;  %s3224_s16 = sadd.s32 4294967295, %s3088_s15   ;;  %s3088_s15 = sphi %s3188_s15, %s29_s15   ;;  %s3084_s14 = sphi %s3186_s14, %s3833_s14   ;;  %s3080_s13 = sphi %s3184_s13, %s3832_s13   ;;  %s3076_s12 = sphi %s3182_s12, %s3831_s12   ;;  %s3072_s11 = sphi %s3180_s11, %s3830_s11   ;;  %s3068_s10 = sphi %s3178_s10, %s3829_s10   ;;  %s3064_s9 = sphi %s3176_s9, %s3828_s9   ;;  %s3060_s30 = sphi %s3174_s30, %s3827_s30   ;;  %s3056_s29 = sphi %s3172_s29, %s3826_s29   ;;  %s3052_s28 = sphi %s3170_s28, %s3825_s28   ;;  %s3048_s27 = sphi %s3168_s27, %s3822_s27  }
  0x18   : > { %3781 = sst [smem:[#allocation25_spill]] %s3072_s11  ;;  %p2382_p0 = scmp.ge.s32.totalorder %s3088_s15, 1 }
  0x19   : > { %3782 = sst [smem:[#allocation26_spill]] %s3076_s12  ;;  %p3768_p1 = scmp.eq.s32.totalorder %s3224_s16, 0 }
  0x1a   : > { %p259_p2 = scmp.lt.s32.totalorder %s3088_s15, 5  ;;  %s3090_s18 = smov [#allocation12]  }
  0x1b   : > { %s271_s19 = sshll.u32 %s3090_s18, 4  ;;  %s3091_s21 = smov [#allocation15]   ;;  %s272_s19 = int_to_ptr.vmem [resolvable:$true] %s271_s19 }
  0x1c   : > { %p3229_p3 = pnand %p2382_p0, %p259_p2  ;;  %s297_s22 = sshll.u32 %s3091_s21, 4  ;;  %s298_s22 = int_to_ptr.vmem [resolvable:$true] %s297_s22 }
  0x1d   : > { %s2779_s23 = scalar_lea.vmem %s272_s19, 256  ;;  %p2787_p10 = scmp.lt.s32.totalorder %s272_s19, %s272_s19 }
  0x1e   : > { %s3783_s17 = scalar_select %p3229_p3, 1, 0 }
  0x1f   : > { %p2576_p4 = pneg %p3229_p3  ;;  %p2780_p7 = scmp.ne.s32.totalorder %s272_s19, %s2779_s23 }
  0x20   : > { %3784 = sst [smem:[#allocation27_spill]] %s3783_s17  ;;  %p2788_p11 = scmp.lt.s32.totalorder %s2779_s23, %s2779_s23 }
  0x21   : > { %p3237_p5 = pnand %p2576_p4, %p3768_p1 }
  0x22   : > { %p2789_p12 = por %p2788_p11, %p2787_p10 }
  0x23   : > { %p2770_p6 = pneg %p3237_p5 }
  0x25   : > { %p2782_p8 = pnand %p2780_p7, %p2770_p6 }
  0x27   : > { %p2783_p9 = pneg %p2782_p8 }
  0x29   : > { %p2790_p13 = pnand %p2789_p12, %p2783_p9 }
  0x2b   : > { %2793 = shalt.err (!%p2790_p13)
}
  0x2c   : > { %s3757_s24 = smov 64   ;;  %s3759_s25 = smov 4  }
  0x2d   : > { %s3786_s3 = sld [smem:[#allocation34_spill]]  ;;  %s2805_s21 = scalar_lea.vmem %s298_s22, 256 }
  0x2e   : > { %p2806_p0 = scmp.ne.s32.totalorder %s298_s22, %s2805_s21  ;;  %p2813_p7 = scmp.lt.s32.totalorder %s298_s22, %s298_s22 }
  0x2f   : > { %p2814_p8 = scmp.lt.s32.totalorder %s2805_s21, %s2805_s21 }
  0x30   : > { %p2808_p2 = pnand %p2806_p0, %p2770_p6 }
  0x31   : > { %p2815_p9 = por %p2814_p8, %p2813_p7 }
  0x32   : > { %p2809_p4 = pneg %p2808_p2 }
  0x33   : > { %2579 = dma.hbm_to_vmem [thread:$0]  (!%p3237_p5), %s3786_s3, 256, %s272_s19, [#allocation13], %s3757_s24, %s3757_s24, %s3759_s25  }
  0x34   : > { %p2816_p10 = pnand %p2815_p9, %p2809_p4 }
  0x36   : > { %2819 = shalt.err (!%p2816_p10)
}
  0x37   : > { %s3787_s5 = sld [smem:[#allocation36_spill]]  ;;  %s38_s19 = sadd.s32 1, %s3080_s13 }
  0x38   : > { %s41_s26 = sadd.s32 1, %s3084_s14  ;;  %p39_p11 = scmp.ge.s32.totalorder %s38_s19, 2 }
  0x39   : > { %p56_p12 = scmp.eq.s32.totalorder %s3088_s15, 0  ;;  %s76_s8 = sadd.s32 1, %s3056_s29 }
  0x3a   : > { %p83_p13 = scmp.ne.s32.totalorder %s3056_s29, %s3052_s28  ;;  %s3835_s19 = smov (%p39_p11, %s38_s19), 0 }
  0x3b   : > { %3788 = sst [smem:[#allocation28_spill]] %s3835_s19  ;;  %s3837_s26 = smov (!%p39_p11, %s41_s26), %s3084_s14 }
  0x3c   : > { %s72_s18 = ssub.s32 %s3080_s13, %s3835_s19  ;;  %p3278_p0 = por %p83_p13, %p56_p12 }
  0x3d   : > { %2585 = dma.hbm_to_vmem [thread:$0]  (!%p3237_p5), %s3787_s5, 256, %s298_s22, [#allocation16], %s3757_s24, %s3757_s24, %s3759_s25  }
  0x3e   : > { %p43_p2 = scmp.ge.s32.totalorder %s3837_s26, 2  ;;  %p89_p4 = scmp.ne.s32.totalorder %s3052_s28, %s3048_s27 }
  0x3f   : > { %p3767_p7 = scmp.lt.s32.totalorder %s3088_s15, 4  ;;  %s345_s21 = sand.u32 1, %s3088_s15  }
  0x40   : > { %s3839_s26 = smov (%p43_p2, %s3837_s26), 0  ;;  %p3290_p8 = por %p89_p4, %p3768_p1 }
  0x41   : > { %3790 = sst [smem:[#allocation29_spill]] %s3839_s26  ;;  %s3296_s24 = ssub.s32 %s3084_s14, %s3839_s26 }
  0x42   : > { %s3791_s23 = scalar_select %p3290_p8, 1, 0 }
  0x43   : > { %s347_s25 = sand.u32 1, %s3056_s29   ;;  %s73_s3 = sor.u32 %s72_s18, %s3296_s24 }
  0x44   : > { %3792 = sst [smem:[#allocation30_spill]] %s3791_s23  ;;  %s3300_s5 = sshll.u32 %s347_s25, 3 }
  0x45   : > { %p74_p9 = scmp.eq.s32.totalorder %s73_s3, 0  ;;  %s2391_s27 = sshll.u32 %s3080_s13, 1 }
  0x46   : > { %s2392_s19 = sshll.u32 %s3084_s14, 2  ;;  %s349_s11 = scalar_lea.vmem [#allocation9], %s3300_s5 }
  0x47   : > { %s3305_s12 = scalar_select %p74_p9, %s3056_s29, %s76_s8  }
  0x48   : > { %s355_s7 = sadd.s32 %s2392_s19, %s2391_s27  ;;  %s358_s28 = sshll.u32 %s349_s11, 4  ;;  %s359_s28 = int_to_ptr.vmem [resolvable:$true] %s358_s28 }
  0x49   : > { %s2393_s17 = sshll.u32 %s355_s7, 6  ;;  %s3793_s1 = sld [smem:[#allocation32_spill]] }
  0x4a   : > { %p3315_p10 = pnand %p3767_p7, %p3278_p0  ;;  %s3795_s2 = sld [smem:[#allocation33_spill]] }
  0x4b   : > { %s3324_s11 = scalar_lea.sflag [#allocation10], %s345_s21  ;;  %s2833_s7 = scalar_lea.vmem %s359_s28, 128 }
  0x4c   : > { %p3769_p11 = pneg %p3315_p10  ;;  %p2834_p13 = scmp.ne.s32.totalorder %s359_s28, %s2833_s7 }
  0x4d   : > { %s3094_s0 = smov [#allocation9]  }
  0x4e   : > { %p2836_p2 = pnand %p2834_p13, %p3769_p11  ;;  %s2838_s8 = sshll.u32 %s3094_s0, 4  ;;  %s2839_s8 = int_to_ptr.vmem [resolvable:$false] %s2838_s8 }
  0x4f   : > { %s357_s26 = scalar_lea.hbm %s3793_s1, %s2393_s17  ;;  %s2840_s22 = scalar_lea.vmem %s2839_s8, 256 }
  0x50   : > { %s3322_s19 = scalar_lea.hbm %s3795_s2, %s2393_s17  ;;  %p2837_p0 = pneg %p2836_p2 }
  0x51   : > { %p2841_p4 = scmp.lt.s32.totalorder %s359_s28, %s2839_s8  ;;  %p2842_p9 = scmp.lt.s32.totalorder %s2840_s22, %s2833_s7 }
  0x53   : > { %p2843_p7 = por %p2842_p9, %p2841_p4 }
  0x55   : > { %p2844_p1 = pnand %p2843_p7, %p2837_p0 }
  0x57   : > { %2847 = shalt.err (!%p2844_p1)
}
  0x58   : > { %s3796_s17 = smov 4   ;;  %s3797_s21 = smov 64  }
  0x59   : > { %2595 = dma.hbm_to_vmem [thread:$0]  (!%p3315_p10), %s357_s26, 128, %s359_s28, %s3324_s11, %s3797_s21, %s3797_s21, %s3796_s17  }
  0x5a   : > { %s372_s23 = scalar_lea.vmem [#allocation11], %s3300_s5  ;;  %s3095_s3 = smov [#allocation14]  }
  0x5b   : > { %s3338_s27 = sshll.u32 %s372_s23, 4  ;;  %s284_s18 = sshll.u32 %s3095_s3, 4  ;;  %s285_s18 = int_to_ptr.vmem [resolvable:$true] %s284_s18  ;;  %s3401_s27 = int_to_ptr.vmem [resolvable:$true] %s3338_s27 }
  0x5c   : > { %s3096_s0 = smov [#allocation17]   ;;  %s2859_s8 = scalar_lea.vmem %s285_s18, 256 }
  0x5d   : > { %s310_s7 = sshll.u32 %s3096_s0, 4  ;;  %p2860_p7 = scmp.ne.s32.totalorder %s285_s18, %s2859_s8  ;;  %s311_s7 = int_to_ptr.vmem [resolvable:$true] %s310_s7 }
  0x5e   : > { %p2867_p2 = scmp.lt.s32.totalorder %s285_s18, %s285_s18  ;;  %p2868_p0 = scmp.lt.s32.totalorder %s2859_s8, %s2859_s8 }
  0x5f   : > { %p2862_p1 = pnand %p2860_p7, %p2770_p6 }
  0x60   : > { %p2869_p4 = por %p2868_p0, %p2867_p2 }
  0x61   : > { %p2863_p13 = pneg %p2862_p1 }
  0x63   : > { %p2870_p9 = pnand %p2869_p4, %p2863_p13 }
  0x65   : > { %2873 = shalt.err (!%p2870_p9)
}
  0x66   : > { %s3798_s4 = sld [smem:[#allocation35_spill]]  ;;  %s2885_s26 = scalar_lea.vmem %s311_s7, 256 }
  0x67   : > { %p2886_p11 = scmp.ne.s32.totalorder %s311_s7, %s2885_s26  ;;  %p2893_p2 = scmp.lt.s32.totalorder %s311_s7, %s311_s7 }
  0x68   : > { %p2894_p13 = scmp.lt.s32.totalorder %s2885_s26, %s2885_s26 }
  0x69   : > { %p2888_p7 = pnand %p2886_p11, %p2770_p6 }
  0x6a   : > { %p2895_p0 = por %p2894_p13, %p2893_p2 }
  0x6b   : > { %p2889_p1 = pneg %p2888_p7 }
  0x6c   : > { %2582 = dma.hbm_to_vmem [thread:$0]  (!%p3237_p5), %s3798_s4, 256, %s285_s18, [#allocation13], %s3797_s21, %s3797_s21, %s3796_s17  }
  0x6d   : > { %p2896_p4 = pnand %p2895_p0, %p2889_p1 }
  0x6f   : > { %2899 = shalt.err (!%p2896_p4)
}
  0x70   : > { %s3799_s6 = sld [smem:[#allocation37_spill]]  ;;  %s2381_s20 = sadd.s32 4294967294, %s3088_s15  }
  0x71   : > { %p46_p6 = scmp.eq.s32.totalorder %s3296_s24, 0  ;;  %s48_s3 = sadd.s32 1, %s3068_s10 }
  0x72   : > { %p55_p11 = scmp.ne.s32.totalorder %s3068_s10, %s3064_s9  ;;  %p61_p9 = scmp.ne.s32.totalorder %s3064_s9, %s3060_s30 }
  0x73   : > { %s3370_s18 = scalar_select %p46_p6, %s3068_s10, %s48_s3  }
  0x74   : > { %p57_p7 = por %p56_p12, %p55_p11  ;;  %p3800_p1 = scmp.eq.s32.totalorder %s3224_s16, 0 }
  0x75   : > { %p246_p13 = scmp.eq.s32.totalorder %s3224_s16, 3  ;;  %p252_p0 = scmp.eq.s32.totalorder %s2381_s20, 3 }
  0x76   : > { %2588 = dma.hbm_to_vmem [thread:$0]  (!%p3237_p5), %s3799_s6, 256, %s311_s7, [#allocation16], %s3797_s21, %s3797_s21, %s3796_s17  }
  0x77   : > { %p3376_p2 = por %p3800_p1, %p61_p9  ;;  %s327_s8 = sand.u32 1, %s3068_s10  }
  0x78   : > { %s2389_s7 = sshll.u32 %s3084_s14, 6  ;;  %p3383_p5 = por %p246_p13, %p55_p11 }
  0x79   : > { %p3387_p4 = por %p252_p0, %p61_p9  ;;  %s2388_s28 = sshll.u32 %s327_s8, 2 }
  0x7a   : > { %s3802_s24 = scalar_select %p3383_p5, 1, 0 }
  0x7b   : > { %s3803_s5 = scalar_select %p3387_p4, 1, 0 }
  0x7c   : > { %s3804_s23 = sld [smem:[#allocation31_spill]]  ;;  %s331_s1 = scalar_lea.vmem [#allocation6], %s2388_s28 }
  0x7d   : > { %s338_s2 = sshll.u32 %s331_s1, 4  ;;  %p3805_p12 = scmp.lt.s32.totalorder %s3088_s15, 4  ;;  %s339_s2 = int_to_ptr.vmem [resolvable:$true] %s338_s2 }
  0x7e   : > { %s328_s4 = scalar_lea.sflag [#allocation7], %s327_s8  ;;  %s2913_s6 = scalar_lea.vmem %s339_s2, 64 }
  0x7f   : > { %p3396_p6 = pnand %p3805_p12, %p57_p7  ;;  %p2914_p9 = scmp.ne.s32.totalorder %s339_s2, %s2913_s6 }
  0x80   : > { %s3097_s26 = smov [#allocation6]  }
  0x81   : > { %p2902_p11 = pneg %p3396_p6 }
  0x82   : > { %s336_s3 = scalar_lea.hbm %s3804_s23, %s2389_s7  ;;  %s2918_s7 = sshll.u32 %s3097_s26, 4  ;;  %s2919_s7 = int_to_ptr.vmem [resolvable:$false] %s2918_s7 }
  0x83   : > { %p2916_p1 = pnand %p2914_p9, %p2902_p11  ;;  %s2920_s1 = scalar_lea.vmem %s2919_s7, 128 }
  0x84   : > { %p2921_p0 = scmp.lt.s32.totalorder %s339_s2, %s2919_s7  ;;  %p2922_p7 = scmp.lt.s32.totalorder %s2920_s1, %s2913_s6 }
  0x85   : > { %p2917_p13 = pneg %p2916_p1 }
  0x86   : > { %p2923_p12 = por %p2922_p7, %p2921_p0 }
  0x88   : > { %p2924_p4 = pnand %p2923_p12, %p2917_p13 }
  0x8a   : > { %2927 = shalt.err (!%p2924_p4)
}
  0x8b   : > { %2592 = dma.hbm_to_vmem [thread:$0]  (!%p3396_p6), %s336_s3, 64, %s339_s2, %s328_s4  }
  0x8c   : > { %s2941_s8 = scalar_lea.vmem %s3401_s27, 128  ;;  %p3807_p11 = pneg %p3315_p10 }
  0x8d   : > { %p2942_p5 = scmp.ne.s32.totalorder %s3401_s27, %s2941_s8  ;;  %s3098_s28 = smov [#allocation11]  }
  0x8e   : > { %s2946_s22 = sshll.u32 %s3098_s28, 4  ;;  %s2947_s22 = int_to_ptr.vmem [resolvable:$false] %s2946_s22 }
  0x8f   : > { %p2944_p9 = pnand %p2942_p5, %p3807_p11  ;;  %s2948_s6 = scalar_lea.vmem %s2947_s22, 256 }
  0x90   : > { %p2949_p0 = scmp.lt.s32.totalorder %s3401_s27, %s2947_s22  ;;  %p2950_p13 = scmp.lt.s32.totalorder %s2948_s6, %s2941_s8 }
  0x91   : > { %p2945_p1 = pneg %p2944_p9 }
  0x92   : > { %p2951_p4 = por %p2950_p13, %p2949_p0 }
  0x94   : > { %p2952_p7 = pnand %p2951_p4, %p2945_p1 }
  0x96   : > { %2955 = shalt.err (!%p2952_p7)
}
  0x97   : > { %2598 = dma.hbm_to_vmem [thread:$0]  (!%p3315_p10), %s3322_s19, 128, %s3401_s27, %s3324_s11, %s3797_s21, %s3797_s21, %s3796_s17  }
  0x98   : > { %393 = sbr.rel (%p3229_p3) target bundleno = 2103 (0x837), region = 52  ;;  %s3424_s4 = sand.u32 (!%p3229_p3), 1, %s3064_s9  }
  0x99   : > { %s2399_s23 = sshll.u32 (!%p3229_p3), %s3424_s4, 2  ;;  %s396_s3 = scalar_lea.sflag (!%p3229_p3), [#allocation7], %s3424_s4 }
  0x9a   : > { %s3428_s20 = scalar_lea.vmem (!%p3229_p3), [#allocation6], %s2399_s23 }
  0x9d   : > { %3027 = dma.done.wait (%p3376_p2), %s396_s3, 64  }
  0x9e   : > { %3029 = vsyncadd (%p3376_p2), %s396_s3, 4294967232  ;;  %s3809_s25 = sld [smem:[#allocation24_spill]]  ;;  %s404_s11 = sand.u32 1, %s3224_s16  }
  0x9f   : > { %s405_s27 = scalar_lea.sflag [#allocation10], %s404_s11 }
  0xa4   : > { %s406_s17 = sand.u32 1, %s3809_s25  }
  0xa5   : > { %s3436_s21 = sshll.u32 %s406_s17, 3 }
  0xa6   : > { %s408_s26 = scalar_lea.vmem [#allocation9], %s3436_s21 }
  0xa7   : > { %3031 = dma.done.wait (%p3290_p8), %s405_s27, 256  }
  0xa8   : > { %3033 = vsyncadd (%p3290_p8), %s405_s27, 4294967040  ;;  %s417_s7 = scalar_lea.vmem [#allocation11], %s3436_s21  ;;  %p3811_p3 = scmp.eq.s32.totalorder %s3224_s16, 0 }
  0xaa   : > { %3035 = dma.done.wait (%p3811_p3), [#allocation13], 512   ;;  %p3812_p10 = pmov %p3811_p3 }
  0xab   : > { %p3813_p2 = pmov %p3811_p3 }
  0xac   : > { %3037 = vsyncadd (%p3812_p10), [#allocation13], 4294966784 }
  0xad   : > { %3039 = dma.done.wait (%p3813_p2), [#allocation16], 512   ;;  %p3814_p5 = pmov %p3813_p2 }
  0xae   : > { %s2406_s0 = sshll.u32 %s3424_s4, 3  ;;  %s3815_s8 = sld [smem:[#allocation25_spill]] }
  0xaf   : > { %3041 = vsyncadd (%p3814_p5), [#allocation16], 4294966784  ;;  %s3453_s1 = scalar_lea.vmem [#allocation18], %s2406_s0 }
  0xb4   : > { %p2407_p8 = scmp.ne.s32.totalorder %s3815_s8, 0 }
  0xb5   : > { %s3102_s16 = smov (!%p2407_p8), 104   ;;  %s3103_s28 = smov (!%p2407_p8), 120  }
  0xb6   : > { %482 = sbr.rel (%p2407_p8) target bundleno = 538 (0x21a), region = 84  ;;  %s3104_s22 = smov (!%p2407_p8), 112  }
  0xbb   : > { %vm722_vm0 = vcmask 7168   ;;  %vm731_vm1 = vcmask 64512   ;;  %v3099_v0 = vmov 0.0   ;;  %v3100_v1 = vmov -inf   ;;  %v2730_v2 = vld [vmem:[#allocation12 + $0x8] sm:$0xff]   ;;  %v2731_v3 = vld [vmem:[#allocation12] sm:$0xff]  }
  0xbc   : > { %2472 = vmatprep.subr.bf16.mxu0 %v3099_v0  ;;  %723 = vst.msk [vmem:[#allocation3] sm:$0xff] %vm722_vm0, %v3100_v1  ;;  %724 = vst.msk [vmem:[#allocation3 + $0x8] sm:$0xff] %vm722_vm0, %v3100_v1  ;;  %vm3101_vm2 = vmmov 0   ;;  %v483_v4 = vld [vmem:[%s3428_s20] sm:$0xf]  ;;  %vm500_vm3 = vcmask 261120   ;;  %v555_v12 = vlaneseq }
  0xbd   : > { %725 = vst.msk [vmem:[#allocation3 + $0x10] sm:$0xff] %vm722_vm0, %v3100_v1  ;;  %726 = vst.msk [vmem:[#allocation3 + $0x18] sm:$0xff] %vm722_vm0, %v3100_v1  ;;  %2476 = vmatprep.mubr.msk.bf16.mxu0 %vm3101_vm2, %v3099_v0  ;;  %2473 = vmatpush3.bf16.msra.mxu0 %v2730_v2  ;;  %v3105_v10 = vmov 1983009808   ;;  %v3106_v13 = vmov 1934713408  }
  0xbe   : > { %727 = vst.msk [vmem:[#allocation4] sm:$0xff] %vm722_vm0, %v3099_v0  ;;  %728 = vst.msk [vmem:[#allocation4 + $0x8] sm:$0xff] %vm722_vm0, %v3099_v0  ;;  %2474 = vmatprep.subr.bf16.mxu0 %v3099_v0  ;;  %v553_v11 = vunpack.c.l.s4 %v3105_v10  ;;  %v570_v14 = vunpack.c.l.s4 %v3106_v13  ;;  %v556_v16 = vshrl.u32 %v555_v12, 7  ;;  %v3107_v33 = vmov 0  }
  0xbf   : > { %729 = vst.msk [vmem:[#allocation4 + $0x10] sm:$0xff] %vm722_vm0, %v3099_v0  ;;  %730 = vst.msk [vmem:[#allocation4 + $0x18] sm:$0xff] %vm722_vm0, %v3099_v0  ;;  %vm717_vm4 = vcmask 60416  }
  0xc0   : > { %732 = vst.msk [vmem:[#allocation5] sm:$0xff] %vm731_vm1, %v3099_v0  ;;  %733 = vst.msk [vmem:[#allocation5 + $0x8] sm:$0xff] %vm731_vm1, %v3099_v0  ;;  %v554_v15 = vunpack.c.0.s8 %v553_v11  ;;  %v571_v17 = vunpack.c.0.s8 %v570_v14 }
  0xc1   : > { %734 = vst.msk [vmem:[#allocation5 + $0x10] sm:$0xff] %vm731_vm1, %v3099_v0  ;;  %735 = vst.msk [vmem:[#allocation5 + $0x18] sm:$0xff] %vm731_vm1, %v3099_v0  ;;  %2475 = vmatpush3.bf16.msra.mxu0 %v2731_v3 }
  0xc2   : > { %v557_v18 = vsub.s32 %v554_v15, %v556_v16  ;;  %v574_v22 = vsub.s32 %v571_v17, %v556_v16 }
  0xc4   : > { %2477 = vmatmul.mubr.msk.bf16.vlgmr.msra.gmra.mxu0 %vm500_vm3, %v483_v4 }
 0x184   : > { %v538_v5 = vpop.f32.mrf.mxu0 }
 0x185   : > { %v544_v6 = vpack.c.bf16 %v538_v5, %v538_v5 }
 0x186   : > { %v2478_v7 = vpop.f32.mrf.mxu0 }
 0x187   : > { %550 = vrot.lane.b32.xlu1 %v544_v6, %s3102_s16  ;;  %546 = vrot.lane.b32.xlu0 %v544_v6, %s3103_s28  ;;  %v558_v29 = vrot.slane %v544_v6, %v557_v18 }
 0x188   : > { %v541_v8 = vpop.f32.mrf.mxu0 }
 0x18a   : > { %v2479_v9 = vpop.f32.mrf.mxu0 }
 0x18b   : > { %548 = vrot.lane.b32.xlu0 %v544_v6, %s3104_s22 }
 0x1f9   : > { %v551_v19 = vpop.permute.xlu1 %550  ;;  %v547_v20 = vpop.permute.xlu0 %546 }
 0x1fa   : > { %v600_v21 = vrot.slane %v551_v19, %v557_v18  ;;  %v592_v23 = vrot.slane %v547_v20, %v557_v18 }
 0x1fc   : > { %v601_v24 = vcombine.low %v592_v23, %v600_v21  ;;  %v602_v25 = vcombine.high %v592_v23, %v600_v21 }
 0x1fd   : > { %v549_v26 = vpop.permute.xlu0 %548 }
 0x1fe   : > { %v609_v27 = vrot.slane %v601_v24, %v574_v22  ;;  %v566_v28 = vrot.slane %v549_v26, %v557_v18  ;;  %v616_v30 = vrot.slane %v602_v25, %v574_v22 }
 0x200   : > { %v567_v31 = vcombine.low %v558_v29, %v566_v28  ;;  %v568_v32 = vcombine.high %v558_v29, %v566_v28  ;;  %v617_v34 = vcombine.high %v609_v27, %v3107_v33  ;;  %v618_v37 = vcombine.high %v616_v30, %v3107_v33 }
 0x201   : > { %v624_v38 = vshrl.u32 %v609_v27, 16  ;;  %v640_v44 = vshrl.u32 %v616_v30, 16 }
 0x202   : > { %v575_v35 = vrot.slane %v567_v31, %v574_v22  ;;  %v582_v36 = vrot.slane %v568_v32, %v574_v22  ;;  %v632_v43 = vshrl.u32 %v617_v34, 16  ;;  %v648_v51 = vshrl.u32 %v618_v37, 16 }
 0x204   : > { %v583_v39 = vcombine.high %v575_v35, %v3107_v33  ;;  %v584_v40 = vcombine.high %v582_v36, %v3107_v33  ;;  %v621_v41 = vpack.i.b16 %v609_v27, %v575_v35  ;;  %v623_v42 = vshrl.u32 %v575_v35, 16 }
 0x205   : > { %v637_v45 = vpack.i.b16 %v616_v30, %v582_v36  ;;  %v639_v46 = vshrl.u32 %v582_v36, 16 }
 0x206   : > { %v625_v47 = vpack.i.b16 %v624_v38, %v623_v42  ;;  %v629_v48 = vpack.i.b16 %v617_v34, %v583_v39  ;;  %v631_v49 = vshrl.u32 %v583_v39, 16  ;;  %v645_v50 = vpack.i.b16 %v618_v37, %v584_v40 }
 0x207   : > { %v641_v52 = vpack.i.b16 %v640_v44, %v639_v46  ;;  %v647_v53 = vshrl.u32 %v584_v40, 16  ;;  %v651_v54 = vcombine.low %v621_v41, %v637_v45 }
 0x208   : > { %v633_v55 = vpack.i.b16 %v632_v43, %v631_v49  ;;  %v659_v56 = vcombine.low %v629_v48, %v645_v50 }
 0x209   : > { %v649_v57 = vpack.i.b16 %v648_v51, %v647_v53  ;;  %v676_v58 = vcombine.low %v625_v47, %v641_v52  ;;  %v658_v59 = vrot.slane %v651_v54, %v557_v18 }
 0x20a   : > { %v666_v60 = vrot.slane %v659_v56, %v557_v18 }
 0x20b   : > { %v684_v61 = vcombine.low %v633_v55, %v649_v57  ;;  %v683_v63 = vrot.slane %v676_v58, %v557_v18 }
 0x20c   : > { %v667_v62 = vcombine.low %v658_v59, %v666_v60 }
 0x20d   : > { %v691_v0 = vrot.slane %v684_v61, %v557_v18 }
 0x20e   : > { %v674_v1 = vrot.slane %v667_v62, %v574_v22 }
 0x20f   : > { %v692_v2 = vcombine.low %v683_v63, %v691_v0 }
 0x210   : > { %v675_v3 = vcombine.high %v674_v1, %v3107_v33  ;;  %v705_v7 = vshrl.u32 %v674_v1, 16 }
 0x211   : > { %v699_v4 = vrot.slane %v692_v2, %v574_v22 }
 0x212   : > { %v713_v11 = vshrl.u32 %v675_v3, 16 }
 0x213   : > { %v700_v5 = vcombine.high %v699_v4, %v3107_v33  ;;  %v703_v6 = vpack.i.b16 %v699_v4, %v674_v1  ;;  %v706_v8 = vshrl.u32 %v699_v4, 16 }
 0x215   : > { %v707_v9 = vpack.i.b16 %v706_v8, %v705_v7  ;;  %v711_v10 = vpack.i.b16 %v700_v5, %v675_v3  ;;  %v714_v12 = vshrl.u32 %v700_v5, 16  ;;  %718 = vst.msk [vmem:[#allocation2] sm:$0xf] %vm717_vm4, %v703_v6 }
 0x217   : > { %v715_v13 = vpack.i.b16 %v714_v12, %v713_v11  ;;  %719 = vst.msk [vmem:[#allocation2 + $0x4] sm:$0xf] %vm717_vm4, %v707_v9  ;;  %720 = vst.msk [vmem:[#allocation2 + $0x8] sm:$0xf] %vm717_vm4, %v711_v10 }
 0x219   : > { %721 = vst.msk [vmem:[#allocation2 + $0xc] sm:$0xf] %vm717_vm4, %v715_v13 }
 0x21a PF: > { %v2734_v14 = vld [vmem:[#allocation14 + $0x8] sm:$0xff]   ;;  %v3108_v15 = vmov 0.0   ;;  %v2735_v16 = vld [vmem:[#allocation14] sm:$0xff]   ;;  %vm3109_vm5 = vmmov 0   ;;  %v2736_v17 = vld [vmem:[%s408_s26] sm:$0xff]   ;;  %vm761_vm6 = vcmask 261120   ;;  %v906_v29 = vlaneseq }
 0x21b   : > { %2480 = vmatprep.subr.bf16.mxu0 %v3108_v15  ;;  %2488 = vmatprep.subr.bf16.mxu1 %v3108_v15  ;;  %v3110_v18 = vmov 0   ;;  %s3111_s6 = smov 104   ;;  %s3112_s2 = smov 120   ;;  %v2737_v24 = vld [vmem:[#allocation15 + $0x8] sm:$0xff]   ;;  %v2738_v25 = vld [vmem:[#allocation15] sm:$0xff]   ;;  %v2739_v26 = vld [vmem:[%s417_s7] sm:$0xff]  }
 0x21c   : > { %2481 = vmatpush3.bf16.msra.mxu0 %v2734_v14  ;;  %2484 = vmatprep.mubr.msk.bf16.mxu0 %vm3109_vm5, %v3108_v15  ;;  %s3113_s23 = smov 112   ;;  %v3114_v27 = vmov 1983009808   ;;  %v907_v31 = vshrl.u32 %v906_v29, 7  ;;  %v3115_v32 = vmov 1934713408   ;;  %v3480_v35 = vpack.i.b16 %v3110_v18, %v3110_v18 }
 0x21d   : > { %2482 = vmatprep.subr.bf16.mxu0 %v3108_v15  ;;  %2492 = vmatprep.mubr.msk.bf16.mxu1 %vm3109_vm5, %v3108_v15  ;;  %v904_v28 = vunpack.c.l.s4 %v3114_v27  ;;  %v935_v33 = vunpack.c.l.s4 %v3115_v32  ;;  %vm1421_vm7 = vcmask 64512   ;;  %vm1610_vm8 = vcmask 130048   ;;  %s3816_s3 = sld [smem:[#allocation25_spill]] }
 0x21e   : > { %2732 = vset.pattern.permute.xlu0 %v3110_v18  ;;  %2733 = vset.pattern.permute.xlu1 %v3110_v18  ;;  %vm1695_vm9 = vcmask 7168  }
 0x21f   : > { %2489 = vmatpush3.bf16.msra.mxu1 %v2737_v24  ;;  %v905_v30 = vunpack.c.0.s8 %v904_v28  ;;  %v936_v41 = vunpack.c.0.s8 %v935_v33 }
 0x220   : > { %2483 = vmatpush3.bf16.msra.mxu0 %v2735_v16  ;;  %2490 = vmatprep.subr.bf16.mxu1 %v3108_v15 }
 0x221   : > { %2496 = vmatprep.subr.bf16.mxu0 %v3108_v15  ;;  %v3482_v40 = vsub.s32 %v905_v30, %v907_v31  ;;  %v3486_v49 = vsub.s32 %v936_v41, %v907_v31 }
 0x223   : > { %2485 = vmatmul.mubr.msk.bf16.vlgmr.msra.gmra.mxu0 %vm761_vm6, %v2736_v17  ;;  %2491 = vmatpush3.bf16.msra.mxu1 %v2738_v25  ;;  %p2435_p6 = scmp.ne.s32.totalorder %s3816_s3, 1 }
 0x224   : > { %2498 = vmatprep.mubr.msk.bf16.mxu0 %vm3109_vm5, %v3108_v15  ;;  %2502 = vmatprep.subr.bf16.mxu1 %v3108_v15  ;;  %s3119_s20 = smov (!%p2435_p6), 8   ;;  %s3120_s25 = smov (!%p2435_p6), 16  }
 0x225   : > { %s3121_s19 = smov (!%p2435_p6), 24   ;;  %s3817_s21 = sld [smem:[#allocation38_spill]] (!%p2435_p6) }
 0x226   : > { %2493 = vmatmul.mubr.msk.bf16.vlgmr.msra.gmra.mxu1 %vm761_vm6, %v2739_v26 }
 0x227   : > { %2504 = vmatprep.mubr.msk.bf16.mxu1 %vm3109_vm5, %v3108_v15 }
 0x2e3   : > { %v799_v19 = vpop.f32.mrf.mxu0 }
 0x2e5   : > { %v2486_v20 = vpop.f32.mrf.mxu0 }
 0x2e7   : > { %v802_v21 = vpop.f32.mrf.mxu0 }
 0x2e8   : > { %v806_v22 = vpack.c.bf16 %v802_v21, %v799_v19 }
 0x2e9   : > { %v2487_v23 = vpop.f32.mrf.mxu0 }
 0x2ea   : > { %878 = vrot.lane.b32.xlu1 %v806_v22, %s3111_s6  ;;  %874 = vrot.lane.b32.xlu0 %v806_v22, %s3112_s2  ;;  %v884_v38 = vshrl.u32 %v806_v22, 16 }
 0x2ee   : > { %876 = vrot.lane.b32.xlu0 %v806_v22, %s3113_s23 }
 0x35c   : > { %v875_v34 = vpop.permute.xlu0 %874  ;;  %v879_v39 = vpop.permute.xlu1 %878 }
 0x35d   : > { %v882_v36 = vpack.i.b16 %v875_v34, %v806_v22  ;;  %v885_v37 = vshrl.u32 %v875_v34, 16  ;;  %v893_v46 = vshrl.u32 %v879_v39, 16 }
 0x35f   : > { %v886_v42 = vpack.i.b16 %v885_v37, %v884_v38  ;;  %v902_v44 = vcombine.high %v882_v36, %v3480_v35  ;;  %v909_v48 = vrot.slane %v882_v36, %v3482_v40 }
 0x360   : > { %v877_v43 = vpop.permute.xlu0 %876 }
 0x361   : > { %v890_v45 = vpack.i.b16 %v879_v39, %v877_v43  ;;  %v892_v47 = vshrl.u32 %v877_v43, 16  ;;  %v968_v52 = vcombine.high %v886_v42, %v3480_v35  ;;  %v916_v54 = vrot.slane %v902_v44, %v3482_v40 }
 0x362   : > { %v975_v58 = vrot.slane %v886_v42, %v3482_v40 }
 0x363   : > { %v917_v50 = vcombine.high %v890_v45, %v3480_v35  ;;  %v924_v51 = vrot.slane %v890_v45, %v3482_v40  ;;  %v894_v53 = vpack.i.b16 %v893_v46, %v892_v47  ;;  %v982_v1 = vrot.slane %v968_v52, %v3482_v40 }
 0x365   : > { %v931_v55 = vrot.slane %v917_v50, %v3482_v40  ;;  %v932_v56 = vcombine.low %v909_v48, %v924_v51  ;;  %v933_v57 = vcombine.high %v909_v48, %v924_v51  ;;  %v983_v59 = vcombine.high %v894_v53, %v3480_v35 }
 0x366   : > { %v990_v60 = vrot.slane %v894_v53, %v3482_v40 }
 0x367   : > { %v940_v61 = vrot.slane %v932_v56, %v3486_v49  ;;  %v947_v62 = vrot.slane %v933_v57, %v3486_v49  ;;  %v948_v63 = vcombine.low %v916_v54, %v931_v55  ;;  %v949_v0 = vcombine.high %v916_v54, %v931_v55  ;;  %v1417_v54 = vld [vmem:[#allocation2] sm:$0xf]  ;;  %v1418_v56 = vld [vmem:[#allocation2 + $0x4] sm:$0xf] }
 0x368   : > { %v997_v2 = vrot.slane %v983_v59, %v3482_v40  ;;  %v998_v3 = vcombine.low %v975_v58, %v990_v60  ;;  %v999_v4 = vcombine.high %v975_v58, %v990_v60  ;;  %v1419_v59 = vld [vmem:[#allocation2 + $0x8] sm:$0xf]  ;;  %v1420_v60 = vld [vmem:[#allocation2 + $0xc] sm:$0xf] }
 0x369   : > { %v956_v5 = vrot.slane %v948_v63, %v3486_v49  ;;  %v963_v6 = vrot.slane %v949_v0, %v3486_v49  ;;  %v1034_v7 = vcombine.low %v940_v61, %v947_v62  ;;  %v2419_v8 = vcombine.high %v940_v61, %v947_v62  ;;  %v865_v61 = vpop.f32.mrf.mxu1 }
 0x36a   : > { %v1006_v9 = vrot.slane %v998_v3, %v3486_v49  ;;  %v1013_v10 = vrot.slane %v999_v4, %v3486_v49  ;;  %v1014_v11 = vcombine.low %v982_v1, %v997_v2  ;;  %v1015_v12 = vcombine.high %v982_v1, %v997_v2 }
 0x36b   : > { %v1041_v13 = vrot.slane %v1034_v7, %v3482_v40  ;;  %v1049_v14 = vrot.slane %v2419_v8, %v3482_v40  ;;  %v1050_v16 = vcombine.low %v956_v5, %v963_v6  ;;  %v2420_v17 = vcombine.high %v956_v5, %v963_v6  ;;  %v2494_v62 = vpop.f32.mrf.mxu1 }
 0x36c   : > { %v1022_v18 = vrot.slane %v1014_v11, %v3486_v49  ;;  %v1029_v19 = vrot.slane %v1015_v12, %v3486_v49  ;;  %v1084_v20 = vcombine.low %v1006_v9, %v1013_v10  ;;  %v2421_v21 = vcombine.high %v1006_v9, %v1013_v10 }
 0x36d   : > { %v1057_v22 = vrot.slane %v1050_v16, %v3482_v40  ;;  %v1065_v23 = vrot.slane %v2420_v17, %v3482_v40  ;;  %v1066_v24 = vcombine.low %v1041_v13, %v1049_v14  ;;  %v868_v63 = vpop.f32.mrf.mxu1 }
 0x36e   : > { %v1100_v25 = vcombine.low %v1022_v18, %v1029_v19  ;;  %v2422_v26 = vcombine.high %v1022_v18, %v1029_v19  ;;  %v1091_v27 = vrot.slane %v1084_v20, %v3482_v40  ;;  %v1099_v28 = vrot.slane %v2421_v21, %v3482_v40 }
 0x36f   : > { %v1074_v29 = vcombine.low %v1057_v22, %v1065_v23  ;;  %v1073_v34 = vrot.slane %v1066_v24, %v3486_v49  ;;  %v3538_v0 = vpack.c.bf16 %v868_v63, %v865_v61  ;;  %v2495_v1 = vpop.f32.mrf.mxu1  ;;  %v1606_v23 = vld [vmem:[#allocation3] sm:$0xff] }
 0x370   : > { %v1107_v30 = vrot.slane %v1100_v25, %v3482_v40  ;;  %v1115_v31 = vrot.slane %v2422_v26, %v3482_v40  ;;  %v1116_v32 = vcombine.low %v1091_v27, %v1099_v28  ;;  %v1607_v25 = vld [vmem:[#allocation3 + $0x8] sm:$0xff] }
 0x371   : > { %v1081_v33 = vrot.slane %v1074_v29, %v3486_v49 }
 0x372   : > { %v1124_v36 = vcombine.low %v1107_v30, %v1115_v31  ;;  %v1123_v38 = vrot.slane %v1116_v32, %v3486_v49  ;;  %v3564_v32 = vld [vmem:[#allocation3 + $0x10] sm:$0xff] }
 0x373   : > { %v1082_v37 = vcombine.low %v1073_v34, %v1081_v33  ;;  %v1083_v48 = vcombine.high %v1073_v34, %v1081_v33 }
 0x374   : > { %v1131_v39 = vrot.slane %v1124_v36, %v3486_v49  ;;  %v3566_v36 = vld [vmem:[#allocation3 + $0x18] sm:$0xff] }
 0x375   : > { %v1137_v43 = vshrl.u32 %v1082_v37, 16  ;;  %v1143_v53 = vshrl.u32 %v1083_v48, 16 }
 0x376   : > { %v1132_v41 = vcombine.low %v1123_v38, %v1131_v39  ;;  %v1133_v45 = vcombine.high %v1123_v38, %v1131_v39 }
 0x378   : > { %v1136_v42 = vpack.i.b16 %v1132_v41, %v1082_v37  ;;  %v1138_v44 = vshrl.u32 %v1132_v41, 16  ;;  %v1144_v51 = vshrl.u32 %v1133_v45, 16  ;;  %v1142_v52 = vpack.i.b16 %v1133_v45, %v1083_v48 }
 0x37a   : > { %v1426_v46 = vsel %vm1421_vm7, %v1136_v42, 0  ;;  %v1139_v47 = vpack.i.b16 %v1138_v44, %v1137_v43  ;;  %v1145_v55 = vpack.i.b16 %v1144_v51, %v1143_v53  ;;  %v1518_v57 = vsel %vm1421_vm7, %v1142_v52, 0 }
 0x37b   : > { %2497 = vmatpush3.bf16.xpose.msra.mxu0 %v1426_v46 }
 0x37c   : > { %v1472_v50 = vsel %vm1421_vm7, %v1139_v47, 0  ;;  %2508 = vmatprep.subr.bf16.mxu0 %v3108_v15  ;;  %v1564_v58 = vsel %vm1421_vm7, %v1145_v55, 0  ;;  %v1157_v47 = vshrl.u32 %v3538_v0, 16 }
 0x37d   : > { %2503 = vmatpush3.bf16.xpose.msra.mxu1 %v1472_v50 }
 0x37e   : > { %2514 = vmatprep.subr.bf16.mxu1 %v3108_v15 }
 0x382   : > { %2499 = vmatmul.mubr.msk.bf16.vlgmr.msra.gmra.mxu0 %vm1421_vm7, %v1417_v54 }
 0x383   : > { %2509 = vmatpush3.bf16.xpose.msra.mxu0 %v1518_v57  ;;  %2510 = vmatprep.mubr.msk.bf16.mxu0 %vm3109_vm5, %v3108_v15 }
 0x384   : > { %2505 = vmatmul.mubr.msk.bf16.vlgmr.msra.gmra.mxu1 %vm1421_vm7, %v1418_v56  ;;  %2520 = vmatprep.subr.bf16.mxu0 %v3108_v15 }
 0x385   : > { %2515 = vmatpush3.bf16.xpose.msra.mxu1 %v1564_v58  ;;  %2516 = vmatprep.mubr.msk.bf16.mxu1 %vm3109_vm5, %v3108_v15 }
 0x386   : > { %2526 = vmatprep.subr.bf16.mxu1 %v3108_v15 }
 0x38a   : > { %2511 = vmatmul.mubr.msk.bf16.vlgmr.msra.gmra.mxu0 %vm1421_vm7, %v1419_v59 }
 0x38b   : > { %2522 = vmatprep.mubr.msk.bf16.mxu0 %vm3109_vm5, %v3108_v15 }
 0x38c   : > { %2517 = vmatmul.mubr.msk.bf16.vlgmr.msra.gmra.mxu1 %vm1421_vm7, %v1420_v60 }
 0x38d   : > { %2528 = vmatprep.mubr.msk.bf16.mxu1 %vm3109_vm5, %v3108_v15 }
 0x442   : > { %v3540_v2 = vpop.f32.mrf.mxu0 }
 0x443   : > { %v1611_v3 = vsel %vm1610_vm8, %v3540_v2, -inf }
 0x444   : > { %v3544_v4 = vpop.f32.mrf.mxu1  ;;  %1612 = vmax.xlane.f32.xlu1 %v1611_v3  ;;  %v2500_v5 = vpop.f32.mrf.mxu0 }
 0x445   : > { %v1614_v6 = vsel %vm1610_vm8, %v3544_v4, -inf }
 0x446   : > { %1615 = vmax.xlane.f32.xlu0 %v1614_v6  ;;  %v1465_v7 = vpop.f32.mrf.mxu0  ;;  %v2506_v8 = vpop.f32.mrf.mxu1 }
 0x448   : > { %v2501_v9 = vpop.f32.mrf.mxu0  ;;  %v1511_v10 = vpop.f32.mrf.mxu1 }
 0x44a   : > { %v2507_v11 = vpop.f32.mrf.mxu1  ;;  %v3548_v12 = vpop.f32.mrf.mxu0 }
 0x44b   : > { %v1617_v13 = vsel %vm1610_vm8, %v3548_v12, -inf }
 0x44c   : > { %v3552_v14 = vpop.f32.mrf.mxu1  ;;  %1618 = vmax.xlane.f32.xlu0 %v1617_v13  ;;  %v2512_v16 = vpop.f32.mrf.mxu0 }
 0x44d   : > { %v1620_v17 = vsel %vm1610_vm8, %v3552_v14, -inf }
 0x44e   : > { %v2518_v18 = vpop.f32.mrf.mxu1  ;;  %1621 = vmax.xlane.f32.xlu1 %v1620_v17  ;;  %v1557_v19 = vpop.f32.mrf.mxu0 }
 0x450   : > { %v2513_v20 = vpop.f32.mrf.mxu0  ;;  %v1603_v21 = vpop.f32.mrf.mxu1 }
 0x452   : > { %v2519_v22 = vpop.f32.mrf.mxu1 }
 0x45f   : > { %1149 = vrot.lane.b32.xlu1 %v3538_v0, %s3113_s23 }
 0x462   : > { %1147 = vrot.lane.b32.xlu0 %v3538_v0, %s3112_s2 }
 0x463   : > { %1151 = vrot.lane.b32.xlu1 %v3538_v0, %s3111_s6 }
 0x4cd   : > { %v1613_v24 = vpop.xlane.xlu1 %1612 }
 0x4ce   : > { %v1623_v26 = vmax.f32 %v1606_v23, %v1613_v24 }
 0x4cf   : > { %v1616_v27 = vpop.xlane.xlu0 %1615 }
 0x4d0   : > { %v1627_v28 = vsub.f32 %v1606_v23, %v1623_v26  ;;  %1912 = vst.msk [vmem:[#allocation3] sm:$0xff] %vm1695_vm9, %v1623_v26  ;;  %v1624_v29 = vmax.f32 %v1607_v25, %v1616_v27  ;;  %1641 = vperm.xlu0 %2732, %v1623_v26  }
 0x4d2   : > { %v1631_v30 = vmul.f32 1.442695, %v1627_v28  ;;  %v1628_v31 = vsub.f32 %v1607_v25, %v1624_v29  ;;  %1913 = vst.msk [vmem:[#allocation3 + $0x8] sm:$0xff] %vm1695_vm9, %v1624_v29  ;;  %1646 = vperm.xlu1 %2733, %v1624_v29  }
 0x4d4   : > { %2740 = vpow2.f32 %v1631_v30  ;;  %v1633_v33 = vmul.f32 1.442695, %v1628_v31 }
 0x4d5   : > { %v1619_v34 = vpop.xlane.xlu0 %1618 }
 0x4d6   : > { %2742 = vpow2.f32 %v1633_v33  ;;  %v3569_v37 = vmax.f32 %v3564_v32, %v1619_v34 }
 0x4d7   : > { %v1622_v38 = vpop.xlane.xlu1 %1621 }
 0x4d8   : > { %v1629_v39 = vsub.f32 %v3564_v32, %v3569_v37  ;;  %1914 = vst.msk [vmem:[#allocation3 + $0x10] sm:$0xff] %vm1695_vm9, %v3569_v37  ;;  %v3576_v41 = vmax.f32 %v3566_v36, %v1622_v38  ;;  %1651 = vperm.xlu1 %2733, %v3569_v37   ;;  %v1671_v37 = vld [vmem:[#allocation4] sm:$0xff] }
 0x4d9   : > { %v1148_v42 = vpop.permute.xlu0 %1147 }
 0x4da   : > { %v1630_v43 = vsub.f32 %v3566_v36, %v3576_v41  ;;  %1915 = vst.msk [vmem:[#allocation3 + $0x18] sm:$0xff] %vm1695_vm9, %v3576_v41  ;;  %1656 = vperm.xlu0 %2732, %v3576_v41   ;;  %v1155_v44 = vpack.i.b16 %v1148_v42, %v3538_v0  ;;  %v1158_v45 = vshrl.u32 %v1148_v42, 16  ;;  %v1673_v41 = vld [vmem:[#allocation4 + $0x10] sm:$0xff] }
 0x4db   : > { %v1150_v46 = vpop.permute.xlu1 %1149 }
 0x4dc   : > { %v1159_v48 = vpack.i.b16 %v1158_v45, %v1157_v47  ;;  %v1169_v50 = vcombine.high %v1155_v44, %v3480_v35  ;;  %v1165_v52 = vshrl.u32 %v1150_v46, 16  ;;  %v1176_v56 = vrot.slane %v1155_v44, %v3482_v40 }
 0x4de   : > { %v1183_v61 = vrot.slane %v1169_v50, %v3482_v40  ;;  %v1235_v62 = vcombine.high %v1159_v48, %v3480_v35  ;;  %v1242_v5 = vrot.slane %v1159_v48, %v3482_v40 }
 0x4df   : > { %v1152_v51 = vpop.permute.xlu1 %1151 }
 0x4e0   : > { %v1163_v53 = vpack.i.b16 %v1152_v51, %v1150_v46  ;;  %v1166_v54 = vshrl.u32 %v1152_v51, 16  ;;  %v1249_v11 = vrot.slane %v1235_v62, %v3482_v40 }
 0x4e1   : > { %v3587_v55 = vpop.eup %2740 }
 0x4e2   : > { %v1167_v57 = vpack.i.b16 %v1166_v54, %v1165_v52  ;;  %v1184_v58 = vcombine.high %v1163_v53, %v3480_v35  ;;  %v1191_v59 = vrot.slane %v1163_v53, %v3482_v40  ;;  %1706 = vperm.xlu0 %2732, %v3587_v55  }
 0x4e3   : > { %v3593_v60 = vpop.eup %2742 }
 0x4e4   : > { %v1198_v63 = vrot.slane %v1184_v58, %v3482_v40  ;;  %v1199_v0 = vcombine.low %v1176_v56, %v1191_v59  ;;  %v1200_v1 = vcombine.high %v1176_v56, %v1191_v59  ;;  %v1250_v3 = vcombine.high %v1167_v57, %v3480_v35  ;;  %1711 = vperm.xlu1 %2733, %v3593_v60  }
 0x4e5   : > { %v1257_v6 = vrot.slane %v1167_v57, %v3482_v40 }
 0x4e6   : > { %v1207_v7 = vrot.slane %v1199_v0, %v3486_v49  ;;  %v1214_v8 = vrot.slane %v1200_v1, %v3486_v49  ;;  %v1215_v9 = vcombine.low %v1183_v61, %v1198_v63  ;;  %v1216_v10 = vcombine.high %v1183_v61, %v1198_v63 }
 0x4e7   : > { %v1264_v13 = vrot.slane %v1250_v3, %v3482_v40  ;;  %v1265_v16 = vcombine.low %v1242_v5, %v1257_v6  ;;  %v1266_v17 = vcombine.high %v1242_v5, %v1257_v6 }
 0x4e8   : > { %v1223_v35 = vrot.slane %v1215_v9, %v3486_v49  ;;  %v1230_v18 = vrot.slane %v1216_v10, %v3486_v49  ;;  %v1301_v19 = vcombine.low %v1207_v7, %v1214_v8  ;;  %v2423_v20 = vcombine.high %v1207_v7, %v1214_v8 }
 0x4e9   : > { %v1273_v21 = vrot.slane %v1265_v16, %v3486_v49  ;;  %v1280_v22 = vrot.slane %v1266_v17, %v3486_v49  ;;  %v1281_v23 = vcombine.low %v1249_v11, %v1264_v13  ;;  %v1282_v24 = vcombine.high %v1249_v11, %v1264_v13 }
 0x4ea   : > { %v1308_v25 = vrot.slane %v1301_v19, %v3482_v40  ;;  %v1316_v26 = vrot.slane %v2423_v20, %v3482_v40  ;;  %v1317_v27 = vcombine.low %v1223_v35, %v1230_v18  ;;  %v2424_v28 = vcombine.high %v1223_v35, %v1230_v18 }
 0x4eb   : > { %v1289_v29 = vrot.slane %v1281_v23, %v3486_v49  ;;  %v1296_v30 = vrot.slane %v1282_v24, %v3486_v49  ;;  %v1351_v31 = vcombine.low %v1273_v21, %v1280_v22  ;;  %v2425_v33 = vcombine.high %v1273_v21, %v1280_v22 }
 0x4ec   : > { %v1324_v34 = vrot.slane %v1317_v27, %v3482_v40  ;;  %v1332_v38 = vrot.slane %v2424_v28, %v3482_v40  ;;  %v1333_v42 = vcombine.low %v1308_v25, %v1316_v26 }
 0x4ed   : > { %v1358_v44 = vrot.slane %v1351_v31, %v3482_v40  ;;  %v1366_v45 = vrot.slane %v2425_v33, %v3482_v40  ;;  %v1367_v46 = vcombine.low %v1289_v29, %v1296_v30  ;;  %v2426_v47 = vcombine.high %v1289_v29, %v1296_v30 }
 0x4ee   : > { %v1341_v48 = vcombine.low %v1324_v34, %v1332_v38  ;;  %v1340_v53 = vrot.slane %v1333_v42, %v3486_v49  ;;  %v1635_v30 = vmul.f32 1.442695, %v1629_v39  ;;  %v1672_v42 = vld [vmem:[#allocation4 + $0x8] sm:$0xff] }
 0x4ef   : > { %v1374_v50 = vrot.slane %v1367_v46, %v3482_v40  ;;  %v1382_v51 = vrot.slane %v2426_v47, %v3482_v40  ;;  %v1383_v52 = vcombine.low %v1358_v44, %v1366_v45  ;;  %v1675_v44 = vmul.f32 %v3587_v55, %v1671_v37 }
 0x4f0   : > { %v1348_v54 = vrot.slane %v1341_v48, %v3486_v49  ;;  %v1676_v47 = vmul.f32 %v3593_v60, %v1672_v42  ;;  %v1701_v60 = vld [vmem:[#allocation5 + $0x8] sm:$0xff] }
 0x4f1   : > { %v1391_v56 = vcombine.low %v1374_v50, %v1382_v51  ;;  %v1390_v59 = vrot.slane %v1383_v52, %v3486_v49 }
 0x4f2   : > { %v1349_v57 = vcombine.low %v1340_v53, %v1348_v54  ;;  %v1350_v58 = vcombine.high %v1340_v53, %v1348_v54 }
 0x4f3   : > { %v1398_v61 = vrot.slane %v1391_v56, %v3486_v49  ;;  %v1700_v56 = vld [vmem:[#allocation5] sm:$0xff] }
 0x4f4   : > { %v1405_v0 = vshrl.u32 %v1349_v57, 16  ;;  %v1413_v1 = vshrl.u32 %v1350_v58, 16 }
 0x4f5   : > { %v1399_v62 = vcombine.low %v1390_v59, %v1398_v61  ;;  %v1400_v63 = vcombine.high %v1390_v59, %v1398_v61 }
 0x4f7   : > { %v1403_v3 = vpack.i.b16 %v1399_v62, %v1349_v57  ;;  %v1406_v5 = vshrl.u32 %v1399_v62, 16  ;;  %v1411_v6 = vpack.i.b16 %v1400_v63, %v1350_v58  ;;  %v1414_v7 = vshrl.u32 %v1400_v63, 16 }
 0x4f9   : > { %2521 = vmatpush3.bf16.msra.mxu0 %v1403_v3  ;;  %v1407_v8 = vpack.i.b16 %v1406_v5, %v1405_v0  ;;  %v1415_v9 = vpack.i.b16 %v1414_v7, %v1413_v1  ;;  %v1702_v3 = vld [vmem:[#allocation5 + $0x10] sm:$0xff] }
 0x4fa   : > { %2532 = vmatprep.subr.bf16.mxu0 %v3108_v15 }
 0x4fb   : > { %2527 = vmatpush3.bf16.msra.mxu1 %v1407_v8  ;;  %v1703_v8 = vld [vmem:[#allocation5 + $0x18] sm:$0xff] }
 0x4fc   : > { %2538 = vmatprep.subr.bf16.mxu1 %v3108_v15 }
 0x54b   : > { %v1642_v10 = vpop.permute.xlu0 %1641 }
 0x54c   : > { %v1659_v11 = vsub.f32 %v3540_v2, %v1642_v10 }
 0x54d   : > { %v1647_v13 = vpop.permute.xlu1 %1646 }
 0x54e   : > { %v1663_v16 = vmul.f32 1.442695, %v1659_v11  ;;  %v1660_v17 = vsub.f32 %v3544_v4, %v1647_v13 }
 0x550   : > { %2744 = vpow2.f32 %v1663_v16  ;;  %v1665_v35 = vmul.f32 1.442695, %v1660_v17 }
 0x552   : > { %2746 = vpow2.f32 %v1665_v35 }
 0x553   : > { %v1652_v18 = vpop.permute.xlu1 %1651 }
 0x554   : > { %v1661_v19 = vsub.f32 %v3548_v12, %v1652_v18 }
 0x555   : > { %v1657_v20 = vpop.permute.xlu0 %1656 }
 0x556   : > { %v1667_v21 = vmul.f32 1.442695, %v1661_v19  ;;  %v1662_v22 = vsub.f32 %v3552_v14, %v1657_v20 }
 0x558   : > { %2748 = vpow2.f32 %v1667_v21  ;;  %v1669_v23 = vmul.f32 1.442695, %v1662_v22 }
 0x55a   : > { %2750 = vpow2.f32 %v1669_v23 }
 0x55b   : > { %2752 = vpow2.f32 %v1635_v30 }
 0x55d   : > { %v2745_v24 = vpop.eup %2744  ;;  %v1707_v39 = vpop.permute.xlu0 %1706 }
 0x55e   : > { %v1679_v2 = vsel %vm1610_vm8, %v2745_v24, 0.0  ;;  %v1728_v25 = vpack.c.bf16 %v2745_v24, %v2745_v24  ;;  %v1724_v57 = vmul.f32 %v1707_v39, %v1700_v56 }
 0x55f   : > { %v2747_v26 = vpop.eup %2746  ;;  %1680 = vadd.xlane.f32.xlu1 %v1679_v2  ;;  %v1712_v32 = vpop.permute.xlu1 %1711 }
 0x560   : > { %2523 = vmatmul.mubr.msk.bf16.vlgmr.msra.gmra.mxu0 %vm1610_vm8, %v1728_v25  ;;  %v1682_v4 = vsel %vm1610_vm8, %v2747_v26, 0.0  ;;  %v1729_v27 = vpack.c.bf16 %v2747_v26, %v2747_v26  ;;  %v1725_v59 = vmul.f32 %v1712_v32, %v1701_v60 }
 0x561   : > { %2533 = vmatpush3.bf16.msra.mxu0 %v1411_v6  ;;  %1683 = vadd.xlane.f32.xlu0 %v1682_v4 }
 0x562   : > { %2529 = vmatmul.mubr.msk.bf16.vlgmr.msra.gmra.mxu1 %vm1610_vm8, %v1729_v27  ;;  %2534 = vmatprep.mubr.msk.bf16.mxu0 %vm3109_vm5, %v3108_v15 }
 0x563   : > { %2539 = vmatpush3.bf16.msra.mxu1 %v1415_v9  ;;  %2540 = vmatprep.mubr.msk.bf16.mxu1 %vm3109_vm5, %v3108_v15  ;;  %v1637_v15 = vmul.f32 1.442695, %v1630_v43  ;;  %v1674_v43 = vld [vmem:[#allocation4 + $0x18] sm:$0xff] }
 0x565   : > { %v2749_v12 = vpop.eup %2748  ;;  %2754 = vpow2.f32 %v1637_v15 }
 0x566   : > { %v1685_v14 = vsel %vm1610_vm8, %v2749_v12, 0.0  ;;  %v1730_v28 = vpack.c.bf16 %v2749_v12, %v2749_v12 }
 0x567   : > { %v2751_v29 = vpop.eup %2750  ;;  %1686 = vadd.xlane.f32.xlu0 %v1685_v14 }
 0x568   : > { %2535 = vmatmul.mubr.msk.bf16.vlgmr.msra.gmra.mxu0 %vm1610_vm8, %v1730_v28  ;;  %v1688_v31 = vsel %vm1610_vm8, %v2751_v29, 0.0  ;;  %v1731_v33 = vpack.c.bf16 %v2751_v29, %v2751_v29  ;;  %v2753_v34 = vpop.eup %2752 }
 0x569   : > { %1689 = vadd.xlane.f32.xlu1 %v1688_v31  ;;  %v1677_v50 = vmul.f32 %v2753_v34, %v1673_v41 }
 0x56a   : > { %2541 = vmatmul.mubr.msk.bf16.vlgmr.msra.gmra.mxu1 %vm1610_vm8, %v1731_v33 }
 0x572   : > { %v2755_v38 = vpop.eup %2754 }
 0x573   : > { %v1678_v53 = vmul.f32 %v2755_v38, %v1674_v43 }
 0x57a   : > { %1716 = vperm.xlu1 %2733, %v2753_v34  }
 0x57d   : > { %1721 = vperm.xlu0 %2732, %v2755_v38  }
 0x5e8   : > { %v1681_v45 = vpop.xlane.xlu1 %1680 }
 0x5e9   : > { %v1691_v46 = vadd.f32 %v1681_v45, %v1675_v44 }
 0x5ea   : > { %v1684_v48 = vpop.xlane.xlu0 %1683 }
 0x5eb   : > { %1696 = vst.msk [vmem:[#allocation4] sm:$0xff] %vm1695_vm9, %v1691_v46  ;;  %v1692_v36 = vadd.f32 %v1684_v48, %v1676_v47 }
 0x5ed   : > { %1697 = vst.msk [vmem:[#allocation4 + $0x8] sm:$0xff] %vm1695_vm9, %v1692_v36 }
 0x5f0   : > { %v1687_v51 = vpop.xlane.xlu0 %1686 }
 0x5f1   : > { %v1693_v52 = vadd.f32 %v1687_v51, %v1677_v50 }
 0x5f2   : > { %v1690_v54 = vpop.xlane.xlu1 %1689 }
 0x5f3   : > { %1698 = vst.msk [vmem:[#allocation4 + $0x10] sm:$0xff] %vm1695_vm9, %v1693_v52  ;;  %v1694_v55 = vadd.f32 %v1690_v54, %v1678_v53 }
 0x5f5   : > { %1699 = vst.msk [vmem:[#allocation4 + $0x18] sm:$0xff] %vm1695_vm9, %v1694_v55 }
 0x5f6   : > { %v1717_v0 = vpop.permute.xlu1 %1716 }
 0x5f7   : > { %v1726_v11 = vmul.f32 %v1717_v0, %v1702_v3 }
 0x5f8   : > { %v1722_v7 = vpop.permute.xlu0 %1721 }
 0x5f9   : > { %v1727_v17 = vmul.f32 %v1722_v7, %v1703_v8 }
 0x620   : > { %v1769_v58 = vpop.f32.mrf.mxu0 }
 0x621   : > { %v1904_v61 = vadd.f32 %v1769_v58, %v1724_v57 }
 0x622   : > { %v2524_v62 = vpop.f32.mrf.mxu0  ;;  %v1812_v63 = vpop.f32.mrf.mxu1 }
 0x623   : > { %1908 = vst.msk [vmem:[#allocation5] sm:$0xff] %vm1421_vm7, %v1904_v61  ;;  %v1905_v1 = vadd.f32 %v1812_v63, %v1725_v59 }
 0x624   : > { %v1772_v5 = vpop.f32.mrf.mxu0  ;;  %v2530_v6 = vpop.f32.mrf.mxu1 }
 0x625   : > { %1909 = vst.msk [vmem:[#allocation5 + $0x8] sm:$0xff] %vm1421_vm7, %v1905_v1 }
 0x626   : > { %v2525_v9 = vpop.f32.mrf.mxu0  ;;  %v1815_v10 = vpop.f32.mrf.mxu1 }
 0x628   : > { %v2531_v13 = vpop.f32.mrf.mxu1  ;;  %v1855_v16 = vpop.f32.mrf.mxu0 }
 0x629   : > { %v1906_v35 = vadd.f32 %v1855_v16, %v1726_v11 }
 0x62a   : > { %v2536_v18 = vpop.f32.mrf.mxu0  ;;  %v1898_v19 = vpop.f32.mrf.mxu1 }
 0x62b   : > { %1910 = vst.msk [vmem:[#allocation5 + $0x10] sm:$0xff] %vm1421_vm7, %v1906_v35  ;;  %v1907_v20 = vadd.f32 %v1898_v19, %v1727_v17 }
 0x62c   : > { %v1858_v21 = vpop.f32.mrf.mxu0  ;;  %v2542_v22 = vpop.f32.mrf.mxu1  ;;  %1919 = sbr.rel (%p2435_p6) target bundleno = 2077 (0x81d), region = 88 }
 0x62d   : > { %1911 = vst.msk [vmem:[#allocation5 + $0x18] sm:$0xff] %vm1421_vm7, %v1907_v20 }
 0x62e   : > { %v2537_v23 = vpop.f32.mrf.mxu0  ;;  %v1901_v24 = vpop.f32.mrf.mxu1 }
 0x630   : > { %v2543_v2 = vpop.f32.mrf.mxu1 }
 0x631   : > { %v1926_v25 = vld [vmem:[#allocation4 + $0x10] sm:$0xff]  ;;  %v1924_v26 = vld [vmem:[#allocation4] sm:$0xff]  ;;  %v1927_v4 = vld [vmem:[#allocation4 + $0x18] sm:$0xff]  ;;  %v3116_v27 = vmov 0   ;;  %v3117_v33 = vmov 0.0   ;;  %vm3118_vm10 = vmmov 0  }
 0x632   : > { %2757 = vset.pattern.permute.xlu1 %v3116_v27  ;;  %2756 = vset.pattern.permute.xlu0 %v3116_v27  ;;  %2760 = vrcp.f32 %v1926_v25  ;;  %v1925_v12 = vld [vmem:[#allocation4 + $0x8] sm:$0xff]  ;;  %v2758_v31 = vld [vmem:[#allocation17 + $0x8] sm:$0xff]   ;;  %v1922_v15 = vld [vmem:[#allocation5 + $0x10] sm:$0xff]  ;;  %vm2129_vm11 = vcmask 195584  }
 0x633   : > { %2762 = vrcp.f32 %v1924_v26  ;;  %2544 = vmatprep.subr.bf16.mxu0 %v3117_v33  ;;  %v1920_v34 = vld [vmem:[#allocation5] sm:$0xff]  ;;  %v1921_v45 = vld [vmem:[#allocation5 + $0x8] sm:$0xff]  ;;  %2548 = vmatprep.mubr.msk.bf16.mxu0 %vm3118_vm10, %v3117_v33 }
 0x634   : > { %2764 = vrcp.f32 %v1927_v4  ;;  %2545 = vmatpush3.bf16.msra.mxu0 %v2758_v31  ;;  %v1923_v42 = vld [vmem:[#allocation5 + $0x18] sm:$0xff] }
 0x635   : > { %2766 = vrcp.f32 %v1925_v12  ;;  %2546 = vmatprep.subr.bf16.mxu0 %v3117_v33  ;;  %v2759_v4 = vld [vmem:[#allocation17] sm:$0xff]  }
 0x638   : > { %2547 = vmatpush3.bf16.msra.mxu0 %v2759_v4 }
 0x63f   : > { %v2761_v14 = vpop.eup %2760 }
 0x640   : > { %v2763_v28 = vpop.eup %2762  ;;  %1944 = vperm.xlu1 %2757, %v2761_v14  }
 0x641   : > { %v2765_v29 = vpop.eup %2764  ;;  %1934 = vperm.xlu0 %2756, %v2763_v28  }
 0x642   : > { %v2767_v30 = vpop.eup %2766 }
 0x644   : > { %1949 = vperm.xlu1 %2757, %v2765_v29  }
 0x645   : > { %1939 = vperm.xlu0 %2756, %v2767_v30  }
 0x6bb   : > { %v1945_v38 = vpop.permute.xlu1 %1944 }
 0x6bc   : > { %v1954_v32 = vmul.f32 %v1945_v38, %v1922_v15  ;;  %v1935_v37 = vpop.permute.xlu0 %1934 }
 0x6bd   : > { %v1952_v39 = vmul.f32 %v1935_v37, %v1920_v34 }
 0x6be   : > { %v1964_v44 = vpack.c.bf16 %v1954_v32, %v1954_v32 }
 0x6bf   : > { %v1956_v46 = vpack.c.bf16 %v1952_v39, %v1952_v39  ;;  %v1950_v47 = vpop.permute.xlu1 %1949 }
 0x6c0   : > { %v1971_v48 = vrot.slane %v1964_v44, %v3482_v40  ;;  %v1955_v36 = vmul.f32 %v1950_v47, %v1923_v42  ;;  %v1940_v41 = vpop.permute.xlu0 %1939 }
 0x6c1   : > { %v1963_v43 = vrot.slane %v1956_v46, %v3482_v40  ;;  %v1953_v50 = vmul.f32 %v1940_v41, %v1921_v45  ;;  %v2436_v41 = vld [vmem:[%s3817_s21] ss:$0 sm:$0xff] }
 0x6c2   : > { %v1998_v51 = vpack.c.bf16 %v1955_v36, %v1955_v36 }
 0x6c3   : > { %v1972_v52 = vcombine.low %v1963_v43, %v1971_v48  ;;  %v1973_v53 = vcombine.high %v1963_v43, %v1971_v48  ;;  %v1990_v54 = vpack.c.bf16 %v1953_v50, %v1953_v50 }
 0x6c4   : > { %v2005_v55 = vrot.slane %v1998_v51, %v3482_v40 }
 0x6c5   : > { %v1980_v56 = vrot.slane %v1972_v52, %v3486_v49  ;;  %v1997_v60 = vrot.slane %v1990_v54, %v3482_v40  ;;  %v1987_v57 = vrot.slane %v1973_v53, %v3486_v49 }
 0x6c7   : > { %v2006_v58 = vcombine.low %v1997_v60, %v2005_v55  ;;  %v2007_v59 = vcombine.high %v1997_v60, %v2005_v55  ;;  %v1988_v61 = vcombine.high %v1980_v56, %v3116_v27  ;;  %v1989_v0 = vcombine.high %v1987_v57, %v3116_v27 }
 0x6c8   : > { %v2028_v1 = vshrl.u32 %v1980_v56, 16  ;;  %v2044_v9 = vshrl.u32 %v1987_v57, 16 }
 0x6c9   : > { %v2014_v62 = vrot.slane %v2006_v58, %v3486_v49  ;;  %v2021_v63 = vrot.slane %v2007_v59, %v3486_v49  ;;  %v2036_v8 = vshrl.u32 %v1988_v61, 16  ;;  %v2052_v18 = vshrl.u32 %v1989_v0, 16 }
 0x6cb   : > { %v2022_v3 = vcombine.high %v2014_v62, %v3116_v27  ;;  %v2023_v5 = vcombine.high %v2021_v63, %v3116_v27  ;;  %v2026_v6 = vpack.i.b16 %v2014_v62, %v1980_v56  ;;  %v2029_v7 = vshrl.u32 %v2014_v62, 16 }
 0x6cc   : > { %v2042_v10 = vpack.i.b16 %v2021_v63, %v1987_v57  ;;  %v2045_v11 = vshrl.u32 %v2021_v63, 16 }
 0x6cd   : > { %v2030_v13 = vpack.i.b16 %v2029_v7, %v2028_v1  ;;  %v2034_v16 = vpack.i.b16 %v2022_v3, %v1988_v61  ;;  %v2037_v17 = vshrl.u32 %v2022_v3, 16  ;;  %v2050_v35 = vpack.i.b16 %v2023_v5, %v1989_v0 }
 0x6ce   : > { %v2046_v19 = vpack.i.b16 %v2045_v11, %v2044_v9  ;;  %v2053_v20 = vshrl.u32 %v2023_v5, 16  ;;  %v2056_v21 = vcombine.low %v2026_v6, %v2042_v10 }
 0x6cf   : > { %v2038_v22 = vpack.i.b16 %v2037_v17, %v2036_v8  ;;  %v2064_v23 = vcombine.low %v2034_v16, %v2050_v35 }
 0x6d0   : > { %v2054_v24 = vpack.i.b16 %v2053_v20, %v2052_v18  ;;  %v2081_v2 = vcombine.low %v2030_v13, %v2046_v19  ;;  %v2063_v25 = vrot.slane %v2056_v21, %v3482_v40 }
 0x6d1   : > { %v2071_v26 = vrot.slane %v2064_v23, %v3482_v40 }
 0x6d2   : > { %v2089_v12 = vcombine.low %v2038_v22, %v2054_v24  ;;  %v2088_v28 = vrot.slane %v2081_v2, %v3482_v40 }
 0x6d3   : > { %v2072_v14 = vcombine.low %v2063_v25, %v2071_v26 }
 0x6d4   : > { %v2096_v29 = vrot.slane %v2089_v12, %v3482_v40 }
 0x6d5   : > { %v2079_v30 = vrot.slane %v2072_v14, %v3486_v49 }
 0x6d6   : > { %v2097_v31 = vcombine.low %v2088_v28, %v2096_v29 }
 0x6d7   : > { %v2109_v34 = vshrl.u32 %v2079_v30, 16  ;;  %v2080_v32 = vcombine.high %v2079_v30, %v3116_v27 }
 0x6d8   : > { %v2104_v15 = vrot.slane %v2097_v31, %v3486_v49 }
 0x6d9   : > { %v2115_v40 = vshrl.u32 %v2080_v32, 16 }
 0x6da   : > { %v2110_v38 = vshrl.u32 %v2104_v15, 16  ;;  %v2105_v37 = vcombine.high %v2104_v15, %v3116_v27  ;;  %v2108_v39 = vpack.i.b16 %v2104_v15, %v2079_v30 }
 0x6dc   : > { %v2111_v42 = vpack.i.b16 %v2110_v38, %v2109_v34  ;;  %v2114_v44 = vpack.i.b16 %v2105_v37, %v2080_v32  ;;  %v2116_v45 = vshrl.u32 %v2105_v37, 16 }
 0x6de   : > { %2118 = vrot.lane.b32.xlu0 %v2111_v42, %s3119_s20  ;;  %2120 = vrot.lane.b32.xlu1 %v2114_v44, %s3120_s25  ;;  %v2117_v33 = vpack.i.b16 %v2116_v45, %v2115_v40 }
 0x6e2   : > { %2122 = vrot.lane.b32.xlu0 %v2117_v33, %s3121_s19 }
 0x750   : > { %v2119_v49 = vpop.permute.xlu0 %2118  ;;  %v2121_v47 = vpop.permute.xlu1 %2120 }
 0x751   : > { %v2126_v46 = vsel %vm1421_vm7, %v2108_v39, %v2119_v49 }
 0x752   : > { %v2128_v27 = vsel %vm1610_vm8, %v2126_v46, %v2121_v47 }
 0x754   : > { %v2123_v48 = vpop.permute.xlu0 %2122 }
 0x755   : > { %v2131_v36 = vsel %vm2129_vm11, %v2128_v27, %v2123_v48 }
 0x756   : > { %2549 = vmatmul.mubr.msk.bf16.vlgmr.msra.gmra.mxu0 %vm761_vm6, %v2131_v36 }
 0x816   : > { %v2191_v43 = vpop.f32.mrf.mxu0 }
 0x817   : > { %v2192_v50 = vadd.f32 %v2436_v41, %v2191_v43 }
 0x818   : > { %v2550_v51 = vpop.f32.mrf.mxu0 }
 0x819   : > { %2197 = vst.msk [vmem:[%s3453_s1] sm:$0xff] %vm761_vm6, %v2192_v50 }
 0x81a   : > { %v2194_v52 = vpop.f32.mrf.mxu0 }
 0x81c   : > { %v2551_v53 = vpop.f32.mrf.mxu0 }
 0x81d PF: > { %s3818_s27 = sld [smem:[#allocation26_spill]]  ;;  %s2212_s28 = sshll.u32 %s3453_s1, 4  ;;  %s2213_s28 = int_to_ptr.vmem [resolvable:$true] %s2212_s28 }
 0x81e   : > { %s3819_s8 = sld [smem:[#allocation39_spill]]  ;;  %s2199_s22 = scalar_lea.sflag [#allocation8], %s3424_s4 }
 0x81f   : > { %s2956_s6 = scalar_lea.vmem %s2213_s28, 128  ;;  %p3820_p11 = scmp.ne.s32.totalorder %s3802_s24, 0 }
 0x820   : > { %p2957_p12 = scmp.ne.s32.totalorder %s2213_s28, %s2956_s6  ;;  %s3122_s2 = smov [#allocation18]  }
 0x821   : > { %s2960_s23 = sshll.u32 %s3122_s2, 4  ;;  %s2961_s23 = int_to_ptr.vmem [resolvable:$false] %s2960_s23 }
 0x822   : > { %p2958_p9 = pnand %p2957_p12, %p3820_p11  ;;  %s2962_s3 = scalar_lea.vmem %s2961_s23, 256 }
 0x823   : > { %s2441_s26 = sshll.u32 %s3818_s27, 7  ;;  %p2963_p0 = scmp.lt.s32.totalorder %s2213_s28, %s2961_s23 }
 0x824   : > { %s2210_s16 = scalar_lea.hbm %s3819_s8, %s2441_s26  ;;  %p2959_p1 = pneg %p2958_p9 }
 0x825   : > { %p2964_p13 = scmp.lt.s32.totalorder %s2962_s3, %s2956_s6 }
 0x827   : > { %p2965_p4 = por %p2964_p13, %p2963_p0 }
 0x829   : > { %p2966_p7 = pnand %p2965_p4, %p2959_p1 }
 0x82b   : > { %2969 = shalt.err (!%p2966_p7)
}
 0x82c   : > { %s2970_s20 = scalar_lea.hbm %s2210_s16, 128  ;;  %s2974_s25 = scalar_lea.hbm %s3819_s8, 256 }
 0x82d   : > { %p2971_p3 = scmp.ne.s32.totalorder %s2210_s16, %s2970_s20  ;;  %p2975_p5 = scmp.lt.s32.totalorder %s2210_s16, %s3819_s8 }
 0x82e   : > { %p2976_p8 = scmp.lt.s32.totalorder %s2974_s25, %s2970_s20 }
 0x82f   : > { %p2972_p10 = pnand %p2971_p3, %p3820_p11 }
 0x830   : > { %p2977_p6 = por %p2976_p8, %p2975_p5 }
 0x831   : > { %p2973_p2 = pneg %p2972_p10 }
 0x833   : > { %p2978_p12 = pnand %p2977_p6, %p2973_p2 }
 0x835   : > { %2981 = shalt.err (!%p2978_p12)
}
 0x836   : > { %2574 = dma.vmem_to_hbm [thread:$0]  (%p3820_p11), %s2213_s28, 128, %s2210_s16, %s2199_s22  }
 0x837 PF: > { %p2612_p9 = scmp.ge.s32.totalorder %s3088_s15, 2  ;;  %s2224_s17 = sand.u32 1, %s3060_s30  }
 0x838   : > { %p3821_p1 = scmp.ne.s32.totalorder %s3803_s5, 0  ;;  %s2225_s21 = scalar_lea.sflag [#allocation8], %s2224_s17 }
 0x83a   : > { %p2600_p0 = pnand %p2612_p9, %p3821_p1 }
 0x83c   : > { %p2601_p13 = pneg %p2600_p0 }
 0x83e   : > { %3043 = dma.done.wait (%p2601_p13), %s2225_s21, 128  }
 0x83f   : > { %3045 = vsyncadd (%p2601_p13), %s2225_s21, 4294967168  ;;  %s29_s15 = sadd.s32 1, %s3088_s15   ;;  %s3822_s27 = sld [smem:[#allocation24_spill]] }
 0x840   : > { %p26_p4 = scmp.ge.s32.totalorder %s29_s15, 6   ;;  %s3823_s24 = sld [smem:[#allocation28_spill]] }
 0x841   : > { %s3824_s26 = sld [smem:[#allocation29_spill]]  ;;  %s3825_s28 = smov %s3056_s29 }
 0x842   : > { %s3826_s29 = smov %s3305_s12  ;;  %s3827_s30 = smov %s3064_s9 }
 0x843   : > { %s3828_s9 = smov %s3068_s10  ;;  %s3829_s10 = smov %s3370_s18 }
 0x844   : > { %s3830_s11 = smov %s3080_s13  ;;  %s3831_s12 = smov %s3084_s14 }
 0x845   :  { %28 = sbr.rel (!%p26_p4) target bundleno = 23 (0x17), region = 145 }
 0x846   : > { %s3832_s13 = smov %s3823_s24 }
 0x847   : > { %s3833_s14 = smov %s3824_s26 }
 0x84a   :  { %2230 = vsyncpa [#allocation7], 1 }
 0x84b   :  { %2232 = vsyncpa [#allocation7 + $0x1], 1 }
 0x84c   :  { %2233 = vsyncpa [#allocation10], 1 }
 0x84d   :  { %2235 = vsyncpa [#allocation10 + $0x1], 1 }
 0x84e   :  { %2236 = vsyncpa [#allocation13], 1 }
 0x84f   :  { %2237 = vsyncpa [#allocation16], 1 }
 0x850   :  { %2238 = vsyncpa [#allocation8], 1 }
 0x851   :  { %2240 = vsyncpa [#allocation8 + $0x1], 1 }

</bundles_post_ra>
